<compile_context>
chip_gen: v6e
topology: v6e:2x2x1
jax: 0.10.0
libtpu: 0.0.40
codegen_flags: <defaults>
</compile_context>

<pallas_src>
import functools

import jax
import jax.numpy as jnp
from jax.experimental import pallas as pl
from jax.experimental.pallas import tpu as pltpu

EPS = 1e-5  # adaILN default eps


def _roll(v, k, n):
    """np.roll semantics along the lane axis: result[:, p] = v[:, (p - k) % n]."""
    return pltpu.roll(v, k % n, 1)


def _ada_iln(y, rho_in, rho_ln, gamma, beta, C, HW):
    """adaILN on the flat (C, HW) layout.

    rho_in/rho_ln/gamma/beta are (C, 1) columns.  Variances are unbiased
    (ddof=1), matching torch.var defaults inside adaILN.
    """
    in_mean = jnp.mean(y, axis=1, keepdims=True)                          # (C,1)
    d_in = y - in_mean
    in_var = jnp.sum(d_in * d_in, axis=1, keepdims=True) * (1.0 / (HW - 1))
    out_in = d_in * jax.lax.rsqrt(in_var + EPS)
    ln_mean = jnp.mean(y, keepdims=True)                                  # (1,1)
    d_ln = y - ln_mean
    ln_var = jnp.sum(d_ln * d_ln, keepdims=True) * (1.0 / (C * HW - 1))
    out_ln = d_ln * jax.lax.rsqrt(ln_var + EPS)
    return (rho_in * out_in + rho_ln * out_ln) * gamma + beta


def _block_kernel(x_ref, w_ref, p_ref, o_ref, *, N, C, H, W):
    HW = H * W

    # Flat-layout masks for the reflect-pad edge fixups (hoisted, built once).
    pos = jax.lax.broadcasted_iota(jnp.int32, (1, HW), 1)
    colm = pos % W
    top, bot = pos < W, pos >= HW - W
    lft, rgt = colm == 0, colm == W - 1

    def taps9(v):
        """The 9 reflect-padded 3x3 tap planes of v (C, HW), order ky*3+kx."""
        up = jnp.where(top, _roll(v, -W, HW), _roll(v, W, HW))      # ky = 0
        dn = jnp.where(bot, _roll(v, W, HW), _roll(v, -W, HW))      # ky = 2
        planes = []
        for r in (up, v, dn):                                       # ky = 0,1,2
            lf = jnp.where(lft, _roll(r, -1, HW), _roll(r, 1, HW))  # kx = 0
            rt = jnp.where(rgt, _roll(r, 1, HW), _roll(r, -1, HW))  # kx = 2
            planes += [lf, r, rt]                                   # kx = 0,1,2
        return planes

    def conv3x3(v, s, bias_col):
        """Reflect-padded 3x3 conv; exact-f32 rank-1 channel mix on the VPU."""
        acc = None
        for t, tap in enumerate(taps9(v)):
            wt = w_ref[s, t]                                    # (C_out, C_in)
            for ci in range(C):
                term = wt[:, ci:ci + 1] * tap[ci:ci + 1, :]     # (C_out, HW)
                acc = term if acc is None else acc + term
        return acc + bias_col

    p = p_ref[...].astype(jnp.float32)          # (C, 6 + 2N): all tiny params
    b1c, b2c = p[:, 0:1], p[:, 1:2]
    r1_in, r1_ln = p[:, 2:3], p[:, 3:4]
    r2_in, r2_ln = p[:, 4:5], p[:, 5:6]

    for n in range(N):                          # N is tiny and static
        gamma = p[:, 6 + n:7 + n]
        beta = p[:, 6 + N + n:7 + N + n]
        xf = x_ref[n].astype(jnp.float32)       # (C, HW), lane-dense

        # Stage 1: reflect-pad -> conv1 -> adaILN -> ReLU  (all stays in vregs)
        h = conv3x3(xf, 0, b1c)
        h = _ada_iln(h, r1_in, r1_ln, gamma, beta, C, HW)
        h = jnp.maximum(h, 0.0)

        # Stage 2: reflect-pad -> conv2 -> adaILN
        h = conv3x3(h, 1, b2c)
        h = _ada_iln(h, r2_in, r2_ln, gamma, beta, C, HW)

        # Residual add + single lane-dense store of the whole sample.
        o_ref[n] = (xf + h).astype(o_ref.dtype)


@jax.jit
def resnet_adailn_block(x, gamma, beta, w1, b1, w2, b2, rho1, rho2):
    """x: (N,C,H,W) f32.  gamma,beta: (N,C).  w*: (C,C,3,3) OIHW.  b*: (C,).
    rho*: (C,2) logits (softmax over last dim -> [rho_IN, rho_LN])."""
    N, C, H, W = x.shape
    HW = H * W

    # Parameter-only glue (tiny / free): tap-major weight layout, rho softmax,
    # and packing every per-channel parameter into ONE (C, 6+2N) operand.
    w_mat = jnp.stack([w1, w2]).transpose(0, 3, 4, 1, 2).reshape(2, 9, C, C)
    r1 = jax.nn.softmax(rho1, axis=-1)          # (C, 2): [rho_IN, rho_LN]
    r2 = jax.nn.softmax(rho2, axis=-1)
    params = jnp.concatenate(
        [b1[:, None], b2[:, None], r1, r2, gamma.T, beta.T], axis=1)
    x_flat = x.reshape(N, C, HW)                # free: NCHW is contiguous

    kernel = functools.partial(_block_kernel, N=N, C=C, H=H, W=W)
    out = pl.pallas_call(
        kernel,
        out_shape=jax.ShapeDtypeStruct((N, C, HW), jnp.float32),
        grid=(1,),
        in_specs=[
            pl.BlockSpec((N, C, HW), lambda i: (0, 0, 0)),        # x (flat)
            pl.BlockSpec((2, 9, C, C), lambda i: (0, 0, 0, 0)),   # both convs
            pl.BlockSpec((C, 6 + 2 * N), lambda i: (0, 0)),       # all params
        ],
        out_specs=pl.BlockSpec((N, C, HW), lambda i: (0, 0, 0)),
        compiler_params=pltpu.CompilerParams(
            dimension_semantics=("arbitrary",)),
    )(x_flat, w_mat, params)
    return out.reshape(N, C, H, W)


# ----------------------------------------------------------------------------
# Pure-JAX reference mirroring the PyTorch module
# ----------------------------------------------------------------------------
def _reference_forward(x, gamma, beta, w1, b1, w2, b2, rho1, rho2):
    def conv(inp, w, b):
        xp = jnp.pad(inp, ((0, 0), (0, 0), (1, 1), (1, 1)), mode="reflect")
        y = jax.lax.conv_general_dilated(
            xp, w, (1, 1), "VALID",
            dimension_numbers=("NCHW", "OIHW", "NCHW"),
            precision=jax.lax.Precision.HIGHEST)
        return y + b[None, :, None, None]

    def ada_iln(y, rho_logits):
        in_mean = y.mean(axis=(2, 3), keepdims=True)
        in_var = y.var(axis=(2, 3), keepdims=True, ddof=1)
        out_in = (y - in_mean) / jnp.sqrt(in_var + EPS)
        ln_mean = y.mean(axis=(1, 2, 3), keepdims=True)
        ln_var = y.var(axis=(1, 2, 3), keepdims=True, ddof=1)
        out_ln = (y - ln_mean) / jnp.sqrt(ln_var + EPS)
        r = jax.nn.softmax(rho_logits, axis=-1)
        r0 = r[:, 0][None, :, None, None]
        r1 = r[:, 1][None, :, None, None]
        out = r0 * out_in + r1 * out_ln
        return out * gamma[:, :, None, None] + beta[:, :, None, None]

    h = jnp.maximum(ada_iln(conv(x, w1, b1), rho1), 0.0)
    h = ada_iln(conv(h, w2, b2), rho2)
    return h + x


if __name__ == "__main__":
    N, C, H, W = 2, 4, 16, 16   # dim=4, 16x16 spatial
    use_bias = True

    key = jax.random.PRNGKey(0)
    kx, kg, kb, kw1, kb1, kw2, kb2, kr1, kr2 = jax.random.split(key, 9)

    x = jax.random.normal(kx, (N, C, H, W), jnp.float32)
    gamma = jax.random.normal(kg, (N, C), jnp.float32)
    beta = jax.random.normal(kb, (N, C), jnp.float32)
    w1 = jax.random.normal(kw1, (C, C, 3, 3), jnp.float32) * 0.1   # OIHW
    w2 = jax.random.normal(kw2, (C, C, 3, 3), jnp.float32) * 0.1
    b1 = (jax.random.normal(kb1, (C,), jnp.float32) * 0.1
          if use_bias else jnp.zeros((C,), jnp.float32))
    b2 = (jax.random.normal(kb2, (C,), jnp.float32) * 0.1
          if use_bias else jnp.zeros((C,), jnp.float32))
    # adaILN rho logits: module init (3.2, 1.0) plus a small perturbation so
    # the per-channel blend is actually exercised.
    rho_init = jnp.stack([jnp.full((C,), 3.2, jnp.float32),
                          jnp.full((C,), 1.0, jnp.float32)], axis=1)
    rho1 = rho_init + 0.1 * jax.random.normal(kr1, (C, 2), jnp.float32)
    rho2 = rho_init + 0.1 * jax.random.normal(kr2, (C, 2), jnp.float32)

    out = jax.block_until_ready(
        resnet_adailn_block(x, gamma, beta, w1, b1, w2, b2, rho1, rho2))
    ref = jax.block_until_ready(
        _reference_forward(x, gamma, beta, w1, b1, w2, b2, rho1, rho2))

    assert out.shape == (N, C, H, W)
    max_err = float(jnp.max(jnp.abs(out - ref)))
    assert jnp.allclose(out, ref, atol=1e-4, rtol=1e-4), max_err

    print("KERNEL_OK")
</pallas_src>

<mosaic_0001>
module attributes {stable_mosaic.version = 11 : i64} {
  func.func @_block_kernel(%arg0: i32, %arg1: memref<2x4x256xf32, #tpu.memory_space<vmem>>, %arg2: memref<2x9x4x4xf32, #tpu.memory_space<vmem>>, %arg3: memref<4x10xf32, #tpu.memory_space<vmem>>, %arg4: memref<2x4x256xf32, #tpu.memory_space<vmem>>) attributes {dimension_semantics = [#tpu.dimension_semantics<arbitrary>], iteration_bounds = array<i64: 1>, scalar_prefetch = 0 : i64, scratch_operands = 0 : i64, tpu.core_type = #tpu.core_type<tc>, window_params = [{pipeline_mode = #tpu.pipeline_mode<synchronous>, transform_indices = @transform_0, window_bounds = array<i64: 2, 4, 256>}, {pipeline_mode = #tpu.pipeline_mode<synchronous>, transform_indices = @transform_1, window_bounds = array<i64: 2, 9, 4, 4>}, {pipeline_mode = #tpu.pipeline_mode<synchronous>, transform_indices = @transform_2, window_bounds = array<i64: 4, 10>}, {pipeline_mode = #tpu.pipeline_mode<synchronous>, transform_indices = @transform_3, window_bounds = array<i64: 2, 4, 256>}]} {
    %0 = tpu.iota {dimensions = array<i32: 1>} : vector<1x256xi32>
    %c16_i32 = arith.constant 16 : i32
    %c0_i32 = arith.constant 0 : i32
    %1 = arith.cmpi eq, %c16_i32, %c0_i32 : i32
    %c1_i32 = arith.constant 1 : i32
    %2 = arith.select %1, %c1_i32, %c16_i32 : i32
    %3 = vector.broadcast %2 : i32 to vector<1x256xi32>
    %4 = arith.remsi %0, %3 : vector<1x256xi32>
    %c0_i32_0 = arith.constant 0 : i32
    %5 = vector.broadcast %c0_i32_0 : i32 to vector<1x256xi32>
    %6 = arith.cmpi ne, %4, %5 : vector<1x256xi32>
    %c0_i32_1 = arith.constant 0 : i32
    %7 = vector.broadcast %c0_i32_1 : i32 to vector<1x256xi32>
    %8 = arith.cmpi slt, %4, %7 : vector<1x256xi32>
    %c0_i32_2 = arith.constant 0 : i32
    %9 = arith.cmpi slt, %2, %c0_i32_2 : i32
    %10 = vector.broadcast %9 : i1 to vector<1x256xi1>
    %11 = vector.broadcast %10 : vector<1x256xi1> to vector<1x256xi1>
    %12 = arith.xori %8, %11 : vector<1x256xi1>
    %13 = arith.andi %12, %6 : vector<1x256xi1>
    %14 = vector.broadcast %2 : i32 to vector<1x256xi32>
    %15 = arith.addi %4, %14 : vector<1x256xi32>
    %16 = arith.select %13, %15, %4 : vector<1x256xi1>, vector<1x256xi32>
    %c16_i32_3 = arith.constant 16 : i32
    %17 = vector.broadcast %c16_i32_3 : i32 to vector<1x256xi32>
    %18 = arith.cmpi slt, %0, %17 : vector<1x256xi32>
    %c240_i32 = arith.constant 240 : i32
    %19 = vector.broadcast %c240_i32 : i32 to vector<1x256xi32>
    %20 = arith.cmpi sge, %0, %19 : vector<1x256xi32>
    %c0_i32_4 = arith.constant 0 : i32
    %21 = vector.broadcast %c0_i32_4 : i32 to vector<1x256xi32>
    %22 = arith.cmpi eq, %16, %21 : vector<1x256xi32>
    %c15_i32 = arith.constant 15 : i32
    %23 = vector.broadcast %c15_i32 : i32 to vector<1x256xi32>
    %24 = arith.cmpi eq, %16, %23 : vector<1x256xi32>
    %c0 = arith.constant 0 : index
    %c0_5 = arith.constant 0 : index
    %25 = vector.load %arg3[%c0, %c0_5] : memref<4x10xf32, #tpu.memory_space<vmem>>, vector<4x10xf32>
    %26 = vector.extract_strided_slice %25 {offsets = [0, 0], sizes = [4, 1], strides = [1, 1]} : vector<4x10xf32> to vector<4x1xf32>
    %27 = vector.extract_strided_slice %25 {offsets = [0, 1], sizes = [4, 1], strides = [1, 1]} : vector<4x10xf32> to vector<4x1xf32>
    %28 = vector.extract_strided_slice %25 {offsets = [0, 2], sizes = [4, 1], strides = [1, 1]} : vector<4x10xf32> to vector<4x1xf32>
    %29 = vector.extract_strided_slice %25 {offsets = [0, 3], sizes = [4, 1], strides = [1, 1]} : vector<4x10xf32> to vector<4x1xf32>
    %30 = vector.extract_strided_slice %25 {offsets = [0, 4], sizes = [4, 1], strides = [1, 1]} : vector<4x10xf32> to vector<4x1xf32>
    %31 = vector.extract_strided_slice %25 {offsets = [0, 5], sizes = [4, 1], strides = [1, 1]} : vector<4x10xf32> to vector<4x1xf32>
    %32 = vector.extract_strided_slice %25 {offsets = [0, 6], sizes = [4, 1], strides = [1, 1]} : vector<4x10xf32> to vector<4x1xf32>
    %33 = vector.extract_strided_slice %25 {offsets = [0, 8], sizes = [4, 1], strides = [1, 1]} : vector<4x10xf32> to vector<4x1xf32>
    %c0_6 = arith.constant 0 : index
    %c0_7 = arith.constant 0 : index
    %c0_8 = arith.constant 0 : index
    %34 = vector.load %arg1[%c0_6, %c0_7, %c0_8] : memref<2x4x256xf32, #tpu.memory_space<vmem>>, vector<1x4x256xf32>
    %35 = vector.shape_cast %34 : vector<1x4x256xf32> to vector<4x256xf32>
    %c240_i32_9 = arith.constant 240 : i32
    %36 = tpu.dynamic_rotate %35 by %c240_i32_9 dim 1 : vector<4x256xf32>, i32 -> vector<4x256xf32>
    %c16_i32_10 = arith.constant 16 : i32
    %37 = tpu.dynamic_rotate %35 by %c16_i32_10 dim 1 : vector<4x256xf32>, i32 -> vector<4x256xf32>
    %38 = vector.shape_cast %18 : vector<1x256xi1> to vector<1x256xi1>
    %39 = vector.broadcast %38 : vector<1x256xi1> to vector<4x256xi1>
    %40 = arith.select %39, %36, %37 : vector<4x256xi1>, vector<4x256xf32>
    %c16_i32_11 = arith.constant 16 : i32
    %41 = tpu.dynamic_rotate %35 by %c16_i32_11 dim 1 : vector<4x256xf32>, i32 -> vector<4x256xf32>
    %c240_i32_12 = arith.constant 240 : i32
    %42 = tpu.dynamic_rotate %35 by %c240_i32_12 dim 1 : vector<4x256xf32>, i32 -> vector<4x256xf32>
    %43 = vector.shape_cast %20 : vector<1x256xi1> to vector<1x256xi1>
    %44 = vector.broadcast %43 : vector<1x256xi1> to vector<4x256xi1>
    %45 = arith.select %44, %41, %42 : vector<4x256xi1>, vector<4x256xf32>
    %c255_i32 = arith.constant 255 : i32
    %46 = tpu.dynamic_rotate %40 by %c255_i32 dim 1 : vector<4x256xf32>, i32 -> vector<4x256xf32>
    %c1_i32_13 = arith.constant 1 : i32
    %47 = tpu.dynamic_rotate %40 by %c1_i32_13 dim 1 : vector<4x256xf32>, i32 -> vector<4x256xf32>
    %48 = vector.shape_cast %22 : vector<1x256xi1> to vector<1x256xi1>
    %49 = vector.broadcast %48 : vector<1x256xi1> to vector<4x256xi1>
    %50 = arith.select %49, %46, %47 : vector<4x256xi1>, vector<4x256xf32>
    %c1_i32_14 = arith.constant 1 : i32
    %51 = tpu.dynamic_rotate %40 by %c1_i32_14 dim 1 : vector<4x256xf32>, i32 -> vector<4x256xf32>
    %c255_i32_15 = arith.constant 255 : i32
    %52 = tpu.dynamic_rotate %40 by %c255_i32_15 dim 1 : vector<4x256xf32>, i32 -> vector<4x256xf32>
    %53 = vector.shape_cast %24 : vector<1x256xi1> to vector<1x256xi1>
    %54 = vector.broadcast %53 : vector<1x256xi1> to vector<4x256xi1>
    %55 = arith.select %54, %51, %52 : vector<4x256xi1>, vector<4x256xf32>
    %c255_i32_16 = arith.constant 255 : i32
    %56 = tpu.dynamic_rotate %35 by %c255_i32_16 dim 1 : vector<4x256xf32>, i32 -> vector<4x256xf32>
    %c1_i32_17 = arith.constant 1 : i32
    %57 = tpu.dynamic_rotate %35 by %c1_i32_17 dim 1 : vector<4x256xf32>, i32 -> vector<4x256xf32>
    %58 = vector.shape_cast %22 : vector<1x256xi1> to vector<1x256xi1>
    %59 = vector.broadcast %58 : vector<1x256xi1> to vector<4x256xi1>
    %60 = arith.select %59, %56, %57 : vector<4x256xi1>, vector<4x256xf32>
    %c1_i32_18 = arith.constant 1 : i32
    %61 = tpu.dynamic_rotate %35 by %c1_i32_18 dim 1 : vector<4x256xf32>, i32 -> vector<4x256xf32>
    %c255_i32_19 = arith.constant 255 : i32
    %62 = tpu.dynamic_rotate %35 by %c255_i32_19 dim 1 : vector<4x256xf32>, i32 -> vector<4x256xf32>
    %63 = vector.shape_cast %24 : vector<1x256xi1> to vector<1x256xi1>
    %64 = vector.broadcast %63 : vector<1x256xi1> to vector<4x256xi1>
    %65 = arith.select %64, %61, %62 : vector<4x256xi1>, vector<4x256xf32>
    %c255_i32_20 = arith.constant 255 : i32
    %66 = tpu.dynamic_rotate %45 by %c255_i32_20 dim 1 : vector<4x256xf32>, i32 -> vector<4x256xf32>
    %c1_i32_21 = arith.constant 1 : i32
    %67 = tpu.dynamic_rotate %45 by %c1_i32_21 dim 1 : vector<4x256xf32>, i32 -> vector<4x256xf32>
    %68 = vector.shape_cast %22 : vector<1x256xi1> to vector<1x256xi1>
    %69 = vector.broadcast %68 : vector<1x256xi1> to vector<4x256xi1>
    %70 = arith.select %69, %66, %67 : vector<4x256xi1>, vector<4x256xf32>
    %c1_i32_22 = arith.constant 1 : i32
    %71 = tpu.dynamic_rotate %45 by %c1_i32_22 dim 1 : vector<4x256xf32>, i32 -> vector<4x256xf32>
    %c255_i32_23 = arith.constant 255 : i32
    %72 = tpu.dynamic_rotate %45 by %c255_i32_23 dim 1 : vector<4x256xf32>, i32 -> vector<4x256xf32>
    %73 = vector.shape_cast %24 : vector<1x256xi1> to vector<1x256xi1>
    %74 = vector.broadcast %73 : vector<1x256xi1> to vector<4x256xi1>
    %75 = arith.select %74, %71, %72 : vector<4x256xi1>, vector<4x256xf32>
    %c0_24 = arith.constant 0 : index
    %c0_25 = arith.constant 0 : index
    %c0_26 = arith.constant 0 : index
    %c0_27 = arith.constant 0 : index
    %76 = vector.load %arg2[%c0_24, %c0_25, %c0_26, %c0_27] : memref<2x9x4x4xf32, #tpu.memory_space<vmem>>, vector<1x1x4x4xf32>
    %77 = vector.shape_cast %76 : vector<1x1x4x4xf32> to vector<4x4xf32>
    %78 = vector.extract_strided_slice %77 {offsets = [0, 0], sizes = [4, 1], strides = [1, 1]} : vector<4x4xf32> to vector<4x1xf32>
    %79 = vector.extract_strided_slice %50 {offsets = [0, 0], sizes = [1, 256], strides = [1, 1]} : vector<4x256xf32> to vector<1x256xf32>
    %80 = vector.broadcast %78 : vector<4x1xf32> to vector<4x256xf32>
    %81 = vector.broadcast %79 : vector<1x256xf32> to vector<4x256xf32>
    %82 = arith.mulf %80, %81 : vector<4x256xf32>
    %83 = vector.extract_strided_slice %77 {offsets = [0, 1], sizes = [4, 1], strides = [1, 1]} : vector<4x4xf32> to vector<4x1xf32>
    %84 = vector.extract_strided_slice %50 {offsets = [1, 0], sizes = [1, 256], strides = [1, 1]} : vector<4x256xf32> to vector<1x256xf32>
    %85 = vector.broadcast %83 : vector<4x1xf32> to vector<4x256xf32>
    %86 = vector.broadcast %84 : vector<1x256xf32> to vector<4x256xf32>
    %87 = arith.mulf %85, %86 : vector<4x256xf32>
    %88 = arith.addf %82, %87 : vector<4x256xf32>
    %89 = vector.extract_strided_slice %77 {offsets = [0, 2], sizes = [4, 1], strides = [1, 1]} : vector<4x4xf32> to vector<4x1xf32>
    %90 = vector.extract_strided_slice %50 {offsets = [2, 0], sizes = [1, 256], strides = [1, 1]} : vector<4x256xf32> to vector<1x256xf32>
    %91 = vector.broadcast %89 : vector<4x1xf32> to vector<4x256xf32>
    %92 = vector.broadcast %90 : vector<1x256xf32> to vector<4x256xf32>
    %93 = arith.mulf %91, %92 : vector<4x256xf32>
    %94 = arith.addf %88, %93 : vector<4x256xf32>
    %95 = vector.extract_strided_slice %77 {offsets = [0, 3], sizes = [4, 1], strides = [1, 1]} : vector<4x4xf32> to vector<4x1xf32>
    %96 = vector.extract_strided_slice %50 {offsets = [3, 0], sizes = [1, 256], strides = [1, 1]} : vector<4x256xf32> to vector<1x256xf32>
    %97 = vector.broadcast %95 : vector<4x1xf32> to vector<4x256xf32>
    %98 = vector.broadcast %96 : vector<1x256xf32> to vector<4x256xf32>
    %99 = arith.mulf %97, %98 : vector<4x256xf32>
    %100 = arith.addf %94, %99 : vector<4x256xf32>
    %c0_28 = arith.constant 0 : index
    %c1 = arith.constant 1 : index
    %c0_29 = arith.constant 0 : index
    %c0_30 = arith.constant 0 : index
    %101 = vector.load %arg2[%c0_28, %c1, %c0_29, %c0_30] : memref<2x9x4x4xf32, #tpu.memory_space<vmem>>, vector<1x1x4x4xf32>
    %102 = vector.shape_cast %101 : vector<1x1x4x4xf32> to vector<4x4xf32>
    %103 = vector.extract_strided_slice %102 {offsets = [0, 0], sizes = [4, 1], strides = [1, 1]} : vector<4x4xf32> to vector<4x1xf32>
    %104 = vector.extract_strided_slice %40 {offsets = [0, 0], sizes = [1, 256], strides = [1, 1]} : vector<4x256xf32> to vector<1x256xf32>
    %105 = vector.broadcast %103 : vector<4x1xf32> to vector<4x256xf32>
    %106 = vector.broadcast %104 : vector<1x256xf32> to vector<4x256xf32>
    %107 = arith.mulf %105, %106 : vector<4x256xf32>
    %108 = arith.addf %100, %107 : vector<4x256xf32>
    %109 = vector.extract_strided_slice %102 {offsets = [0, 1], sizes = [4, 1], strides = [1, 1]} : vector<4x4xf32> to vector<4x1xf32>
    %110 = vector.extract_strided_slice %40 {offsets = [1, 0], sizes = [1, 256], strides = [1, 1]} : vector<4x256xf32> to vector<1x256xf32>
    %111 = vector.broadcast %109 : vector<4x1xf32> to vector<4x256xf32>
    %112 = vector.broadcast %110 : vector<1x256xf32> to vector<4x256xf32>
    %113 = arith.mulf %111, %112 : vector<4x256xf32>
    %114 = arith.addf %108, %113 : vector<4x256xf32>
    %115 = vector.extract_strided_slice %102 {offsets = [0, 2], sizes = [4, 1], strides = [1, 1]} : vector<4x4xf32> to vector<4x1xf32>
    %116 = vector.extract_strided_slice %40 {offsets = [2, 0], sizes = [1, 256], strides = [1, 1]} : vector<4x256xf32> to vector<1x256xf32>
    %117 = vector.broadcast %115 : vector<4x1xf32> to vector<4x256xf32>
    %118 = vector.broadcast %116 : vector<1x256xf32> to vector<4x256xf32>
    %119 = arith.mulf %117, %118 : vector<4x256xf32>
    %120 = arith.addf %114, %119 : vector<4x256xf32>
    %121 = vector.extract_strided_slice %102 {offsets = [0, 3], sizes = [4, 1], strides = [1, 1]} : vector<4x4xf32> to vector<4x1xf32>
    %122 = vector.extract_strided_slice %40 {offsets = [3, 0], sizes = [1, 256], strides = [1, 1]} : vector<4x256xf32> to vector<1x256xf32>
    %123 = vector.broadcast %121 : vector<4x1xf32> to vector<4x256xf32>
    %124 = vector.broadcast %122 : vector<1x256xf32> to vector<4x256xf32>
    %125 = arith.mulf %123, %124 : vector<4x256xf32>
    %126 = arith.addf %120, %125 : vector<4x256xf32>
    %c0_31 = arith.constant 0 : index
    %c2 = arith.constant 2 : index
    %c0_32 = arith.constant 0 : index
    %c0_33 = arith.constant 0 : index
    %127 = vector.load %arg2[%c0_31, %c2, %c0_32, %c0_33] : memref<2x9x4x4xf32, #tpu.memory_space<vmem>>, vector<1x1x4x4xf32>
    %128 = vector.shape_cast %127 : vector<1x1x4x4xf32> to vector<4x4xf32>
    %129 = vector.extract_strided_slice %128 {offsets = [0, 0], sizes = [4, 1], strides = [1, 1]} : vector<4x4xf32> to vector<4x1xf32>
    %130 = vector.extract_strided_slice %55 {offsets = [0, 0], sizes = [1, 256], strides = [1, 1]} : vector<4x256xf32> to vector<1x256xf32>
    %131 = vector.broadcast %129 : vector<4x1xf32> to vector<4x256xf32>
    %132 = vector.broadcast %130 : vector<1x256xf32> to vector<4x256xf32>
    %133 = arith.mulf %131, %132 : vector<4x256xf32>
    %134 = arith.addf %126, %133 : vector<4x256xf32>
    %135 = vector.extract_strided_slice %128 {offsets = [0, 1], sizes = [4, 1], strides = [1, 1]} : vector<4x4xf32> to vector<4x1xf32>
    %136 = vector.extract_strided_slice %55 {offsets = [1, 0], sizes = [1, 256], strides = [1, 1]} : vector<4x256xf32> to vector<1x256xf32>
    %137 = vector.broadcast %135 : vector<4x1xf32> to vector<4x256xf32>
    %138 = vector.broadcast %136 : vector<1x256xf32> to vector<4x256xf32>
    %139 = arith.mulf %137, %138 : vector<4x256xf32>
    %140 = arith.addf %134, %139 : vector<4x256xf32>
    %141 = vector.extract_strided_slice %128 {offsets = [0, 2], sizes = [4, 1], strides = [1, 1]} : vector<4x4xf32> to vector<4x1xf32>
    %142 = vector.extract_strided_slice %55 {offsets = [2, 0], sizes = [1, 256], strides = [1, 1]} : vector<4x256xf32> to vector<1x256xf32>
    %143 = vector.broadcast %141 : vector<4x1xf32> to vector<4x256xf32>
    %144 = vector.broadcast %142 : vector<1x256xf32> to vector<4x256xf32>
    %145 = arith.mulf %143, %144 : vector<4x256xf32>
    %146 = arith.addf %140, %145 : vector<4x256xf32>
    %147 = vector.extract_strided_slice %128 {offsets = [0, 3], sizes = [4, 1], strides = [1, 1]} : vector<4x4xf32> to vector<4x1xf32>
    %148 = vector.extract_strided_slice %55 {offsets = [3, 0], sizes = [1, 256], strides = [1, 1]} : vector<4x256xf32> to vector<1x256xf32>
    %149 = vector.broadcast %147 : vector<4x1xf32> to vector<4x256xf32>
    %150 = vector.broadcast %148 : vector<1x256xf32> to vector<4x256xf32>
    %151 = arith.mulf %149, %150 : vector<4x256xf32>
    %152 = arith.addf %146, %151 : vector<4x256xf32>
    %c0_34 = arith.constant 0 : index
    %c3 = arith.constant 3 : index
    %c0_35 = arith.constant 0 : index
    %c0_36 = arith.constant 0 : index
    %153 = vector.load %arg2[%c0_34, %c3, %c0_35, %c0_36] : memref<2x9x4x4xf32, #tpu.memory_space<vmem>>, vector<1x1x4x4xf32>
    %154 = vector.shape_cast %153 : vector<1x1x4x4xf32> to vector<4x4xf32>
    %155 = vector.extract_strided_slice %154 {offsets = [0, 0], sizes = [4, 1], strides = [1, 1]} : vector<4x4xf32> to vector<4x1xf32>
    %156 = vector.extract_strided_slice %60 {offsets = [0, 0], sizes = [1, 256], strides = [1, 1]} : vector<4x256xf32> to vector<1x256xf32>
    %157 = vector.broadcast %155 : vector<4x1xf32> to vector<4x256xf32>
    %158 = vector.broadcast %156 : vector<1x256xf32> to vector<4x256xf32>
    %159 = arith.mulf %157, %158 : vector<4x256xf32>
    %160 = arith.addf %152, %159 : vector<4x256xf32>
    %161 = vector.extract_strided_slice %154 {offsets = [0, 1], sizes = [4, 1], strides = [1, 1]} : vector<4x4xf32> to vector<4x1xf32>
    %162 = vector.extract_strided_slice %60 {offsets = [1, 0], sizes = [1, 256], strides = [1, 1]} : vector<4x256xf32> to vector<1x256xf32>
    %163 = vector.broadcast %161 : vector<4x1xf32> to vector<4x256xf32>
    %164 = vector.broadcast %162 : vector<1x256xf32> to vector<4x256xf32>
    %165 = arith.mulf %163, %164 : vector<4x256xf32>
    %166 = arith.addf %160, %165 : vector<4x256xf32>
    %167 = vector.extract_strided_slice %154 {offsets = [0, 2], sizes = [4, 1], strides = [1, 1]} : vector<4x4xf32> to vector<4x1xf32>
    %168 = vector.extract_strided_slice %60 {offsets = [2, 0], sizes = [1, 256], strides = [1, 1]} : vector<4x256xf32> to vector<1x256xf32>
    %169 = vector.broadcast %167 : vector<4x1xf32> to vector<4x256xf32>
    %170 = vector.broadcast %168 : vector<1x256xf32> to vector<4x256xf32>
    %171 = arith.mulf %169, %170 : vector<4x256xf32>
    %172 = arith.addf %166, %171 : vector<4x256xf32>
    %173 = vector.extract_strided_slice %154 {offsets = [0, 3], sizes = [4, 1], strides = [1, 1]} : vector<4x4xf32> to vector<4x1xf32>
    %174 = vector.extract_strided_slice %60 {offsets = [3, 0], sizes = [1, 256], strides = [1, 1]} : vector<4x256xf32> to vector<1x256xf32>
    %175 = vector.broadcast %173 : vector<4x1xf32> to vector<4x256xf32>
    %176 = vector.broadcast %174 : vector<1x256xf32> to vector<4x256xf32>
    %177 = arith.mulf %175, %176 : vector<4x256xf32>
    %178 = arith.addf %172, %177 : vector<4x256xf32>
    %c0_37 = arith.constant 0 : index
    %c4 = arith.constant 4 : index
    %c0_38 = arith.constant 0 : index
    %c0_39 = arith.constant 0 : index
    %179 = vector.load %arg2[%c0_37, %c4, %c0_38, %c0_39] : memref<2x9x4x4xf32, #tpu.memory_space<vmem>>, vector<1x1x4x4xf32>
    %180 = vector.shape_cast %179 : vector<1x1x4x4xf32> to vector<4x4xf32>
    %181 = vector.extract_strided_slice %180 {offsets = [0, 0], sizes = [4, 1], strides = [1, 1]} : vector<4x4xf32> to vector<4x1xf32>
    %182 = vector.extract_strided_slice %35 {offsets = [0, 0], sizes = [1, 256], strides = [1, 1]} : vector<4x256xf32> to vector<1x256xf32>
    %183 = vector.broadcast %181 : vector<4x1xf32> to vector<4x256xf32>
    %184 = vector.broadcast %182 : vector<1x256xf32> to vector<4x256xf32>
    %185 = arith.mulf %183, %184 : vector<4x256xf32>
    %186 = arith.addf %178, %185 : vector<4x256xf32>
    %187 = vector.extract_strided_slice %180 {offsets = [0, 1], sizes = [4, 1], strides = [1, 1]} : vector<4x4xf32> to vector<4x1xf32>
    %188 = vector.extract_strided_slice %35 {offsets = [1, 0], sizes = [1, 256], strides = [1, 1]} : vector<4x256xf32> to vector<1x256xf32>
    %189 = vector.broadcast %187 : vector<4x1xf32> to vector<4x256xf32>
    %190 = vector.broadcast %188 : vector<1x256xf32> to vector<4x256xf32>
    %191 = arith.mulf %189, %190 : vector<4x256xf32>
    %192 = arith.addf %186, %191 : vector<4x256xf32>
    %193 = vector.extract_strided_slice %180 {offsets = [0, 2], sizes = [4, 1], strides = [1, 1]} : vector<4x4xf32> to vector<4x1xf32>
    %194 = vector.extract_strided_slice %35 {offsets = [2, 0], sizes = [1, 256], strides = [1, 1]} : vector<4x256xf32> to vector<1x256xf32>
    %195 = vector.broadcast %193 : vector<4x1xf32> to vector<4x256xf32>
    %196 = vector.broadcast %194 : vector<1x256xf32> to vector<4x256xf32>
    %197 = arith.mulf %195, %196 : vector<4x256xf32>
    %198 = arith.addf %192, %197 : vector<4x256xf32>
    %199 = vector.extract_strided_slice %180 {offsets = [0, 3], sizes = [4, 1], strides = [1, 1]} : vector<4x4xf32> to vector<4x1xf32>
    %200 = vector.extract_strided_slice %35 {offsets = [3, 0], sizes = [1, 256], strides = [1, 1]} : vector<4x256xf32> to vector<1x256xf32>
    %201 = vector.broadcast %199 : vector<4x1xf32> to vector<4x256xf32>
    %202 = vector.broadcast %200 : vector<1x256xf32> to vector<4x256xf32>
    %203 = arith.mulf %201, %202 : vector<4x256xf32>
    %204 = arith.addf %198, %203 : vector<4x256xf32>
    %c0_40 = arith.constant 0 : index
    %c5 = arith.constant 5 : index
    %c0_41 = arith.constant 0 : index
    %c0_42 = arith.constant 0 : index
    %205 = vector.load %arg2[%c0_40, %c5, %c0_41, %c0_42] : memref<2x9x4x4xf32, #tpu.memory_space<vmem>>, vector<1x1x4x4xf32>
    %206 = vector.shape_cast %205 : vector<1x1x4x4xf32> to vector<4x4xf32>
    %207 = vector.extract_strided_slice %206 {offsets = [0, 0], sizes = [4, 1], strides = [1, 1]} : vector<4x4xf32> to vector<4x1xf32>
    %208 = vector.extract_strided_slice %65 {offsets = [0, 0], sizes = [1, 256], strides = [1, 1]} : vector<4x256xf32> to vector<1x256xf32>
    %209 = vector.broadcast %207 : vector<4x1xf32> to vector<4x256xf32>
    %210 = vector.broadcast %208 : vector<1x256xf32> to vector<4x256xf32>
    %211 = arith.mulf %209, %210 : vector<4x256xf32>
    %212 = arith.addf %204, %211 : vector<4x256xf32>
    %213 = vector.extract_strided_slice %206 {offsets = [0, 1], sizes = [4, 1], strides = [1, 1]} : vector<4x4xf32> to vector<4x1xf32>
    %214 = vector.extract_strided_slice %65 {offsets = [1, 0], sizes = [1, 256], strides = [1, 1]} : vector<4x256xf32> to vector<1x256xf32>
    %215 = vector.broadcast %213 : vector<4x1xf32> to vector<4x256xf32>
    %216 = vector.broadcast %214 : vector<1x256xf32> to vector<4x256xf32>
    %217 = arith.mulf %215, %216 : vector<4x256xf32>
    %218 = arith.addf %212, %217 : vector<4x256xf32>
    %219 = vector.extract_strided_slice %206 {offsets = [0, 2], sizes = [4, 1], strides = [1, 1]} : vector<4x4xf32> to vector<4x1xf32>
    %220 = vector.extract_strided_slice %65 {offsets = [2, 0], sizes = [1, 256], strides = [1, 1]} : vector<4x256xf32> to vector<1x256xf32>
    %221 = vector.broadcast %219 : vector<4x1xf32> to vector<4x256xf32>
    %222 = vector.broadcast %220 : vector<1x256xf32> to vector<4x256xf32>
    %223 = arith.mulf %221, %222 : vector<4x256xf32>
    %224 = arith.addf %218, %223 : vector<4x256xf32>
    %225 = vector.extract_strided_slice %206 {offsets = [0, 3], sizes = [4, 1], strides = [1, 1]} : vector<4x4xf32> to vector<4x1xf32>
    %226 = vector.extract_strided_slice %65 {offsets = [3, 0], sizes = [1, 256], strides = [1, 1]} : vector<4x256xf32> to vector<1x256xf32>
    %227 = vector.broadcast %225 : vector<4x1xf32> to vector<4x256xf32>
    %228 = vector.broadcast %226 : vector<1x256xf32> to vector<4x256xf32>
    %229 = arith.mulf %227, %228 : vector<4x256xf32>
    %230 = arith.addf %224, %229 : vector<4x256xf32>
    %c0_43 = arith.constant 0 : index
    %c6 = arith.constant 6 : index
    %c0_44 = arith.constant 0 : index
    %c0_45 = arith.constant 0 : index
    %231 = vector.load %arg2[%c0_43, %c6, %c0_44, %c0_45] : memref<2x9x4x4xf32, #tpu.memory_space<vmem>>, vector<1x1x4x4xf32>
    %232 = vector.shape_cast %231 : vector<1x1x4x4xf32> to vector<4x4xf32>
    %233 = vector.extract_strided_slice %232 {offsets = [0, 0], sizes = [4, 1], strides = [1, 1]} : vector<4x4xf32> to vector<4x1xf32>
    %234 = vector.extract_strided_slice %70 {offsets = [0, 0], sizes = [1, 256], strides = [1, 1]} : vector<4x256xf32> to vector<1x256xf32>
    %235 = vector.broadcast %233 : vector<4x1xf32> to vector<4x256xf32>
    %236 = vector.broadcast %234 : vector<1x256xf32> to vector<4x256xf32>
    %237 = arith.mulf %235, %236 : vector<4x256xf32>
    %238 = arith.addf %230, %237 : vector<4x256xf32>
    %239 = vector.extract_strided_slice %232 {offsets = [0, 1], sizes = [4, 1], strides = [1, 1]} : vector<4x4xf32> to vector<4x1xf32>
    %240 = vector.extract_strided_slice %70 {offsets = [1, 0], sizes = [1, 256], strides = [1, 1]} : vector<4x256xf32> to vector<1x256xf32>
    %241 = vector.broadcast %239 : vector<4x1xf32> to vector<4x256xf32>
    %242 = vector.broadcast %240 : vector<1x256xf32> to vector<4x256xf32>
    %243 = arith.mulf %241, %242 : vector<4x256xf32>
    %244 = arith.addf %238, %243 : vector<4x256xf32>
    %245 = vector.extract_strided_slice %232 {offsets = [0, 2], sizes = [4, 1], strides = [1, 1]} : vector<4x4xf32> to vector<4x1xf32>
    %246 = vector.extract_strided_slice %70 {offsets = [2, 0], sizes = [1, 256], strides = [1, 1]} : vector<4x256xf32> to vector<1x256xf32>
    %247 = vector.broadcast %245 : vector<4x1xf32> to vector<4x256xf32>
    %248 = vector.broadcast %246 : vector<1x256xf32> to vector<4x256xf32>
    %249 = arith.mulf %247, %248 : vector<4x256xf32>
    %250 = arith.addf %244, %249 : vector<4x256xf32>
    %251 = vector.extract_strided_slice %232 {offsets = [0, 3], sizes = [4, 1], strides = [1, 1]} : vector<4x4xf32> to vector<4x1xf32>
    %252 = vector.extract_strided_slice %70 {offsets = [3, 0], sizes = [1, 256], strides = [1, 1]} : vector<4x256xf32> to vector<1x256xf32>
    %253 = vector.broadcast %251 : vector<4x1xf32> to vector<4x256xf32>
    %254 = vector.broadcast %252 : vector<1x256xf32> to vector<4x256xf32>
    %255 = arith.mulf %253, %254 : vector<4x256xf32>
    %256 = arith.addf %250, %255 : vector<4x256xf32>
    %c0_46 = arith.constant 0 : index
    %c7 = arith.constant 7 : index
    %c0_47 = arith.constant 0 : index
    %c0_48 = arith.constant 0 : index
    %257 = vector.load %arg2[%c0_46, %c7, %c0_47, %c0_48] : memref<2x9x4x4xf32, #tpu.memory_space<vmem>>, vector<1x1x4x4xf32>
    %258 = vector.shape_cast %257 : vector<1x1x4x4xf32> to vector<4x4xf32>
    %259 = vector.extract_strided_slice %258 {offsets = [0, 0], sizes = [4, 1], strides = [1, 1]} : vector<4x4xf32> to vector<4x1xf32>
    %260 = vector.extract_strided_slice %45 {offsets = [0, 0], sizes = [1, 256], strides = [1, 1]} : vector<4x256xf32> to vector<1x256xf32>
    %261 = vector.broadcast %259 : vector<4x1xf32> to vector<4x256xf32>
    %262 = vector.broadcast %260 : vector<1x256xf32> to vector<4x256xf32>
    %263 = arith.mulf %261, %262 : vector<4x256xf32>
    %264 = arith.addf %256, %263 : vector<4x256xf32>
    %265 = vector.extract_strided_slice %258 {offsets = [0, 1], sizes = [4, 1], strides = [1, 1]} : vector<4x4xf32> to vector<4x1xf32>
    %266 = vector.extract_strided_slice %45 {offsets = [1, 0], sizes = [1, 256], strides = [1, 1]} : vector<4x256xf32> to vector<1x256xf32>
    %267 = vector.broadcast %265 : vector<4x1xf32> to vector<4x256xf32>
    %268 = vector.broadcast %266 : vector<1x256xf32> to vector<4x256xf32>
    %269 = arith.mulf %267, %268 : vector<4x256xf32>
    %270 = arith.addf %264, %269 : vector<4x256xf32>
    %271 = vector.extract_strided_slice %258 {offsets = [0, 2], sizes = [4, 1], strides = [1, 1]} : vector<4x4xf32> to vector<4x1xf32>
    %272 = vector.extract_strided_slice %45 {offsets = [2, 0], sizes = [1, 256], strides = [1, 1]} : vector<4x256xf32> to vector<1x256xf32>
    %273 = vector.broadcast %271 : vector<4x1xf32> to vector<4x256xf32>
    %274 = vector.broadcast %272 : vector<1x256xf32> to vector<4x256xf32>
    %275 = arith.mulf %273, %274 : vector<4x256xf32>
    %276 = arith.addf %270, %275 : vector<4x256xf32>
    %277 = vector.extract_strided_slice %258 {offsets = [0, 3], sizes = [4, 1], strides = [1, 1]} : vector<4x4xf32> to vector<4x1xf32>
    %278 = vector.extract_strided_slice %45 {offsets = [3, 0], sizes = [1, 256], strides = [1, 1]} : vector<4x256xf32> to vector<1x256xf32>
    %279 = vector.broadcast %277 : vector<4x1xf32> to vector<4x256xf32>
    %280 = vector.broadcast %278 : vector<1x256xf32> to vector<4x256xf32>
    %281 = arith.mulf %279, %280 : vector<4x256xf32>
    %282 = arith.addf %276, %281 : vector<4x256xf32>
    %c0_49 = arith.constant 0 : index
    %c8 = arith.constant 8 : index
    %c0_50 = arith.constant 0 : index
    %c0_51 = arith.constant 0 : index
    %283 = vector.load %arg2[%c0_49, %c8, %c0_50, %c0_51] : memref<2x9x4x4xf32, #tpu.memory_space<vmem>>, vector<1x1x4x4xf32>
    %284 = vector.shape_cast %283 : vector<1x1x4x4xf32> to vector<4x4xf32>
    %285 = vector.extract_strided_slice %284 {offsets = [0, 0], sizes = [4, 1], strides = [1, 1]} : vector<4x4xf32> to vector<4x1xf32>
    %286 = vector.extract_strided_slice %75 {offsets = [0, 0], sizes = [1, 256], strides = [1, 1]} : vector<4x256xf32> to vector<1x256xf32>
    %287 = vector.broadcast %285 : vector<4x1xf32> to vector<4x256xf32>
    %288 = vector.broadcast %286 : vector<1x256xf32> to vector<4x256xf32>
    %289 = arith.mulf %287, %288 : vector<4x256xf32>
    %290 = arith.addf %282, %289 : vector<4x256xf32>
    %291 = vector.extract_strided_slice %284 {offsets = [0, 1], sizes = [4, 1], strides = [1, 1]} : vector<4x4xf32> to vector<4x1xf32>
    %292 = vector.extract_strided_slice %75 {offsets = [1, 0], sizes = [1, 256], strides = [1, 1]} : vector<4x256xf32> to vector<1x256xf32>
    %293 = vector.broadcast %291 : vector<4x1xf32> to vector<4x256xf32>
    %294 = vector.broadcast %292 : vector<1x256xf32> to vector<4x256xf32>
    %295 = arith.mulf %293, %294 : vector<4x256xf32>
    %296 = arith.addf %290, %295 : vector<4x256xf32>
    %297 = vector.extract_strided_slice %284 {offsets = [0, 2], sizes = [4, 1], strides = [1, 1]} : vector<4x4xf32> to vector<4x1xf32>
    %298 = vector.extract_strided_slice %75 {offsets = [2, 0], sizes = [1, 256], strides = [1, 1]} : vector<4x256xf32> to vector<1x256xf32>
    %299 = vector.broadcast %297 : vector<4x1xf32> to vector<4x256xf32>
    %300 = vector.broadcast %298 : vector<1x256xf32> to vector<4x256xf32>
    %301 = arith.mulf %299, %300 : vector<4x256xf32>
    %302 = arith.addf %296, %301 : vector<4x256xf32>
    %303 = vector.extract_strided_slice %284 {offsets = [0, 3], sizes = [4, 1], strides = [1, 1]} : vector<4x4xf32> to vector<4x1xf32>
    %304 = vector.extract_strided_slice %75 {offsets = [3, 0], sizes = [1, 256], strides = [1, 1]} : vector<4x256xf32> to vector<1x256xf32>
    %305 = vector.broadcast %303 : vector<4x1xf32> to vector<4x256xf32>
    %306 = vector.broadcast %304 : vector<1x256xf32> to vector<4x256xf32>
    %307 = arith.mulf %305, %306 : vector<4x256xf32>
    %308 = arith.addf %302, %307 : vector<4x256xf32>
    %309 = vector.broadcast %26 : vector<4x1xf32> to vector<4x256xf32>
    %310 = arith.addf %308, %309 : vector<4x256xf32>
    %cst = arith.constant dense<0.000000e+00> : vector<4xf32>
    %311 = vector.multi_reduction <add>, %310, %cst [1] : vector<4x256xf32> to vector<4xf32>
    %312 = vector.shape_cast %311 : vector<4xf32> to vector<4x1xf32>
    %cst_52 = arith.constant 2.560000e+02 : f32
    %313 = vector.broadcast %cst_52 : f32 to vector<4x1xf32>
    %314 = arith.divf %312, %313 : vector<4x1xf32>
    %315 = vector.broadcast %314 : vector<4x1xf32> to vector<4x256xf32>
    %316 = arith.subf %310, %315 : vector<4x256xf32>
    %317 = arith.mulf %316, %316 : vector<4x256xf32>
    %cst_53 = arith.constant dense<0.000000e+00> : vector<4xf32>
    %318 = vector.multi_reduction <add>, %317, %cst_53 [1] : vector<4x256xf32> to vector<4xf32>
    %319 = vector.shape_cast %318 : vector<4xf32> to vector<4x1xf32>
    %cst_54 = arith.constant 0.00392156886 : f32
    %320 = vector.broadcast %cst_54 : f32 to vector<4x1xf32>
    %321 = arith.mulf %319, %320 : vector<4x1xf32>
    %cst_55 = arith.constant 9.99999974E-6 : f32
    %322 = vector.broadcast %cst_55 : f32 to vector<4x1xf32>
    %323 = arith.addf %321, %322 : vector<4x1xf32>
    %324 = math.rsqrt %323 : vector<4x1xf32>
    %325 = vector.broadcast %324 : vector<4x1xf32> to vector<4x256xf32>
    %326 = arith.mulf %316, %325 : vector<4x256xf32>
    %327 = vector.shape_cast %310 : vector<4x256xf32> to vector<1x4x256xf32>
    %cst_56 = arith.constant dense<0.000000e+00> : vector<1xf32>
    %328 = vector.multi_reduction <add>, %327, %cst_56 [1, 2] : vector<1x4x256xf32> to vector<1xf32>
    %329 = vector.shape_cast %328 : vector<1xf32> to vector<1x1x1xf32>
    %330 = vector.extract %329[0, 0, 0] : f32 from vector<1x1x1xf32>
    %331 = vector.broadcast %330 : f32 to vector<1x1xf32>
    %cst_57 = arith.constant 1.024000e+03 : f32
    %332 = vector.broadcast %cst_57 : f32 to vector<1x1xf32>
    %333 = arith.divf %331, %332 : vector<1x1xf32>
    %334 = vector.broadcast %333 : vector<1x1xf32> to vector<4x256xf32>
    %335 = arith.subf %310, %334 : vector<4x256xf32>
    %336 = arith.mulf %335, %335 : vector<4x256xf32>
    %337 = vector.shape_cast %336 : vector<4x256xf32> to vector<1x4x256xf32>
    %cst_58 = arith.constant dense<0.000000e+00> : vector<1xf32>
    %338 = vector.multi_reduction <add>, %337, %cst_58 [1, 2] : vector<1x4x256xf32> to vector<1xf32>
    %339 = vector.shape_cast %338 : vector<1xf32> to vector<1x1x1xf32>
    %340 = vector.extract %339[0, 0, 0] : f32 from vector<1x1x1xf32>
    %341 = vector.broadcast %340 : f32 to vector<1x1xf32>
    %cst_59 = arith.constant 9.77517105E-4 : f32
    %342 = vector.broadcast %cst_59 : f32 to vector<1x1xf32>
    %343 = arith.mulf %341, %342 : vector<1x1xf32>
    %cst_60 = arith.constant 9.99999974E-6 : f32
    %344 = vector.broadcast %cst_60 : f32 to vector<1x1xf32>
    %345 = arith.addf %343, %344 : vector<1x1xf32>
    %346 = math.rsqrt %345 : vector<1x1xf32>
    %347 = vector.broadcast %346 : vector<1x1xf32> to vector<4x256xf32>
    %348 = arith.mulf %335, %347 : vector<4x256xf32>
    %349 = vector.broadcast %28 : vector<4x1xf32> to vector<4x256xf32>
    %350 = arith.mulf %349, %326 : vector<4x256xf32>
    %351 = vector.broadcast %29 : vector<4x1xf32> to vector<4x256xf32>
    %352 = arith.mulf %351, %348 : vector<4x256xf32>
    %353 = arith.addf %350, %352 : vector<4x256xf32>
    %354 = vector.broadcast %32 : vector<4x1xf32> to vector<4x256xf32>
    %355 = arith.mulf %353, %354 : vector<4x256xf32>
    %356 = vector.broadcast %33 : vector<4x1xf32> to vector<4x256xf32>
    %357 = arith.addf %355, %356 : vector<4x256xf32>
    %cst_61 = arith.constant 0.000000e+00 : f32
    %358 = vector.broadcast %cst_61 : f32 to vector<4x256xf32>
    %359 = arith.maximumf %357, %358 : vector<4x256xf32>
    %c240_i32_62 = arith.constant 240 : i32
    %360 = tpu.dynamic_rotate %359 by %c240_i32_62 dim 1 : vector<4x256xf32>, i32 -> vector<4x256xf32>
    %c16_i32_63 = arith.constant 16 : i32
    %361 = tpu.dynamic_rotate %359 by %c16_i32_63 dim 1 : vector<4x256xf32>, i32 -> vector<4x256xf32>
    %362 = vector.shape_cast %18 : vector<1x256xi1> to vector<1x256xi1>
    %363 = vector.broadcast %362 : vector<1x256xi1> to vector<4x256xi1>
    %364 = arith.select %363, %360, %361 : vector<4x256xi1>, vector<4x256xf32>
    %c16_i32_64 = arith.constant 16 : i32
    %365 = tpu.dynamic_rotate %359 by %c16_i32_64 dim 1 : vector<4x256xf32>, i32 -> vector<4x256xf32>
    %c240_i32_65 = arith.constant 240 : i32
    %366 = tpu.dynamic_rotate %359 by %c240_i32_65 dim 1 : vector<4x256xf32>, i32 -> vector<4x256xf32>
    %367 = vector.shape_cast %20 : vector<1x256xi1> to vector<1x256xi1>
    %368 = vector.broadcast %367 : vector<1x256xi1> to vector<4x256xi1>
    %369 = arith.select %368, %365, %366 : vector<4x256xi1>, vector<4x256xf32>
    %c255_i32_66 = arith.constant 255 : i32
    %370 = tpu.dynamic_rotate %364 by %c255_i32_66 dim 1 : vector<4x256xf32>, i32 -> vector<4x256xf32>
    %c1_i32_67 = arith.constant 1 : i32
    %371 = tpu.dynamic_rotate %364 by %c1_i32_67 dim 1 : vector<4x256xf32>, i32 -> vector<4x256xf32>
    %372 = vector.shape_cast %22 : vector<1x256xi1> to vector<1x256xi1>
    %373 = vector.broadcast %372 : vector<1x256xi1> to vector<4x256xi1>
    %374 = arith.select %373, %370, %371 : vector<4x256xi1>, vector<4x256xf32>
    %c1_i32_68 = arith.constant 1 : i32
    %375 = tpu.dynamic_rotate %364 by %c1_i32_68 dim 1 : vector<4x256xf32>, i32 -> vector<4x256xf32>
    %c255_i32_69 = arith.constant 255 : i32
    %376 = tpu.dynamic_rotate %364 by %c255_i32_69 dim 1 : vector<4x256xf32>, i32 -> vector<4x256xf32>
    %377 = vector.shape_cast %24 : vector<1x256xi1> to vector<1x256xi1>
    %378 = vector.broadcast %377 : vector<1x256xi1> to vector<4x256xi1>
    %379 = arith.select %378, %375, %376 : vector<4x256xi1>, vector<4x256xf32>
    %c255_i32_70 = arith.constant 255 : i32
    %380 = tpu.dynamic_rotate %359 by %c255_i32_70 dim 1 : vector<4x256xf32>, i32 -> vector<4x256xf32>
    %c1_i32_71 = arith.constant 1 : i32
    %381 = tpu.dynamic_rotate %359 by %c1_i32_71 dim 1 : vector<4x256xf32>, i32 -> vector<4x256xf32>
    %382 = vector.shape_cast %22 : vector<1x256xi1> to vector<1x256xi1>
    %383 = vector.broadcast %382 : vector<1x256xi1> to vector<4x256xi1>
    %384 = arith.select %383, %380, %381 : vector<4x256xi1>, vector<4x256xf32>
    %c1_i32_72 = arith.constant 1 : i32
    %385 = tpu.dynamic_rotate %359 by %c1_i32_72 dim 1 : vector<4x256xf32>, i32 -> vector<4x256xf32>
    %c255_i32_73 = arith.constant 255 : i32
    %386 = tpu.dynamic_rotate %359 by %c255_i32_73 dim 1 : vector<4x256xf32>, i32 -> vector<4x256xf32>
    %387 = vector.shape_cast %24 : vector<1x256xi1> to vector<1x256xi1>
    %388 = vector.broadcast %387 : vector<1x256xi1> to vector<4x256xi1>
    %389 = arith.select %388, %385, %386 : vector<4x256xi1>, vector<4x256xf32>
    %c255_i32_74 = arith.constant 255 : i32
    %390 = tpu.dynamic_rotate %369 by %c255_i32_74 dim 1 : vector<4x256xf32>, i32 -> vector<4x256xf32>
    %c1_i32_75 = arith.constant 1 : i32
    %391 = tpu.dynamic_rotate %369 by %c1_i32_75 dim 1 : vector<4x256xf32>, i32 -> vector<4x256xf32>
    %392 = vector.shape_cast %22 : vector<1x256xi1> to vector<1x256xi1>
    %393 = vector.broadcast %392 : vector<1x256xi1> to vector<4x256xi1>
    %394 = arith.select %393, %390, %391 : vector<4x256xi1>, vector<4x256xf32>
    %c1_i32_76 = arith.constant 1 : i32
    %395 = tpu.dynamic_rotate %369 by %c1_i32_76 dim 1 : vector<4x256xf32>, i32 -> vector<4x256xf32>
    %c255_i32_77 = arith.constant 255 : i32
    %396 = tpu.dynamic_rotate %369 by %c255_i32_77 dim 1 : vector<4x256xf32>, i32 -> vector<4x256xf32>
    %397 = vector.shape_cast %24 : vector<1x256xi1> to vector<1x256xi1>
    %398 = vector.broadcast %397 : vector<1x256xi1> to vector<4x256xi1>
    %399 = arith.select %398, %395, %396 : vector<4x256xi1>, vector<4x256xf32>
    %c1_78 = arith.constant 1 : index
    %c0_79 = arith.constant 0 : index
    %c0_80 = arith.constant 0 : index
    %c0_81 = arith.constant 0 : index
    %400 = vector.load %arg2[%c1_78, %c0_79, %c0_80, %c0_81] : memref<2x9x4x4xf32, #tpu.memory_space<vmem>>, vector<1x1x4x4xf32>
    %401 = vector.shape_cast %400 : vector<1x1x4x4xf32> to vector<4x4xf32>
    %402 = vector.extract_strided_slice %401 {offsets = [0, 0], sizes = [4, 1], strides = [1, 1]} : vector<4x4xf32> to vector<4x1xf32>
    %403 = vector.extract_strided_slice %374 {offsets = [0, 0], sizes = [1, 256], strides = [1, 1]} : vector<4x256xf32> to vector<1x256xf32>
    %404 = vector.broadcast %402 : vector<4x1xf32> to vector<4x256xf32>
    %405 = vector.broadcast %403 : vector<1x256xf32> to vector<4x256xf32>
    %406 = arith.mulf %404, %405 : vector<4x256xf32>
    %407 = vector.extract_strided_slice %401 {offsets = [0, 1], sizes = [4, 1], strides = [1, 1]} : vector<4x4xf32> to vector<4x1xf32>
    %408 = vector.extract_strided_slice %374 {offsets = [1, 0], sizes = [1, 256], strides = [1, 1]} : vector<4x256xf32> to vector<1x256xf32>
    %409 = vector.broadcast %407 : vector<4x1xf32> to vector<4x256xf32>
    %410 = vector.broadcast %408 : vector<1x256xf32> to vector<4x256xf32>
    %411 = arith.mulf %409, %410 : vector<4x256xf32>
    %412 = arith.addf %406, %411 : vector<4x256xf32>
    %413 = vector.extract_strided_slice %401 {offsets = [0, 2], sizes = [4, 1], strides = [1, 1]} : vector<4x4xf32> to vector<4x1xf32>
    %414 = vector.extract_strided_slice %374 {offsets = [2, 0], sizes = [1, 256], strides = [1, 1]} : vector<4x256xf32> to vector<1x256xf32>
    %415 = vector.broadcast %413 : vector<4x1xf32> to vector<4x256xf32>
    %416 = vector.broadcast %414 : vector<1x256xf32> to vector<4x256xf32>
    %417 = arith.mulf %415, %416 : vector<4x256xf32>
    %418 = arith.addf %412, %417 : vector<4x256xf32>
    %419 = vector.extract_strided_slice %401 {offsets = [0, 3], sizes = [4, 1], strides = [1, 1]} : vector<4x4xf32> to vector<4x1xf32>
    %420 = vector.extract_strided_slice %374 {offsets = [3, 0], sizes = [1, 256], strides = [1, 1]} : vector<4x256xf32> to vector<1x256xf32>
    %421 = vector.broadcast %419 : vector<4x1xf32> to vector<4x256xf32>
    %422 = vector.broadcast %420 : vector<1x256xf32> to vector<4x256xf32>
    %423 = arith.mulf %421, %422 : vector<4x256xf32>
    %424 = arith.addf %418, %423 : vector<4x256xf32>
    %c1_82 = arith.constant 1 : index
    %c1_83 = arith.constant 1 : index
    %c0_84 = arith.constant 0 : index
    %c0_85 = arith.constant 0 : index
    %425 = vector.load %arg2[%c1_82, %c1_83, %c0_84, %c0_85] : memref<2x9x4x4xf32, #tpu.memory_space<vmem>>, vector<1x1x4x4xf32>
    %426 = vector.shape_cast %425 : vector<1x1x4x4xf32> to vector<4x4xf32>
    %427 = vector.extract_strided_slice %426 {offsets = [0, 0], sizes = [4, 1], strides = [1, 1]} : vector<4x4xf32> to vector<4x1xf32>
    %428 = vector.extract_strided_slice %364 {offsets = [0, 0], sizes = [1, 256], strides = [1, 1]} : vector<4x256xf32> to vector<1x256xf32>
    %429 = vector.broadcast %427 : vector<4x1xf32> to vector<4x256xf32>
    %430 = vector.broadcast %428 : vector<1x256xf32> to vector<4x256xf32>
    %431 = arith.mulf %429, %430 : vector<4x256xf32>
    %432 = arith.addf %424, %431 : vector<4x256xf32>
    %433 = vector.extract_strided_slice %426 {offsets = [0, 1], sizes = [4, 1], strides = [1, 1]} : vector<4x4xf32> to vector<4x1xf32>
    %434 = vector.extract_strided_slice %364 {offsets = [1, 0], sizes = [1, 256], strides = [1, 1]} : vector<4x256xf32> to vector<1x256xf32>
    %435 = vector.broadcast %433 : vector<4x1xf32> to vector<4x256xf32>
    %436 = vector.broadcast %434 : vector<1x256xf32> to vector<4x256xf32>
    %437 = arith.mulf %435, %436 : vector<4x256xf32>
    %438 = arith.addf %432, %437 : vector<4x256xf32>
    %439 = vector.extract_strided_slice %426 {offsets = [0, 2], sizes = [4, 1], strides = [1, 1]} : vector<4x4xf32> to vector<4x1xf32>
    %440 = vector.extract_strided_slice %364 {offsets = [2, 0], sizes = [1, 256], strides = [1, 1]} : vector<4x256xf32> to vector<1x256xf32>
    %441 = vector.broadcast %439 : vector<4x1xf32> to vector<4x256xf32>
    %442 = vector.broadcast %440 : vector<1x256xf32> to vector<4x256xf32>
    %443 = arith.mulf %441, %442 : vector<4x256xf32>
    %444 = arith.addf %438, %443 : vector<4x256xf32>
    %445 = vector.extract_strided_slice %426 {offsets = [0, 3], sizes = [4, 1], strides = [1, 1]} : vector<4x4xf32> to vector<4x1xf32>
    %446 = vector.extract_strided_slice %364 {offsets = [3, 0], sizes = [1, 256], strides = [1, 1]} : vector<4x256xf32> to vector<1x256xf32>
    %447 = vector.broadcast %445 : vector<4x1xf32> to vector<4x256xf32>
    %448 = vector.broadcast %446 : vector<1x256xf32> to vector<4x256xf32>
    %449 = arith.mulf %447, %448 : vector<4x256xf32>
    %450 = arith.addf %444, %449 : vector<4x256xf32>
    %c1_86 = arith.constant 1 : index
    %c2_87 = arith.constant 2 : index
    %c0_88 = arith.constant 0 : index
    %c0_89 = arith.constant 0 : index
    %451 = vector.load %arg2[%c1_86, %c2_87, %c0_88, %c0_89] : memref<2x9x4x4xf32, #tpu.memory_space<vmem>>, vector<1x1x4x4xf32>
    %452 = vector.shape_cast %451 : vector<1x1x4x4xf32> to vector<4x4xf32>
    %453 = vector.extract_strided_slice %452 {offsets = [0, 0], sizes = [4, 1], strides = [1, 1]} : vector<4x4xf32> to vector<4x1xf32>
    %454 = vector.extract_strided_slice %379 {offsets = [0, 0], sizes = [1, 256], strides = [1, 1]} : vector<4x256xf32> to vector<1x256xf32>
    %455 = vector.broadcast %453 : vector<4x1xf32> to vector<4x256xf32>
    %456 = vector.broadcast %454 : vector<1x256xf32> to vector<4x256xf32>
    %457 = arith.mulf %455, %456 : vector<4x256xf32>
    %458 = arith.addf %450, %457 : vector<4x256xf32>
    %459 = vector.extract_strided_slice %452 {offsets = [0, 1], sizes = [4, 1], strides = [1, 1]} : vector<4x4xf32> to vector<4x1xf32>
    %460 = vector.extract_strided_slice %379 {offsets = [1, 0], sizes = [1, 256], strides = [1, 1]} : vector<4x256xf32> to vector<1x256xf32>
    %461 = vector.broadcast %459 : vector<4x1xf32> to vector<4x256xf32>
    %462 = vector.broadcast %460 : vector<1x256xf32> to vector<4x256xf32>
    %463 = arith.mulf %461, %462 : vector<4x256xf32>
    %464 = arith.addf %458, %463 : vector<4x256xf32>
    %465 = vector.extract_strided_slice %452 {offsets = [0, 2], sizes = [4, 1], strides = [1, 1]} : vector<4x4xf32> to vector<4x1xf32>
    %466 = vector.extract_strided_slice %379 {offsets = [2, 0], sizes = [1, 256], strides = [1, 1]} : vector<4x256xf32> to vector<1x256xf32>
    %467 = vector.broadcast %465 : vector<4x1xf32> to vector<4x256xf32>
    %468 = vector.broadcast %466 : vector<1x256xf32> to vector<4x256xf32>
    %469 = arith.mulf %467, %468 : vector<4x256xf32>
    %470 = arith.addf %464, %469 : vector<4x256xf32>
    %471 = vector.extract_strided_slice %452 {offsets = [0, 3], sizes = [4, 1], strides = [1, 1]} : vector<4x4xf32> to vector<4x1xf32>
    %472 = vector.extract_strided_slice %379 {offsets = [3, 0], sizes = [1, 256], strides = [1, 1]} : vector<4x256xf32> to vector<1x256xf32>
    %473 = vector.broadcast %471 : vector<4x1xf32> to vector<4x256xf32>
    %474 = vector.broadcast %472 : vector<1x256xf32> to vector<4x256xf32>
    %475 = arith.mulf %473, %474 : vector<4x256xf32>
    %476 = arith.addf %470, %475 : vector<4x256xf32>
    %c1_90 = arith.constant 1 : index
    %c3_91 = arith.constant 3 : index
    %c0_92 = arith.constant 0 : index
    %c0_93 = arith.constant 0 : index
    %477 = vector.load %arg2[%c1_90, %c3_91, %c0_92, %c0_93] : memref<2x9x4x4xf32, #tpu.memory_space<vmem>>, vector<1x1x4x4xf32>
    %478 = vector.shape_cast %477 : vector<1x1x4x4xf32> to vector<4x4xf32>
    %479 = vector.extract_strided_slice %478 {offsets = [0, 0], sizes = [4, 1], strides = [1, 1]} : vector<4x4xf32> to vector<4x1xf32>
    %480 = vector.extract_strided_slice %384 {offsets = [0, 0], sizes = [1, 256], strides = [1, 1]} : vector<4x256xf32> to vector<1x256xf32>
    %481 = vector.broadcast %479 : vector<4x1xf32> to vector<4x256xf32>
    %482 = vector.broadcast %480 : vector<1x256xf32> to vector<4x256xf32>
    %483 = arith.mulf %481, %482 : vector<4x256xf32>
    %484 = arith.addf %476, %483 : vector<4x256xf32>
    %485 = vector.extract_strided_slice %478 {offsets = [0, 1], sizes = [4, 1], strides = [1, 1]} : vector<4x4xf32> to vector<4x1xf32>
    %486 = vector.extract_strided_slice %384 {offsets = [1, 0], sizes = [1, 256], strides = [1, 1]} : vector<4x256xf32> to vector<1x256xf32>
    %487 = vector.broadcast %485 : vector<4x1xf32> to vector<4x256xf32>
    %488 = vector.broadcast %486 : vector<1x256xf32> to vector<4x256xf32>
    %489 = arith.mulf %487, %488 : vector<4x256xf32>
    %490 = arith.addf %484, %489 : vector<4x256xf32>
    %491 = vector.extract_strided_slice %478 {offsets = [0, 2], sizes = [4, 1], strides = [1, 1]} : vector<4x4xf32> to vector<4x1xf32>
    %492 = vector.extract_strided_slice %384 {offsets = [2, 0], sizes = [1, 256], strides = [1, 1]} : vector<4x256xf32> to vector<1x256xf32>
    %493 = vector.broadcast %491 : vector<4x1xf32> to vector<4x256xf32>
    %494 = vector.broadcast %492 : vector<1x256xf32> to vector<4x256xf32>
    %495 = arith.mulf %493, %494 : vector<4x256xf32>
    %496 = arith.addf %490, %495 : vector<4x256xf32>
    %497 = vector.extract_strided_slice %478 {offsets = [0, 3], sizes = [4, 1], strides = [1, 1]} : vector<4x4xf32> to vector<4x1xf32>
    %498 = vector.extract_strided_slice %384 {offsets = [3, 0], sizes = [1, 256], strides = [1, 1]} : vector<4x256xf32> to vector<1x256xf32>
    %499 = vector.broadcast %497 : vector<4x1xf32> to vector<4x256xf32>
    %500 = vector.broadcast %498 : vector<1x256xf32> to vector<4x256xf32>
    %501 = arith.mulf %499, %500 : vector<4x256xf32>
    %502 = arith.addf %496, %501 : vector<4x256xf32>
    %c1_94 = arith.constant 1 : index
    %c4_95 = arith.constant 4 : index
    %c0_96 = arith.constant 0 : index
    %c0_97 = arith.constant 0 : index
    %503 = vector.load %arg2[%c1_94, %c4_95, %c0_96, %c0_97] : memref<2x9x4x4xf32, #tpu.memory_space<vmem>>, vector<1x1x4x4xf32>
    %504 = vector.shape_cast %503 : vector<1x1x4x4xf32> to vector<4x4xf32>
    %505 = vector.extract_strided_slice %504 {offsets = [0, 0], sizes = [4, 1], strides = [1, 1]} : vector<4x4xf32> to vector<4x1xf32>
    %506 = vector.extract_strided_slice %359 {offsets = [0, 0], sizes = [1, 256], strides = [1, 1]} : vector<4x256xf32> to vector<1x256xf32>
    %507 = vector.broadcast %505 : vector<4x1xf32> to vector<4x256xf32>
    %508 = vector.broadcast %506 : vector<1x256xf32> to vector<4x256xf32>
    %509 = arith.mulf %507, %508 : vector<4x256xf32>
    %510 = arith.addf %502, %509 : vector<4x256xf32>
    %511 = vector.extract_strided_slice %504 {offsets = [0, 1], sizes = [4, 1], strides = [1, 1]} : vector<4x4xf32> to vector<4x1xf32>
    %512 = vector.extract_strided_slice %359 {offsets = [1, 0], sizes = [1, 256], strides = [1, 1]} : vector<4x256xf32> to vector<1x256xf32>
    %513 = vector.broadcast %511 : vector<4x1xf32> to vector<4x256xf32>
    %514 = vector.broadcast %512 : vector<1x256xf32> to vector<4x256xf32>
    %515 = arith.mulf %513, %514 : vector<4x256xf32>
    %516 = arith.addf %510, %515 : vector<4x256xf32>
    %517 = vector.extract_strided_slice %504 {offsets = [0, 2], sizes = [4, 1], strides = [1, 1]} : vector<4x4xf32> to vector<4x1xf32>
    %518 = vector.extract_strided_slice %359 {offsets = [2, 0], sizes = [1, 256], strides = [1, 1]} : vector<4x256xf32> to vector<1x256xf32>
    %519 = vector.broadcast %517 : vector<4x1xf32> to vector<4x256xf32>
    %520 = vector.broadcast %518 : vector<1x256xf32> to vector<4x256xf32>
    %521 = arith.mulf %519, %520 : vector<4x256xf32>
    %522 = arith.addf %516, %521 : vector<4x256xf32>
    %523 = vector.extract_strided_slice %504 {offsets = [0, 3], sizes = [4, 1], strides = [1, 1]} : vector<4x4xf32> to vector<4x1xf32>
    %524 = vector.extract_strided_slice %359 {offsets = [3, 0], sizes = [1, 256], strides = [1, 1]} : vector<4x256xf32> to vector<1x256xf32>
    %525 = vector.broadcast %523 : vector<4x1xf32> to vector<4x256xf32>
    %526 = vector.broadcast %524 : vector<1x256xf32> to vector<4x256xf32>
    %527 = arith.mulf %525, %526 : vector<4x256xf32>
    %528 = arith.addf %522, %527 : vector<4x256xf32>
    %c1_98 = arith.constant 1 : index
    %c5_99 = arith.constant 5 : index
    %c0_100 = arith.constant 0 : index
    %c0_101 = arith.constant 0 : index
    %529 = vector.load %arg2[%c1_98, %c5_99, %c0_100, %c0_101] : memref<2x9x4x4xf32, #tpu.memory_space<vmem>>, vector<1x1x4x4xf32>
    %530 = vector.shape_cast %529 : vector<1x1x4x4xf32> to vector<4x4xf32>
    %531 = vector.extract_strided_slice %530 {offsets = [0, 0], sizes = [4, 1], strides = [1, 1]} : vector<4x4xf32> to vector<4x1xf32>
    %532 = vector.extract_strided_slice %389 {offsets = [0, 0], sizes = [1, 256], strides = [1, 1]} : vector<4x256xf32> to vector<1x256xf32>
    %533 = vector.broadcast %531 : vector<4x1xf32> to vector<4x256xf32>
    %534 = vector.broadcast %532 : vector<1x256xf32> to vector<4x256xf32>
    %535 = arith.mulf %533, %534 : vector<4x256xf32>
    %536 = arith.addf %528, %535 : vector<4x256xf32>
    %537 = vector.extract_strided_slice %530 {offsets = [0, 1], sizes = [4, 1], strides = [1, 1]} : vector<4x4xf32> to vector<4x1xf32>
    %538 = vector.extract_strided_slice %389 {offsets = [1, 0], sizes = [1, 256], strides = [1, 1]} : vector<4x256xf32> to vector<1x256xf32>
    %539 = vector.broadcast %537 : vector<4x1xf32> to vector<4x256xf32>
    %540 = vector.broadcast %538 : vector<1x256xf32> to vector<4x256xf32>
    %541 = arith.mulf %539, %540 : vector<4x256xf32>
    %542 = arith.addf %536, %541 : vector<4x256xf32>
    %543 = vector.extract_strided_slice %530 {offsets = [0, 2], sizes = [4, 1], strides = [1, 1]} : vector<4x4xf32> to vector<4x1xf32>
    %544 = vector.extract_strided_slice %389 {offsets = [2, 0], sizes = [1, 256], strides = [1, 1]} : vector<4x256xf32> to vector<1x256xf32>
    %545 = vector.broadcast %543 : vector<4x1xf32> to vector<4x256xf32>
    %546 = vector.broadcast %544 : vector<1x256xf32> to vector<4x256xf32>
    %547 = arith.mulf %545, %546 : vector<4x256xf32>
    %548 = arith.addf %542, %547 : vector<4x256xf32>
    %549 = vector.extract_strided_slice %530 {offsets = [0, 3], sizes = [4, 1], strides = [1, 1]} : vector<4x4xf32> to vector<4x1xf32>
    %550 = vector.extract_strided_slice %389 {offsets = [3, 0], sizes = [1, 256], strides = [1, 1]} : vector<4x256xf32> to vector<1x256xf32>
    %551 = vector.broadcast %549 : vector<4x1xf32> to vector<4x256xf32>
    %552 = vector.broadcast %550 : vector<1x256xf32> to vector<4x256xf32>
    %553 = arith.mulf %551, %552 : vector<4x256xf32>
    %554 = arith.addf %548, %553 : vector<4x256xf32>
    %c1_102 = arith.constant 1 : index
    %c6_103 = arith.constant 6 : index
    %c0_104 = arith.constant 0 : index
    %c0_105 = arith.constant 0 : index
    %555 = vector.load %arg2[%c1_102, %c6_103, %c0_104, %c0_105] : memref<2x9x4x4xf32, #tpu.memory_space<vmem>>, vector<1x1x4x4xf32>
    %556 = vector.shape_cast %555 : vector<1x1x4x4xf32> to vector<4x4xf32>
    %557 = vector.extract_strided_slice %556 {offsets = [0, 0], sizes = [4, 1], strides = [1, 1]} : vector<4x4xf32> to vector<4x1xf32>
    %558 = vector.extract_strided_slice %394 {offsets = [0, 0], sizes = [1, 256], strides = [1, 1]} : vector<4x256xf32> to vector<1x256xf32>
    %559 = vector.broadcast %557 : vector<4x1xf32> to vector<4x256xf32>
    %560 = vector.broadcast %558 : vector<1x256xf32> to vector<4x256xf32>
    %561 = arith.mulf %559, %560 : vector<4x256xf32>
    %562 = arith.addf %554, %561 : vector<4x256xf32>
    %563 = vector.extract_strided_slice %556 {offsets = [0, 1], sizes = [4, 1], strides = [1, 1]} : vector<4x4xf32> to vector<4x1xf32>
    %564 = vector.extract_strided_slice %394 {offsets = [1, 0], sizes = [1, 256], strides = [1, 1]} : vector<4x256xf32> to vector<1x256xf32>
    %565 = vector.broadcast %563 : vector<4x1xf32> to vector<4x256xf32>
    %566 = vector.broadcast %564 : vector<1x256xf32> to vector<4x256xf32>
    %567 = arith.mulf %565, %566 : vector<4x256xf32>
    %568 = arith.addf %562, %567 : vector<4x256xf32>
    %569 = vector.extract_strided_slice %556 {offsets = [0, 2], sizes = [4, 1], strides = [1, 1]} : vector<4x4xf32> to vector<4x1xf32>
    %570 = vector.extract_strided_slice %394 {offsets = [2, 0], sizes = [1, 256], strides = [1, 1]} : vector<4x256xf32> to vector<1x256xf32>
    %571 = vector.broadcast %569 : vector<4x1xf32> to vector<4x256xf32>
    %572 = vector.broadcast %570 : vector<1x256xf32> to vector<4x256xf32>
    %573 = arith.mulf %571, %572 : vector<4x256xf32>
    %574 = arith.addf %568, %573 : vector<4x256xf32>
    %575 = vector.extract_strided_slice %556 {offsets = [0, 3], sizes = [4, 1], strides = [1, 1]} : vector<4x4xf32> to vector<4x1xf32>
    %576 = vector.extract_strided_slice %394 {offsets = [3, 0], sizes = [1, 256], strides = [1, 1]} : vector<4x256xf32> to vector<1x256xf32>
    %577 = vector.broadcast %575 : vector<4x1xf32> to vector<4x256xf32>
    %578 = vector.broadcast %576 : vector<1x256xf32> to vector<4x256xf32>
    %579 = arith.mulf %577, %578 : vector<4x256xf32>
    %580 = arith.addf %574, %579 : vector<4x256xf32>
    %c1_106 = arith.constant 1 : index
    %c7_107 = arith.constant 7 : index
    %c0_108 = arith.constant 0 : index
    %c0_109 = arith.constant 0 : index
    %581 = vector.load %arg2[%c1_106, %c7_107, %c0_108, %c0_109] : memref<2x9x4x4xf32, #tpu.memory_space<vmem>>, vector<1x1x4x4xf32>
    %582 = vector.shape_cast %581 : vector<1x1x4x4xf32> to vector<4x4xf32>
    %583 = vector.extract_strided_slice %582 {offsets = [0, 0], sizes = [4, 1], strides = [1, 1]} : vector<4x4xf32> to vector<4x1xf32>
    %584 = vector.extract_strided_slice %369 {offsets = [0, 0], sizes = [1, 256], strides = [1, 1]} : vector<4x256xf32> to vector<1x256xf32>
    %585 = vector.broadcast %583 : vector<4x1xf32> to vector<4x256xf32>
    %586 = vector.broadcast %584 : vector<1x256xf32> to vector<4x256xf32>
    %587 = arith.mulf %585, %586 : vector<4x256xf32>
    %588 = arith.addf %580, %587 : vector<4x256xf32>
    %589 = vector.extract_strided_slice %582 {offsets = [0, 1], sizes = [4, 1], strides = [1, 1]} : vector<4x4xf32> to vector<4x1xf32>
    %590 = vector.extract_strided_slice %369 {offsets = [1, 0], sizes = [1, 256], strides = [1, 1]} : vector<4x256xf32> to vector<1x256xf32>
    %591 = vector.broadcast %589 : vector<4x1xf32> to vector<4x256xf32>
    %592 = vector.broadcast %590 : vector<1x256xf32> to vector<4x256xf32>
    %593 = arith.mulf %591, %592 : vector<4x256xf32>
    %594 = arith.addf %588, %593 : vector<4x256xf32>
    %595 = vector.extract_strided_slice %582 {offsets = [0, 2], sizes = [4, 1], strides = [1, 1]} : vector<4x4xf32> to vector<4x1xf32>
    %596 = vector.extract_strided_slice %369 {offsets = [2, 0], sizes = [1, 256], strides = [1, 1]} : vector<4x256xf32> to vector<1x256xf32>
    %597 = vector.broadcast %595 : vector<4x1xf32> to vector<4x256xf32>
    %598 = vector.broadcast %596 : vector<1x256xf32> to vector<4x256xf32>
    %599 = arith.mulf %597, %598 : vector<4x256xf32>
    %600 = arith.addf %594, %599 : vector<4x256xf32>
    %601 = vector.extract_strided_slice %582 {offsets = [0, 3], sizes = [4, 1], strides = [1, 1]} : vector<4x4xf32> to vector<4x1xf32>
    %602 = vector.extract_strided_slice %369 {offsets = [3, 0], sizes = [1, 256], strides = [1, 1]} : vector<4x256xf32> to vector<1x256xf32>
    %603 = vector.broadcast %601 : vector<4x1xf32> to vector<4x256xf32>
    %604 = vector.broadcast %602 : vector<1x256xf32> to vector<4x256xf32>
    %605 = arith.mulf %603, %604 : vector<4x256xf32>
    %606 = arith.addf %600, %605 : vector<4x256xf32>
    %c1_110 = arith.constant 1 : index
    %c8_111 = arith.constant 8 : index
    %c0_112 = arith.constant 0 : index
    %c0_113 = arith.constant 0 : index
    %607 = vector.load %arg2[%c1_110, %c8_111, %c0_112, %c0_113] : memref<2x9x4x4xf32, #tpu.memory_space<vmem>>, vector<1x1x4x4xf32>
    %608 = vector.shape_cast %607 : vector<1x1x4x4xf32> to vector<4x4xf32>
    %609 = vector.extract_strided_slice %608 {offsets = [0, 0], sizes = [4, 1], strides = [1, 1]} : vector<4x4xf32> to vector<4x1xf32>
    %610 = vector.extract_strided_slice %399 {offsets = [0, 0], sizes = [1, 256], strides = [1, 1]} : vector<4x256xf32> to vector<1x256xf32>
    %611 = vector.broadcast %609 : vector<4x1xf32> to vector<4x256xf32>
    %612 = vector.broadcast %610 : vector<1x256xf32> to vector<4x256xf32>
    %613 = arith.mulf %611, %612 : vector<4x256xf32>
    %614 = arith.addf %606, %613 : vector<4x256xf32>
    %615 = vector.extract_strided_slice %608 {offsets = [0, 1], sizes = [4, 1], strides = [1, 1]} : vector<4x4xf32> to vector<4x1xf32>
    %616 = vector.extract_strided_slice %399 {offsets = [1, 0], sizes = [1, 256], strides = [1, 1]} : vector<4x256xf32> to vector<1x256xf32>
    %617 = vector.broadcast %615 : vector<4x1xf32> to vector<4x256xf32>
    %618 = vector.broadcast %616 : vector<1x256xf32> to vector<4x256xf32>
    %619 = arith.mulf %617, %618 : vector<4x256xf32>
    %620 = arith.addf %614, %619 : vector<4x256xf32>
    %621 = vector.extract_strided_slice %608 {offsets = [0, 2], sizes = [4, 1], strides = [1, 1]} : vector<4x4xf32> to vector<4x1xf32>
    %622 = vector.extract_strided_slice %399 {offsets = [2, 0], sizes = [1, 256], strides = [1, 1]} : vector<4x256xf32> to vector<1x256xf32>
    %623 = vector.broadcast %621 : vector<4x1xf32> to vector<4x256xf32>
    %624 = vector.broadcast %622 : vector<1x256xf32> to vector<4x256xf32>
    %625 = arith.mulf %623, %624 : vector<4x256xf32>
    %626 = arith.addf %620, %625 : vector<4x256xf32>
    %627 = vector.extract_strided_slice %608 {offsets = [0, 3], sizes = [4, 1], strides = [1, 1]} : vector<4x4xf32> to vector<4x1xf32>
    %628 = vector.extract_strided_slice %399 {offsets = [3, 0], sizes = [1, 256], strides = [1, 1]} : vector<4x256xf32> to vector<1x256xf32>
    %629 = vector.broadcast %627 : vector<4x1xf32> to vector<4x256xf32>
    %630 = vector.broadcast %628 : vector<1x256xf32> to vector<4x256xf32>
    %631 = arith.mulf %629, %630 : vector<4x256xf32>
    %632 = arith.addf %626, %631 : vector<4x256xf32>
    %633 = vector.broadcast %27 : vector<4x1xf32> to vector<4x256xf32>
    %634 = arith.addf %632, %633 : vector<4x256xf32>
    %cst_114 = arith.constant dense<0.000000e+00> : vector<4xf32>
    %635 = vector.multi_reduction <add>, %634, %cst_114 [1] : vector<4x256xf32> to vector<4xf32>
    %636 = vector.shape_cast %635 : vector<4xf32> to vector<4x1xf32>
    %cst_115 = arith.constant 2.560000e+02 : f32
    %637 = vector.broadcast %cst_115 : f32 to vector<4x1xf32>
    %638 = arith.divf %636, %637 : vector<4x1xf32>
    %639 = vector.broadcast %638 : vector<4x1xf32> to vector<4x256xf32>
    %640 = arith.subf %634, %639 : vector<4x256xf32>
    %641 = arith.mulf %640, %640 : vector<4x256xf32>
    %cst_116 = arith.constant dense<0.000000e+00> : vector<4xf32>
    %642 = vector.multi_reduction <add>, %641, %cst_116 [1] : vector<4x256xf32> to vector<4xf32>
    %643 = vector.shape_cast %642 : vector<4xf32> to vector<4x1xf32>
    %cst_117 = arith.constant 0.00392156886 : f32
    %644 = vector.broadcast %cst_117 : f32 to vector<4x1xf32>
    %645 = arith.mulf %643, %644 : vector<4x1xf32>
    %cst_118 = arith.constant 9.99999974E-6 : f32
    %646 = vector.broadcast %cst_118 : f32 to vector<4x1xf32>
    %647 = arith.addf %645, %646 : vector<4x1xf32>
    %648 = math.rsqrt %647 : vector<4x1xf32>
    %649 = vector.broadcast %648 : vector<4x1xf32> to vector<4x256xf32>
    %650 = arith.mulf %640, %649 : vector<4x256xf32>
    %651 = vector.shape_cast %634 : vector<4x256xf32> to vector<1x4x256xf32>
    %cst_119 = arith.constant dense<0.000000e+00> : vector<1xf32>
    %652 = vector.multi_reduction <add>, %651, %cst_119 [1, 2] : vector<1x4x256xf32> to vector<1xf32>
    %653 = vector.shape_cast %652 : vector<1xf32> to vector<1x1x1xf32>
    %654 = vector.extract %653[0, 0, 0] : f32 from vector<1x1x1xf32>
    %655 = vector.broadcast %654 : f32 to vector<1x1xf32>
    %cst_120 = arith.constant 1.024000e+03 : f32
    %656 = vector.broadcast %cst_120 : f32 to vector<1x1xf32>
    %657 = arith.divf %655, %656 : vector<1x1xf32>
    %658 = vector.broadcast %657 : vector<1x1xf32> to vector<4x256xf32>
    %659 = arith.subf %634, %658 : vector<4x256xf32>
    %660 = arith.mulf %659, %659 : vector<4x256xf32>
    %661 = vector.shape_cast %660 : vector<4x256xf32> to vector<1x4x256xf32>
    %cst_121 = arith.constant dense<0.000000e+00> : vector<1xf32>
    %662 = vector.multi_reduction <add>, %661, %cst_121 [1, 2] : vector<1x4x256xf32> to vector<1xf32>
    %663 = vector.shape_cast %662 : vector<1xf32> to vector<1x1x1xf32>
    %664 = vector.extract %663[0, 0, 0] : f32 from vector<1x1x1xf32>
    %665 = vector.broadcast %664 : f32 to vector<1x1xf32>
    %cst_122 = arith.constant 9.77517105E-4 : f32
    %666 = vector.broadcast %cst_122 : f32 to vector<1x1xf32>
    %667 = arith.mulf %665, %666 : vector<1x1xf32>
    %cst_123 = arith.constant 9.99999974E-6 : f32
    %668 = vector.broadcast %cst_123 : f32 to vector<1x1xf32>
    %669 = arith.addf %667, %668 : vector<1x1xf32>
    %670 = math.rsqrt %669 : vector<1x1xf32>
    %671 = vector.broadcast %670 : vector<1x1xf32> to vector<4x256xf32>
    %672 = arith.mulf %659, %671 : vector<4x256xf32>
    %673 = vector.broadcast %30 : vector<4x1xf32> to vector<4x256xf32>
    %674 = arith.mulf %673, %650 : vector<4x256xf32>
    %675 = vector.broadcast %31 : vector<4x1xf32> to vector<4x256xf32>
    %676 = arith.mulf %675, %672 : vector<4x256xf32>
    %677 = arith.addf %674, %676 : vector<4x256xf32>
    %678 = vector.broadcast %32 : vector<4x1xf32> to vector<4x256xf32>
    %679 = arith.mulf %677, %678 : vector<4x256xf32>
    %680 = vector.broadcast %33 : vector<4x1xf32> to vector<4x256xf32>
    %681 = arith.addf %679, %680 : vector<4x256xf32>
    %682 = arith.addf %35, %681 : vector<4x256xf32>
    %c0_124 = arith.constant 0 : index
    %c0_125 = arith.constant 0 : index
    %c0_126 = arith.constant 0 : index
    %683 = vector.load %arg4[%c0_124, %c0_125, %c0_126] : memref<2x4x256xf32, #tpu.memory_space<vmem>>, vector<1x4x256xf32>
    %684 = vector.shape_cast %683 : vector<1x4x256xf32> to vector<4x256xf32>
    %685 = vector.shape_cast %682 : vector<4x256xf32> to vector<1x4x256xf32>
    tpu.vector_store %arg4[%c0_124, %c0_125, %c0_126], %685 {strides = array<i32>} : memref<2x4x256xf32, #tpu.memory_space<vmem>>, vector<1x4x256xf32>,
    %686 = vector.extract_strided_slice %25 {offsets = [0, 7], sizes = [4, 1], strides = [1, 1]} : vector<4x10xf32> to vector<4x1xf32>
    %687 = vector.extract_strided_slice %25 {offsets = [0, 9], sizes = [4, 1], strides = [1, 1]} : vector<4x10xf32> to vector<4x1xf32>
    %c1_127 = arith.constant 1 : index
    %c0_128 = arith.constant 0 : index
    %c0_129 = arith.constant 0 : index
    %688 = vector.load %arg1[%c1_127, %c0_128, %c0_129] : memref<2x4x256xf32, #tpu.memory_space<vmem>>, vector<1x4x256xf32>
    %689 = vector.shape_cast %688 : vector<1x4x256xf32> to vector<4x256xf32>
    %c240_i32_130 = arith.constant 240 : i32
    %690 = tpu.dynamic_rotate %689 by %c240_i32_130 dim 1 : vector<4x256xf32>, i32 -> vector<4x256xf32>
    %c16_i32_131 = arith.constant 16 : i32
    %691 = tpu.dynamic_rotate %689 by %c16_i32_131 dim 1 : vector<4x256xf32>, i32 -> vector<4x256xf32>
    %692 = vector.shape_cast %18 : vector<1x256xi1> to vector<1x256xi1>
    %693 = vector.broadcast %692 : vector<1x256xi1> to vector<4x256xi1>
    %694 = arith.select %693, %690, %691 : vector<4x256xi1>, vector<4x256xf32>
    %c16_i32_132 = arith.constant 16 : i32
    %695 = tpu.dynamic_rotate %689 by %c16_i32_132 dim 1 : vector<4x256xf32>, i32 -> vector<4x256xf32>
    %c240_i32_133 = arith.constant 240 : i32
    %696 = tpu.dynamic_rotate %689 by %c240_i32_133 dim 1 : vector<4x256xf32>, i32 -> vector<4x256xf32>
    %697 = vector.shape_cast %20 : vector<1x256xi1> to vector<1x256xi1>
    %698 = vector.broadcast %697 : vector<1x256xi1> to vector<4x256xi1>
    %699 = arith.select %698, %695, %696 : vector<4x256xi1>, vector<4x256xf32>
    %c255_i32_134 = arith.constant 255 : i32
    %700 = tpu.dynamic_rotate %694 by %c255_i32_134 dim 1 : vector<4x256xf32>, i32 -> vector<4x256xf32>
    %c1_i32_135 = arith.constant 1 : i32
    %701 = tpu.dynamic_rotate %694 by %c1_i32_135 dim 1 : vector<4x256xf32>, i32 -> vector<4x256xf32>
    %702 = vector.shape_cast %22 : vector<1x256xi1> to vector<1x256xi1>
    %703 = vector.broadcast %702 : vector<1x256xi1> to vector<4x256xi1>
    %704 = arith.select %703, %700, %701 : vector<4x256xi1>, vector<4x256xf32>
    %c1_i32_136 = arith.constant 1 : i32
    %705 = tpu.dynamic_rotate %694 by %c1_i32_136 dim 1 : vector<4x256xf32>, i32 -> vector<4x256xf32>
    %c255_i32_137 = arith.constant 255 : i32
    %706 = tpu.dynamic_rotate %694 by %c255_i32_137 dim 1 : vector<4x256xf32>, i32 -> vector<4x256xf32>
    %707 = vector.shape_cast %24 : vector<1x256xi1> to vector<1x256xi1>
    %708 = vector.broadcast %707 : vector<1x256xi1> to vector<4x256xi1>
    %709 = arith.select %708, %705, %706 : vector<4x256xi1>, vector<4x256xf32>
    %c255_i32_138 = arith.constant 255 : i32
    %710 = tpu.dynamic_rotate %689 by %c255_i32_138 dim 1 : vector<4x256xf32>, i32 -> vector<4x256xf32>
    %c1_i32_139 = arith.constant 1 : i32
    %711 = tpu.dynamic_rotate %689 by %c1_i32_139 dim 1 : vector<4x256xf32>, i32 -> vector<4x256xf32>
    %712 = vector.shape_cast %22 : vector<1x256xi1> to vector<1x256xi1>
    %713 = vector.broadcast %712 : vector<1x256xi1> to vector<4x256xi1>
    %714 = arith.select %713, %710, %711 : vector<4x256xi1>, vector<4x256xf32>
    %c1_i32_140 = arith.constant 1 : i32
    %715 = tpu.dynamic_rotate %689 by %c1_i32_140 dim 1 : vector<4x256xf32>, i32 -> vector<4x256xf32>
    %c255_i32_141 = arith.constant 255 : i32
    %716 = tpu.dynamic_rotate %689 by %c255_i32_141 dim 1 : vector<4x256xf32>, i32 -> vector<4x256xf32>
    %717 = vector.shape_cast %24 : vector<1x256xi1> to vector<1x256xi1>
    %718 = vector.broadcast %717 : vector<1x256xi1> to vector<4x256xi1>
    %719 = arith.select %718, %715, %716 : vector<4x256xi1>, vector<4x256xf32>
    %c255_i32_142 = arith.constant 255 : i32
    %720 = tpu.dynamic_rotate %699 by %c255_i32_142 dim 1 : vector<4x256xf32>, i32 -> vector<4x256xf32>
    %c1_i32_143 = arith.constant 1 : i32
    %721 = tpu.dynamic_rotate %699 by %c1_i32_143 dim 1 : vector<4x256xf32>, i32 -> vector<4x256xf32>
    %722 = vector.shape_cast %22 : vector<1x256xi1> to vector<1x256xi1>
    %723 = vector.broadcast %722 : vector<1x256xi1> to vector<4x256xi1>
    %724 = arith.select %723, %720, %721 : vector<4x256xi1>, vector<4x256xf32>
    %c1_i32_144 = arith.constant 1 : i32
    %725 = tpu.dynamic_rotate %699 by %c1_i32_144 dim 1 : vector<4x256xf32>, i32 -> vector<4x256xf32>
    %c255_i32_145 = arith.constant 255 : i32
    %726 = tpu.dynamic_rotate %699 by %c255_i32_145 dim 1 : vector<4x256xf32>, i32 -> vector<4x256xf32>
    %727 = vector.shape_cast %24 : vector<1x256xi1> to vector<1x256xi1>
    %728 = vector.broadcast %727 : vector<1x256xi1> to vector<4x256xi1>
    %729 = arith.select %728, %725, %726 : vector<4x256xi1>, vector<4x256xf32>
    %c0_146 = arith.constant 0 : index
    %c0_147 = arith.constant 0 : index
    %c0_148 = arith.constant 0 : index
    %c0_149 = arith.constant 0 : index
    %730 = vector.load %arg2[%c0_146, %c0_147, %c0_148, %c0_149] : memref<2x9x4x4xf32, #tpu.memory_space<vmem>>, vector<1x1x4x4xf32>
    %731 = vector.shape_cast %730 : vector<1x1x4x4xf32> to vector<4x4xf32>
    %732 = vector.extract_strided_slice %731 {offsets = [0, 0], sizes = [4, 1], strides = [1, 1]} : vector<4x4xf32> to vector<4x1xf32>
    %733 = vector.extract_strided_slice %704 {offsets = [0, 0], sizes = [1, 256], strides = [1, 1]} : vector<4x256xf32> to vector<1x256xf32>
    %734 = vector.broadcast %732 : vector<4x1xf32> to vector<4x256xf32>
    %735 = vector.broadcast %733 : vector<1x256xf32> to vector<4x256xf32>
    %736 = arith.mulf %734, %735 : vector<4x256xf32>
    %737 = vector.extract_strided_slice %731 {offsets = [0, 1], sizes = [4, 1], strides = [1, 1]} : vector<4x4xf32> to vector<4x1xf32>
    %738 = vector.extract_strided_slice %704 {offsets = [1, 0], sizes = [1, 256], strides = [1, 1]} : vector<4x256xf32> to vector<1x256xf32>
    %739 = vector.broadcast %737 : vector<4x1xf32> to vector<4x256xf32>
    %740 = vector.broadcast %738 : vector<1x256xf32> to vector<4x256xf32>
    %741 = arith.mulf %739, %740 : vector<4x256xf32>
    %742 = arith.addf %736, %741 : vector<4x256xf32>
    %743 = vector.extract_strided_slice %731 {offsets = [0, 2], sizes = [4, 1], strides = [1, 1]} : vector<4x4xf32> to vector<4x1xf32>
    %744 = vector.extract_strided_slice %704 {offsets = [2, 0], sizes = [1, 256], strides = [1, 1]} : vector<4x256xf32> to vector<1x256xf32>
    %745 = vector.broadcast %743 : vector<4x1xf32> to vector<4x256xf32>
    %746 = vector.broadcast %744 : vector<1x256xf32> to vector<4x256xf32>
    %747 = arith.mulf %745, %746 : vector<4x256xf32>
    %748 = arith.addf %742, %747 : vector<4x256xf32>
    %749 = vector.extract_strided_slice %731 {offsets = [0, 3], sizes = [4, 1], strides = [1, 1]} : vector<4x4xf32> to vector<4x1xf32>
    %750 = vector.extract_strided_slice %704 {offsets = [3, 0], sizes = [1, 256], strides = [1, 1]} : vector<4x256xf32> to vector<1x256xf32>
    %751 = vector.broadcast %749 : vector<4x1xf32> to vector<4x256xf32>
    %752 = vector.broadcast %750 : vector<1x256xf32> to vector<4x256xf32>
    %753 = arith.mulf %751, %752 : vector<4x256xf32>
    %754 = arith.addf %748, %753 : vector<4x256xf32>
    %c0_150 = arith.constant 0 : index
    %c1_151 = arith.constant 1 : index
    %c0_152 = arith.constant 0 : index
    %c0_153 = arith.constant 0 : index
    %755 = vector.load %arg2[%c0_150, %c1_151, %c0_152, %c0_153] : memref<2x9x4x4xf32, #tpu.memory_space<vmem>>, vector<1x1x4x4xf32>
    %756 = vector.shape_cast %755 : vector<1x1x4x4xf32> to vector<4x4xf32>
    %757 = vector.extract_strided_slice %756 {offsets = [0, 0], sizes = [4, 1], strides = [1, 1]} : vector<4x4xf32> to vector<4x1xf32>
    %758 = vector.extract_strided_slice %694 {offsets = [0, 0], sizes = [1, 256], strides = [1, 1]} : vector<4x256xf32> to vector<1x256xf32>
    %759 = vector.broadcast %757 : vector<4x1xf32> to vector<4x256xf32>
    %760 = vector.broadcast %758 : vector<1x256xf32> to vector<4x256xf32>
    %761 = arith.mulf %759, %760 : vector<4x256xf32>
    %762 = arith.addf %754, %761 : vector<4x256xf32>
    %763 = vector.extract_strided_slice %756 {offsets = [0, 1], sizes = [4, 1], strides = [1, 1]} : vector<4x4xf32> to vector<4x1xf32>
    %764 = vector.extract_strided_slice %694 {offsets = [1, 0], sizes = [1, 256], strides = [1, 1]} : vector<4x256xf32> to vector<1x256xf32>
    %765 = vector.broadcast %763 : vector<4x1xf32> to vector<4x256xf32>
    %766 = vector.broadcast %764 : vector<1x256xf32> to vector<4x256xf32>
    %767 = arith.mulf %765, %766 : vector<4x256xf32>
    %768 = arith.addf %762, %767 : vector<4x256xf32>
    %769 = vector.extract_strided_slice %756 {offsets = [0, 2], sizes = [4, 1], strides = [1, 1]} : vector<4x4xf32> to vector<4x1xf32>
    %770 = vector.extract_strided_slice %694 {offsets = [2, 0], sizes = [1, 256], strides = [1, 1]} : vector<4x256xf32> to vector<1x256xf32>
    %771 = vector.broadcast %769 : vector<4x1xf32> to vector<4x256xf32>
    %772 = vector.broadcast %770 : vector<1x256xf32> to vector<4x256xf32>
    %773 = arith.mulf %771, %772 : vector<4x256xf32>
    %774 = arith.addf %768, %773 : vector<4x256xf32>
    %775 = vector.extract_strided_slice %756 {offsets = [0, 3], sizes = [4, 1], strides = [1, 1]} : vector<4x4xf32> to vector<4x1xf32>
    %776 = vector.extract_strided_slice %694 {offsets = [3, 0], sizes = [1, 256], strides = [1, 1]} : vector<4x256xf32> to vector<1x256xf32>
    %777 = vector.broadcast %775 : vector<4x1xf32> to vector<4x256xf32>
    %778 = vector.broadcast %776 : vector<1x256xf32> to vector<4x256xf32>
    %779 = arith.mulf %777, %778 : vector<4x256xf32>
    %780 = arith.addf %774, %779 : vector<4x256xf32>
    %c0_154 = arith.constant 0 : index
    %c2_155 = arith.constant 2 : index
    %c0_156 = arith.constant 0 : index
    %c0_157 = arith.constant 0 : index
    %781 = vector.load %arg2[%c0_154, %c2_155, %c0_156, %c0_157] : memref<2x9x4x4xf32, #tpu.memory_space<vmem>>, vector<1x1x4x4xf32>
    %782 = vector.shape_cast %781 : vector<1x1x4x4xf32> to vector<4x4xf32>
    %783 = vector.extract_strided_slice %782 {offsets = [0, 0], sizes = [4, 1], strides = [1, 1]} : vector<4x4xf32> to vector<4x1xf32>
    %784 = vector.extract_strided_slice %709 {offsets = [0, 0], sizes = [1, 256], strides = [1, 1]} : vector<4x256xf32> to vector<1x256xf32>
    %785 = vector.broadcast %783 : vector<4x1xf32> to vector<4x256xf32>
    %786 = vector.broadcast %784 : vector<1x256xf32> to vector<4x256xf32>
    %787 = arith.mulf %785, %786 : vector<4x256xf32>
    %788 = arith.addf %780, %787 : vector<4x256xf32>
    %789 = vector.extract_strided_slice %782 {offsets = [0, 1], sizes = [4, 1], strides = [1, 1]} : vector<4x4xf32> to vector<4x1xf32>
    %790 = vector.extract_strided_slice %709 {offsets = [1, 0], sizes = [1, 256], strides = [1, 1]} : vector<4x256xf32> to vector<1x256xf32>
    %791 = vector.broadcast %789 : vector<4x1xf32> to vector<4x256xf32>
    %792 = vector.broadcast %790 : vector<1x256xf32> to vector<4x256xf32>
    %793 = arith.mulf %791, %792 : vector<4x256xf32>
    %794 = arith.addf %788, %793 : vector<4x256xf32>
    %795 = vector.extract_strided_slice %782 {offsets = [0, 2], sizes = [4, 1], strides = [1, 1]} : vector<4x4xf32> to vector<4x1xf32>
    %796 = vector.extract_strided_slice %709 {offsets = [2, 0], sizes = [1, 256], strides = [1, 1]} : vector<4x256xf32> to vector<1x256xf32>
    %797 = vector.broadcast %795 : vector<4x1xf32> to vector<4x256xf32>
    %798 = vector.broadcast %796 : vector<1x256xf32> to vector<4x256xf32>
    %799 = arith.mulf %797, %798 : vector<4x256xf32>
    %800 = arith.addf %794, %799 : vector<4x256xf32>
    %801 = vector.extract_strided_slice %782 {offsets = [0, 3], sizes = [4, 1], strides = [1, 1]} : vector<4x4xf32> to vector<4x1xf32>
    %802 = vector.extract_strided_slice %709 {offsets = [3, 0], sizes = [1, 256], strides = [1, 1]} : vector<4x256xf32> to vector<1x256xf32>
    %803 = vector.broadcast %801 : vector<4x1xf32> to vector<4x256xf32>
    %804 = vector.broadcast %802 : vector<1x256xf32> to vector<4x256xf32>
    %805 = arith.mulf %803, %804 : vector<4x256xf32>
    %806 = arith.addf %800, %805 : vector<4x256xf32>
    %c0_158 = arith.constant 0 : index
    %c3_159 = arith.constant 3 : index
    %c0_160 = arith.constant 0 : index
    %c0_161 = arith.constant 0 : index
    %807 = vector.load %arg2[%c0_158, %c3_159, %c0_160, %c0_161] : memref<2x9x4x4xf32, #tpu.memory_space<vmem>>, vector<1x1x4x4xf32>
    %808 = vector.shape_cast %807 : vector<1x1x4x4xf32> to vector<4x4xf32>
    %809 = vector.extract_strided_slice %808 {offsets = [0, 0], sizes = [4, 1], strides = [1, 1]} : vector<4x4xf32> to vector<4x1xf32>
    %810 = vector.extract_strided_slice %714 {offsets = [0, 0], sizes = [1, 256], strides = [1, 1]} : vector<4x256xf32> to vector<1x256xf32>
    %811 = vector.broadcast %809 : vector<4x1xf32> to vector<4x256xf32>
    %812 = vector.broadcast %810 : vector<1x256xf32> to vector<4x256xf32>
    %813 = arith.mulf %811, %812 : vector<4x256xf32>
    %814 = arith.addf %806, %813 : vector<4x256xf32>
    %815 = vector.extract_strided_slice %808 {offsets = [0, 1], sizes = [4, 1], strides = [1, 1]} : vector<4x4xf32> to vector<4x1xf32>
    %816 = vector.extract_strided_slice %714 {offsets = [1, 0], sizes = [1, 256], strides = [1, 1]} : vector<4x256xf32> to vector<1x256xf32>
    %817 = vector.broadcast %815 : vector<4x1xf32> to vector<4x256xf32>
    %818 = vector.broadcast %816 : vector<1x256xf32> to vector<4x256xf32>
    %819 = arith.mulf %817, %818 : vector<4x256xf32>
    %820 = arith.addf %814, %819 : vector<4x256xf32>
    %821 = vector.extract_strided_slice %808 {offsets = [0, 2], sizes = [4, 1], strides = [1, 1]} : vector<4x4xf32> to vector<4x1xf32>
    %822 = vector.extract_strided_slice %714 {offsets = [2, 0], sizes = [1, 256], strides = [1, 1]} : vector<4x256xf32> to vector<1x256xf32>
    %823 = vector.broadcast %821 : vector<4x1xf32> to vector<4x256xf32>
    %824 = vector.broadcast %822 : vector<1x256xf32> to vector<4x256xf32>
    %825 = arith.mulf %823, %824 : vector<4x256xf32>
    %826 = arith.addf %820, %825 : vector<4x256xf32>
    %827 = vector.extract_strided_slice %808 {offsets = [0, 3], sizes = [4, 1], strides = [1, 1]} : vector<4x4xf32> to vector<4x1xf32>
    %828 = vector.extract_strided_slice %714 {offsets = [3, 0], sizes = [1, 256], strides = [1, 1]} : vector<4x256xf32> to vector<1x256xf32>
    %829 = vector.broadcast %827 : vector<4x1xf32> to vector<4x256xf32>
    %830 = vector.broadcast %828 : vector<1x256xf32> to vector<4x256xf32>
    %831 = arith.mulf %829, %830 : vector<4x256xf32>
    %832 = arith.addf %826, %831 : vector<4x256xf32>
    %c0_162 = arith.constant 0 : index
    %c4_163 = arith.constant 4 : index
    %c0_164 = arith.constant 0 : index
    %c0_165 = arith.constant 0 : index
    %833 = vector.load %arg2[%c0_162, %c4_163, %c0_164, %c0_165] : memref<2x9x4x4xf32, #tpu.memory_space<vmem>>, vector<1x1x4x4xf32>
    %834 = vector.shape_cast %833 : vector<1x1x4x4xf32> to vector<4x4xf32>
    %835 = vector.extract_strided_slice %834 {offsets = [0, 0], sizes = [4, 1], strides = [1, 1]} : vector<4x4xf32> to vector<4x1xf32>
    %836 = vector.extract_strided_slice %689 {offsets = [0, 0], sizes = [1, 256], strides = [1, 1]} : vector<4x256xf32> to vector<1x256xf32>
    %837 = vector.broadcast %835 : vector<4x1xf32> to vector<4x256xf32>
    %838 = vector.broadcast %836 : vector<1x256xf32> to vector<4x256xf32>
    %839 = arith.mulf %837, %838 : vector<4x256xf32>
    %840 = arith.addf %832, %839 : vector<4x256xf32>
    %841 = vector.extract_strided_slice %834 {offsets = [0, 1], sizes = [4, 1], strides = [1, 1]} : vector<4x4xf32> to vector<4x1xf32>
    %842 = vector.extract_strided_slice %689 {offsets = [1, 0], sizes = [1, 256], strides = [1, 1]} : vector<4x256xf32> to vector<1x256xf32>
    %843 = vector.broadcast %841 : vector<4x1xf32> to vector<4x256xf32>
    %844 = vector.broadcast %842 : vector<1x256xf32> to vector<4x256xf32>
    %845 = arith.mulf %843, %844 : vector<4x256xf32>
    %846 = arith.addf %840, %845 : vector<4x256xf32>
    %847 = vector.extract_strided_slice %834 {offsets = [0, 2], sizes = [4, 1], strides = [1, 1]} : vector<4x4xf32> to vector<4x1xf32>
    %848 = vector.extract_strided_slice %689 {offsets = [2, 0], sizes = [1, 256], strides = [1, 1]} : vector<4x256xf32> to vector<1x256xf32>
    %849 = vector.broadcast %847 : vector<4x1xf32> to vector<4x256xf32>
    %850 = vector.broadcast %848 : vector<1x256xf32> to vector<4x256xf32>
    %851 = arith.mulf %849, %850 : vector<4x256xf32>
    %852 = arith.addf %846, %851 : vector<4x256xf32>
    %853 = vector.extract_strided_slice %834 {offsets = [0, 3], sizes = [4, 1], strides = [1, 1]} : vector<4x4xf32> to vector<4x1xf32>
    %854 = vector.extract_strided_slice %689 {offsets = [3, 0], sizes = [1, 256], strides = [1, 1]} : vector<4x256xf32> to vector<1x256xf32>
    %855 = vector.broadcast %853 : vector<4x1xf32> to vector<4x256xf32>
    %856 = vector.broadcast %854 : vector<1x256xf32> to vector<4x256xf32>
    %857 = arith.mulf %855, %856 : vector<4x256xf32>
    %858 = arith.addf %852, %857 : vector<4x256xf32>
    %c0_166 = arith.constant 0 : index
    %c5_167 = arith.constant 5 : index
    %c0_168 = arith.constant 0 : index
    %c0_169 = arith.constant 0 : index
    %859 = vector.load %arg2[%c0_166, %c5_167, %c0_168, %c0_169] : memref<2x9x4x4xf32, #tpu.memory_space<vmem>>, vector<1x1x4x4xf32>
    %860 = vector.shape_cast %859 : vector<1x1x4x4xf32> to vector<4x4xf32>
    %861 = vector.extract_strided_slice %860 {offsets = [0, 0], sizes = [4, 1], strides = [1, 1]} : vector<4x4xf32> to vector<4x1xf32>
    %862 = vector.extract_strided_slice %719 {offsets = [0, 0], sizes = [1, 256], strides = [1, 1]} : vector<4x256xf32> to vector<1x256xf32>
    %863 = vector.broadcast %861 : vector<4x1xf32> to vector<4x256xf32>
    %864 = vector.broadcast %862 : vector<1x256xf32> to vector<4x256xf32>
    %865 = arith.mulf %863, %864 : vector<4x256xf32>
    %866 = arith.addf %858, %865 : vector<4x256xf32>
    %867 = vector.extract_strided_slice %860 {offsets = [0, 1], sizes = [4, 1], strides = [1, 1]} : vector<4x4xf32> to vector<4x1xf32>
    %868 = vector.extract_strided_slice %719 {offsets = [1, 0], sizes = [1, 256], strides = [1, 1]} : vector<4x256xf32> to vector<1x256xf32>
    %869 = vector.broadcast %867 : vector<4x1xf32> to vector<4x256xf32>
    %870 = vector.broadcast %868 : vector<1x256xf32> to vector<4x256xf32>
    %871 = arith.mulf %869, %870 : vector<4x256xf32>
    %872 = arith.addf %866, %871 : vector<4x256xf32>
    %873 = vector.extract_strided_slice %860 {offsets = [0, 2], sizes = [4, 1], strides = [1, 1]} : vector<4x4xf32> to vector<4x1xf32>
    %874 = vector.extract_strided_slice %719 {offsets = [2, 0], sizes = [1, 256], strides = [1, 1]} : vector<4x256xf32> to vector<1x256xf32>
    %875 = vector.broadcast %873 : vector<4x1xf32> to vector<4x256xf32>
    %876 = vector.broadcast %874 : vector<1x256xf32> to vector<4x256xf32>
    %877 = arith.mulf %875, %876 : vector<4x256xf32>
    %878 = arith.addf %872, %877 : vector<4x256xf32>
    %879 = vector.extract_strided_slice %860 {offsets = [0, 3], sizes = [4, 1], strides = [1, 1]} : vector<4x4xf32> to vector<4x1xf32>
    %880 = vector.extract_strided_slice %719 {offsets = [3, 0], sizes = [1, 256], strides = [1, 1]} : vector<4x256xf32> to vector<1x256xf32>
    %881 = vector.broadcast %879 : vector<4x1xf32> to vector<4x256xf32>
    %882 = vector.broadcast %880 : vector<1x256xf32> to vector<4x256xf32>
    %883 = arith.mulf %881, %882 : vector<4x256xf32>
    %884 = arith.addf %878, %883 : vector<4x256xf32>
    %c0_170 = arith.constant 0 : index
    %c6_171 = arith.constant 6 : index
    %c0_172 = arith.constant 0 : index
    %c0_173 = arith.constant 0 : index
    %885 = vector.load %arg2[%c0_170, %c6_171, %c0_172, %c0_173] : memref<2x9x4x4xf32, #tpu.memory_space<vmem>>, vector<1x1x4x4xf32>
    %886 = vector.shape_cast %885 : vector<1x1x4x4xf32> to vector<4x4xf32>
    %887 = vector.extract_strided_slice %886 {offsets = [0, 0], sizes = [4, 1], strides = [1, 1]} : vector<4x4xf32> to vector<4x1xf32>
    %888 = vector.extract_strided_slice %724 {offsets = [0, 0], sizes = [1, 256], strides = [1, 1]} : vector<4x256xf32> to vector<1x256xf32>
    %889 = vector.broadcast %887 : vector<4x1xf32> to vector<4x256xf32>
    %890 = vector.broadcast %888 : vector<1x256xf32> to vector<4x256xf32>
    %891 = arith.mulf %889, %890 : vector<4x256xf32>
    %892 = arith.addf %884, %891 : vector<4x256xf32>
    %893 = vector.extract_strided_slice %886 {offsets = [0, 1], sizes = [4, 1], strides = [1, 1]} : vector<4x4xf32> to vector<4x1xf32>
    %894 = vector.extract_strided_slice %724 {offsets = [1, 0], sizes = [1, 256], strides = [1, 1]} : vector<4x256xf32> to vector<1x256xf32>
    %895 = vector.broadcast %893 : vector<4x1xf32> to vector<4x256xf32>
    %896 = vector.broadcast %894 : vector<1x256xf32> to vector<4x256xf32>
    %897 = arith.mulf %895, %896 : vector<4x256xf32>
    %898 = arith.addf %892, %897 : vector<4x256xf32>
    %899 = vector.extract_strided_slice %886 {offsets = [0, 2], sizes = [4, 1], strides = [1, 1]} : vector<4x4xf32> to vector<4x1xf32>
    %900 = vector.extract_strided_slice %724 {offsets = [2, 0], sizes = [1, 256], strides = [1, 1]} : vector<4x256xf32> to vector<1x256xf32>
    %901 = vector.broadcast %899 : vector<4x1xf32> to vector<4x256xf32>
    %902 = vector.broadcast %900 : vector<1x256xf32> to vector<4x256xf32>
    %903 = arith.mulf %901, %902 : vector<4x256xf32>
    %904 = arith.addf %898, %903 : vector<4x256xf32>
    %905 = vector.extract_strided_slice %886 {offsets = [0, 3], sizes = [4, 1], strides = [1, 1]} : vector<4x4xf32> to vector<4x1xf32>
    %906 = vector.extract_strided_slice %724 {offsets = [3, 0], sizes = [1, 256], strides = [1, 1]} : vector<4x256xf32> to vector<1x256xf32>
    %907 = vector.broadcast %905 : vector<4x1xf32> to vector<4x256xf32>
    %908 = vector.broadcast %906 : vector<1x256xf32> to vector<4x256xf32>
    %909 = arith.mulf %907, %908 : vector<4x256xf32>
    %910 = arith.addf %904, %909 : vector<4x256xf32>
    %c0_174 = arith.constant 0 : index
    %c7_175 = arith.constant 7 : index
    %c0_176 = arith.constant 0 : index
    %c0_177 = arith.constant 0 : index
    %911 = vector.load %arg2[%c0_174, %c7_175, %c0_176, %c0_177] : memref<2x9x4x4xf32, #tpu.memory_space<vmem>>, vector<1x1x4x4xf32>
    %912 = vector.shape_cast %911 : vector<1x1x4x4xf32> to vector<4x4xf32>
    %913 = vector.extract_strided_slice %912 {offsets = [0, 0], sizes = [4, 1], strides = [1, 1]} : vector<4x4xf32> to vector<4x1xf32>
    %914 = vector.extract_strided_slice %699 {offsets = [0, 0], sizes = [1, 256], strides = [1, 1]} : vector<4x256xf32> to vector<1x256xf32>
    %915 = vector.broadcast %913 : vector<4x1xf32> to vector<4x256xf32>
    %916 = vector.broadcast %914 : vector<1x256xf32> to vector<4x256xf32>
    %917 = arith.mulf %915, %916 : vector<4x256xf32>
    %918 = arith.addf %910, %917 : vector<4x256xf32>
    %919 = vector.extract_strided_slice %912 {offsets = [0, 1], sizes = [4, 1], strides = [1, 1]} : vector<4x4xf32> to vector<4x1xf32>
    %920 = vector.extract_strided_slice %699 {offsets = [1, 0], sizes = [1, 256], strides = [1, 1]} : vector<4x256xf32> to vector<1x256xf32>
    %921 = vector.broadcast %919 : vector<4x1xf32> to vector<4x256xf32>
    %922 = vector.broadcast %920 : vector<1x256xf32> to vector<4x256xf32>
    %923 = arith.mulf %921, %922 : vector<4x256xf32>
    %924 = arith.addf %918, %923 : vector<4x256xf32>
    %925 = vector.extract_strided_slice %912 {offsets = [0, 2], sizes = [4, 1], strides = [1, 1]} : vector<4x4xf32> to vector<4x1xf32>
    %926 = vector.extract_strided_slice %699 {offsets = [2, 0], sizes = [1, 256], strides = [1, 1]} : vector<4x256xf32> to vector<1x256xf32>
    %927 = vector.broadcast %925 : vector<4x1xf32> to vector<4x256xf32>
    %928 = vector.broadcast %926 : vector<1x256xf32> to vector<4x256xf32>
    %929 = arith.mulf %927, %928 : vector<4x256xf32>
    %930 = arith.addf %924, %929 : vector<4x256xf32>
    %931 = vector.extract_strided_slice %912 {offsets = [0, 3], sizes = [4, 1], strides = [1, 1]} : vector<4x4xf32> to vector<4x1xf32>
    %932 = vector.extract_strided_slice %699 {offsets = [3, 0], sizes = [1, 256], strides = [1, 1]} : vector<4x256xf32> to vector<1x256xf32>
    %933 = vector.broadcast %931 : vector<4x1xf32> to vector<4x256xf32>
    %934 = vector.broadcast %932 : vector<1x256xf32> to vector<4x256xf32>
    %935 = arith.mulf %933, %934 : vector<4x256xf32>
    %936 = arith.addf %930, %935 : vector<4x256xf32>
    %c0_178 = arith.constant 0 : index
    %c8_179 = arith.constant 8 : index
    %c0_180 = arith.constant 0 : index
    %c0_181 = arith.constant 0 : index
    %937 = vector.load %arg2[%c0_178, %c8_179, %c0_180, %c0_181] : memref<2x9x4x4xf32, #tpu.memory_space<vmem>>, vector<1x1x4x4xf32>
    %938 = vector.shape_cast %937 : vector<1x1x4x4xf32> to vector<4x4xf32>
    %939 = vector.extract_strided_slice %938 {offsets = [0, 0], sizes = [4, 1], strides = [1, 1]} : vector<4x4xf32> to vector<4x1xf32>
    %940 = vector.extract_strided_slice %729 {offsets = [0, 0], sizes = [1, 256], strides = [1, 1]} : vector<4x256xf32> to vector<1x256xf32>
    %941 = vector.broadcast %939 : vector<4x1xf32> to vector<4x256xf32>
    %942 = vector.broadcast %940 : vector<1x256xf32> to vector<4x256xf32>
    %943 = arith.mulf %941, %942 : vector<4x256xf32>
    %944 = arith.addf %936, %943 : vector<4x256xf32>
    %945 = vector.extract_strided_slice %938 {offsets = [0, 1], sizes = [4, 1], strides = [1, 1]} : vector<4x4xf32> to vector<4x1xf32>
    %946 = vector.extract_strided_slice %729 {offsets = [1, 0], sizes = [1, 256], strides = [1, 1]} : vector<4x256xf32> to vector<1x256xf32>
    %947 = vector.broadcast %945 : vector<4x1xf32> to vector<4x256xf32>
    %948 = vector.broadcast %946 : vector<1x256xf32> to vector<4x256xf32>
    %949 = arith.mulf %947, %948 : vector<4x256xf32>
    %950 = arith.addf %944, %949 : vector<4x256xf32>
    %951 = vector.extract_strided_slice %938 {offsets = [0, 2], sizes = [4, 1], strides = [1, 1]} : vector<4x4xf32> to vector<4x1xf32>
    %952 = vector.extract_strided_slice %729 {offsets = [2, 0], sizes = [1, 256], strides = [1, 1]} : vector<4x256xf32> to vector<1x256xf32>
    %953 = vector.broadcast %951 : vector<4x1xf32> to vector<4x256xf32>
    %954 = vector.broadcast %952 : vector<1x256xf32> to vector<4x256xf32>
    %955 = arith.mulf %953, %954 : vector<4x256xf32>
    %956 = arith.addf %950, %955 : vector<4x256xf32>
    %957 = vector.extract_strided_slice %938 {offsets = [0, 3], sizes = [4, 1], strides = [1, 1]} : vector<4x4xf32> to vector<4x1xf32>
    %958 = vector.extract_strided_slice %729 {offsets = [3, 0], sizes = [1, 256], strides = [1, 1]} : vector<4x256xf32> to vector<1x256xf32>
    %959 = vector.broadcast %957 : vector<4x1xf32> to vector<4x256xf32>
    %960 = vector.broadcast %958 : vector<1x256xf32> to vector<4x256xf32>
    %961 = arith.mulf %959, %960 : vector<4x256xf32>
    %962 = arith.addf %956, %961 : vector<4x256xf32>
    %963 = vector.broadcast %26 : vector<4x1xf32> to vector<4x256xf32>
    %964 = arith.addf %962, %963 : vector<4x256xf32>
    %cst_182 = arith.constant dense<0.000000e+00> : vector<4xf32>
    %965 = vector.multi_reduction <add>, %964, %cst_182 [1] : vector<4x256xf32> to vector<4xf32>
    %966 = vector.shape_cast %965 : vector<4xf32> to vector<4x1xf32>
    %cst_183 = arith.constant 2.560000e+02 : f32
    %967 = vector.broadcast %cst_183 : f32 to vector<4x1xf32>
    %968 = arith.divf %966, %967 : vector<4x1xf32>
    %969 = vector.broadcast %968 : vector<4x1xf32> to vector<4x256xf32>
    %970 = arith.subf %964, %969 : vector<4x256xf32>
    %971 = arith.mulf %970, %970 : vector<4x256xf32>
    %cst_184 = arith.constant dense<0.000000e+00> : vector<4xf32>
    %972 = vector.multi_reduction <add>, %971, %cst_184 [1] : vector<4x256xf32> to vector<4xf32>
    %973 = vector.shape_cast %972 : vector<4xf32> to vector<4x1xf32>
    %cst_185 = arith.constant 0.00392156886 : f32
    %974 = vector.broadcast %cst_185 : f32 to vector<4x1xf32>
    %975 = arith.mulf %973, %974 : vector<4x1xf32>
    %cst_186 = arith.constant 9.99999974E-6 : f32
    %976 = vector.broadcast %cst_186 : f32 to vector<4x1xf32>
    %977 = arith.addf %975, %976 : vector<4x1xf32>
    %978 = math.rsqrt %977 : vector<4x1xf32>
    %979 = vector.broadcast %978 : vector<4x1xf32> to vector<4x256xf32>
    %980 = arith.mulf %970, %979 : vector<4x256xf32>
    %981 = vector.shape_cast %964 : vector<4x256xf32> to vector<1x4x256xf32>
    %cst_187 = arith.constant dense<0.000000e+00> : vector<1xf32>
    %982 = vector.multi_reduction <add>, %981, %cst_187 [1, 2] : vector<1x4x256xf32> to vector<1xf32>
    %983 = vector.shape_cast %982 : vector<1xf32> to vector<1x1x1xf32>
    %984 = vector.extract %983[0, 0, 0] : f32 from vector<1x1x1xf32>
    %985 = vector.broadcast %984 : f32 to vector<1x1xf32>
    %cst_188 = arith.constant 1.024000e+03 : f32
    %986 = vector.broadcast %cst_188 : f32 to vector<1x1xf32>
    %987 = arith.divf %985, %986 : vector<1x1xf32>
    %988 = vector.broadcast %987 : vector<1x1xf32> to vector<4x256xf32>
    %989 = arith.subf %964, %988 : vector<4x256xf32>
    %990 = arith.mulf %989, %989 : vector<4x256xf32>
    %991 = vector.shape_cast %990 : vector<4x256xf32> to vector<1x4x256xf32>
    %cst_189 = arith.constant dense<0.000000e+00> : vector<1xf32>
    %992 = vector.multi_reduction <add>, %991, %cst_189 [1, 2] : vector<1x4x256xf32> to vector<1xf32>
    %993 = vector.shape_cast %992 : vector<1xf32> to vector<1x1x1xf32>
    %994 = vector.extract %993[0, 0, 0] : f32 from vector<1x1x1xf32>
    %995 = vector.broadcast %994 : f32 to vector<1x1xf32>
    %cst_190 = arith.constant 9.77517105E-4 : f32
    %996 = vector.broadcast %cst_190 : f32 to vector<1x1xf32>
    %997 = arith.mulf %995, %996 : vector<1x1xf32>
    %cst_191 = arith.constant 9.99999974E-6 : f32
    %998 = vector.broadcast %cst_191 : f32 to vector<1x1xf32>
    %999 = arith.addf %997, %998 : vector<1x1xf32>
    %1000 = math.rsqrt %999 : vector<1x1xf32>
    %1001 = vector.broadcast %1000 : vector<1x1xf32> to vector<4x256xf32>
    %1002 = arith.mulf %989, %1001 : vector<4x256xf32>
    %1003 = vector.broadcast %28 : vector<4x1xf32> to vector<4x256xf32>
    %1004 = arith.mulf %1003, %980 : vector<4x256xf32>
    %1005 = vector.broadcast %29 : vector<4x1xf32> to vector<4x256xf32>
    %1006 = arith.mulf %1005, %1002 : vector<4x256xf32>
    %1007 = arith.addf %1004, %1006 : vector<4x256xf32>
    %1008 = vector.broadcast %686 : vector<4x1xf32> to vector<4x256xf32>
    %1009 = arith.mulf %1007, %1008 : vector<4x256xf32>
    %1010 = vector.broadcast %687 : vector<4x1xf32> to vector<4x256xf32>
    %1011 = arith.addf %1009, %1010 : vector<4x256xf32>
    %cst_192 = arith.constant 0.000000e+00 : f32
    %1012 = vector.broadcast %cst_192 : f32 to vector<4x256xf32>
    %1013 = arith.maximumf %1011, %1012 : vector<4x256xf32>
    %c240_i32_193 = arith.constant 240 : i32
    %1014 = tpu.dynamic_rotate %1013 by %c240_i32_193 dim 1 : vector<4x256xf32>, i32 -> vector<4x256xf32>
    %c16_i32_194 = arith.constant 16 : i32
    %1015 = tpu.dynamic_rotate %1013 by %c16_i32_194 dim 1 : vector<4x256xf32>, i32 -> vector<4x256xf32>
    %1016 = vector.shape_cast %18 : vector<1x256xi1> to vector<1x256xi1>
    %1017 = vector.broadcast %1016 : vector<1x256xi1> to vector<4x256xi1>
    %1018 = arith.select %1017, %1014, %1015 : vector<4x256xi1>, vector<4x256xf32>
    %c16_i32_195 = arith.constant 16 : i32
    %1019 = tpu.dynamic_rotate %1013 by %c16_i32_195 dim 1 : vector<4x256xf32>, i32 -> vector<4x256xf32>
    %c240_i32_196 = arith.constant 240 : i32
    %1020 = tpu.dynamic_rotate %1013 by %c240_i32_196 dim 1 : vector<4x256xf32>, i32 -> vector<4x256xf32>
    %1021 = vector.shape_cast %20 : vector<1x256xi1> to vector<1x256xi1>
    %1022 = vector.broadcast %1021 : vector<1x256xi1> to vector<4x256xi1>
    %1023 = arith.select %1022, %1019, %1020 : vector<4x256xi1>, vector<4x256xf32>
    %c255_i32_197 = arith.constant 255 : i32
    %1024 = tpu.dynamic_rotate %1018 by %c255_i32_197 dim 1 : vector<4x256xf32>, i32 -> vector<4x256xf32>
    %c1_i32_198 = arith.constant 1 : i32
    %1025 = tpu.dynamic_rotate %1018 by %c1_i32_198 dim 1 : vector<4x256xf32>, i32 -> vector<4x256xf32>
    %1026 = vector.shape_cast %22 : vector<1x256xi1> to vector<1x256xi1>
    %1027 = vector.broadcast %1026 : vector<1x256xi1> to vector<4x256xi1>
    %1028 = arith.select %1027, %1024, %1025 : vector<4x256xi1>, vector<4x256xf32>
    %c1_i32_199 = arith.constant 1 : i32
    %1029 = tpu.dynamic_rotate %1018 by %c1_i32_199 dim 1 : vector<4x256xf32>, i32 -> vector<4x256xf32>
    %c255_i32_200 = arith.constant 255 : i32
    %1030 = tpu.dynamic_rotate %1018 by %c255_i32_200 dim 1 : vector<4x256xf32>, i32 -> vector<4x256xf32>
    %1031 = vector.shape_cast %24 : vector<1x256xi1> to vector<1x256xi1>
    %1032 = vector.broadcast %1031 : vector<1x256xi1> to vector<4x256xi1>
    %1033 = arith.select %1032, %1029, %1030 : vector<4x256xi1>, vector<4x256xf32>
    %c255_i32_201 = arith.constant 255 : i32
    %1034 = tpu.dynamic_rotate %1013 by %c255_i32_201 dim 1 : vector<4x256xf32>, i32 -> vector<4x256xf32>
    %c1_i32_202 = arith.constant 1 : i32
    %1035 = tpu.dynamic_rotate %1013 by %c1_i32_202 dim 1 : vector<4x256xf32>, i32 -> vector<4x256xf32>
    %1036 = vector.shape_cast %22 : vector<1x256xi1> to vector<1x256xi1>
    %1037 = vector.broadcast %1036 : vector<1x256xi1> to vector<4x256xi1>
    %1038 = arith.select %1037, %1034, %1035 : vector<4x256xi1>, vector<4x256xf32>
    %c1_i32_203 = arith.constant 1 : i32
    %1039 = tpu.dynamic_rotate %1013 by %c1_i32_203 dim 1 : vector<4x256xf32>, i32 -> vector<4x256xf32>
    %c255_i32_204 = arith.constant 255 : i32
    %1040 = tpu.dynamic_rotate %1013 by %c255_i32_204 dim 1 : vector<4x256xf32>, i32 -> vector<4x256xf32>
    %1041 = vector.shape_cast %24 : vector<1x256xi1> to vector<1x256xi1>
    %1042 = vector.broadcast %1041 : vector<1x256xi1> to vector<4x256xi1>
    %1043 = arith.select %1042, %1039, %1040 : vector<4x256xi1>, vector<4x256xf32>
    %c255_i32_205 = arith.constant 255 : i32
    %1044 = tpu.dynamic_rotate %1023 by %c255_i32_205 dim 1 : vector<4x256xf32>, i32 -> vector<4x256xf32>
    %c1_i32_206 = arith.constant 1 : i32
    %1045 = tpu.dynamic_rotate %1023 by %c1_i32_206 dim 1 : vector<4x256xf32>, i32 -> vector<4x256xf32>
    %1046 = vector.shape_cast %22 : vector<1x256xi1> to vector<1x256xi1>
    %1047 = vector.broadcast %1046 : vector<1x256xi1> to vector<4x256xi1>
    %1048 = arith.select %1047, %1044, %1045 : vector<4x256xi1>, vector<4x256xf32>
    %c1_i32_207 = arith.constant 1 : i32
    %1049 = tpu.dynamic_rotate %1023 by %c1_i32_207 dim 1 : vector<4x256xf32>, i32 -> vector<4x256xf32>
    %c255_i32_208 = arith.constant 255 : i32
    %1050 = tpu.dynamic_rotate %1023 by %c255_i32_208 dim 1 : vector<4x256xf32>, i32 -> vector<4x256xf32>
    %1051 = vector.shape_cast %24 : vector<1x256xi1> to vector<1x256xi1>
    %1052 = vector.broadcast %1051 : vector<1x256xi1> to vector<4x256xi1>
    %1053 = arith.select %1052, %1049, %1050 : vector<4x256xi1>, vector<4x256xf32>
    %c1_209 = arith.constant 1 : index
    %c0_210 = arith.constant 0 : index
    %c0_211 = arith.constant 0 : index
    %c0_212 = arith.constant 0 : index
    %1054 = vector.load %arg2[%c1_209, %c0_210, %c0_211, %c0_212] : memref<2x9x4x4xf32, #tpu.memory_space<vmem>>, vector<1x1x4x4xf32>
    %1055 = vector.shape_cast %1054 : vector<1x1x4x4xf32> to vector<4x4xf32>
    %1056 = vector.extract_strided_slice %1055 {offsets = [0, 0], sizes = [4, 1], strides = [1, 1]} : vector<4x4xf32> to vector<4x1xf32>
    %1057 = vector.extract_strided_slice %1028 {offsets = [0, 0], sizes = [1, 256], strides = [1, 1]} : vector<4x256xf32> to vector<1x256xf32>
    %1058 = vector.broadcast %1056 : vector<4x1xf32> to vector<4x256xf32>
    %1059 = vector.broadcast %1057 : vector<1x256xf32> to vector<4x256xf32>
    %1060 = arith.mulf %1058, %1059 : vector<4x256xf32>
    %1061 = vector.extract_strided_slice %1055 {offsets = [0, 1], sizes = [4, 1], strides = [1, 1]} : vector<4x4xf32> to vector<4x1xf32>
    %1062 = vector.extract_strided_slice %1028 {offsets = [1, 0], sizes = [1, 256], strides = [1, 1]} : vector<4x256xf32> to vector<1x256xf32>
    %1063 = vector.broadcast %1061 : vector<4x1xf32> to vector<4x256xf32>
    %1064 = vector.broadcast %1062 : vector<1x256xf32> to vector<4x256xf32>
    %1065 = arith.mulf %1063, %1064 : vector<4x256xf32>
    %1066 = arith.addf %1060, %1065 : vector<4x256xf32>
    %1067 = vector.extract_strided_slice %1055 {offsets = [0, 2], sizes = [4, 1], strides = [1, 1]} : vector<4x4xf32> to vector<4x1xf32>
    %1068 = vector.extract_strided_slice %1028 {offsets = [2, 0], sizes = [1, 256], strides = [1, 1]} : vector<4x256xf32> to vector<1x256xf32>
    %1069 = vector.broadcast %1067 : vector<4x1xf32> to vector<4x256xf32>
    %1070 = vector.broadcast %1068 : vector<1x256xf32> to vector<4x256xf32>
    %1071 = arith.mulf %1069, %1070 : vector<4x256xf32>
    %1072 = arith.addf %1066, %1071 : vector<4x256xf32>
    %1073 = vector.extract_strided_slice %1055 {offsets = [0, 3], sizes = [4, 1], strides = [1, 1]} : vector<4x4xf32> to vector<4x1xf32>
    %1074 = vector.extract_strided_slice %1028 {offsets = [3, 0], sizes = [1, 256], strides = [1, 1]} : vector<4x256xf32> to vector<1x256xf32>
    %1075 = vector.broadcast %1073 : vector<4x1xf32> to vector<4x256xf32>
    %1076 = vector.broadcast %1074 : vector<1x256xf32> to vector<4x256xf32>
    %1077 = arith.mulf %1075, %1076 : vector<4x256xf32>
    %1078 = arith.addf %1072, %1077 : vector<4x256xf32>
    %c1_213 = arith.constant 1 : index
    %c1_214 = arith.constant 1 : index
    %c0_215 = arith.constant 0 : index
    %c0_216 = arith.constant 0 : index
    %1079 = vector.load %arg2[%c1_213, %c1_214, %c0_215, %c0_216] : memref<2x9x4x4xf32, #tpu.memory_space<vmem>>, vector<1x1x4x4xf32>
    %1080 = vector.shape_cast %1079 : vector<1x1x4x4xf32> to vector<4x4xf32>
    %1081 = vector.extract_strided_slice %1080 {offsets = [0, 0], sizes = [4, 1], strides = [1, 1]} : vector<4x4xf32> to vector<4x1xf32>
    %1082 = vector.extract_strided_slice %1018 {offsets = [0, 0], sizes = [1, 256], strides = [1, 1]} : vector<4x256xf32> to vector<1x256xf32>
    %1083 = vector.broadcast %1081 : vector<4x1xf32> to vector<4x256xf32>
    %1084 = vector.broadcast %1082 : vector<1x256xf32> to vector<4x256xf32>
    %1085 = arith.mulf %1083, %1084 : vector<4x256xf32>
    %1086 = arith.addf %1078, %1085 : vector<4x256xf32>
    %1087 = vector.extract_strided_slice %1080 {offsets = [0, 1], sizes = [4, 1], strides = [1, 1]} : vector<4x4xf32> to vector<4x1xf32>
    %1088 = vector.extract_strided_slice %1018 {offsets = [1, 0], sizes = [1, 256], strides = [1, 1]} : vector<4x256xf32> to vector<1x256xf32>
    %1089 = vector.broadcast %1087 : vector<4x1xf32> to vector<4x256xf32>
    %1090 = vector.broadcast %1088 : vector<1x256xf32> to vector<4x256xf32>
    %1091 = arith.mulf %1089, %1090 : vector<4x256xf32>
    %1092 = arith.addf %1086, %1091 : vector<4x256xf32>
    %1093 = vector.extract_strided_slice %1080 {offsets = [0, 2], sizes = [4, 1], strides = [1, 1]} : vector<4x4xf32> to vector<4x1xf32>
    %1094 = vector.extract_strided_slice %1018 {offsets = [2, 0], sizes = [1, 256], strides = [1, 1]} : vector<4x256xf32> to vector<1x256xf32>
    %1095 = vector.broadcast %1093 : vector<4x1xf32> to vector<4x256xf32>
    %1096 = vector.broadcast %1094 : vector<1x256xf32> to vector<4x256xf32>
    %1097 = arith.mulf %1095, %1096 : vector<4x256xf32>
    %1098 = arith.addf %1092, %1097 : vector<4x256xf32>
    %1099 = vector.extract_strided_slice %1080 {offsets = [0, 3], sizes = [4, 1], strides = [1, 1]} : vector<4x4xf32> to vector<4x1xf32>
    %1100 = vector.extract_strided_slice %1018 {offsets = [3, 0], sizes = [1, 256], strides = [1, 1]} : vector<4x256xf32> to vector<1x256xf32>
    %1101 = vector.broadcast %1099 : vector<4x1xf32> to vector<4x256xf32>
    %1102 = vector.broadcast %1100 : vector<1x256xf32> to vector<4x256xf32>
    %1103 = arith.mulf %1101, %1102 : vector<4x256xf32>
    %1104 = arith.addf %1098, %1103 : vector<4x256xf32>
    %c1_217 = arith.constant 1 : index
    %c2_218 = arith.constant 2 : index
    %c0_219 = arith.constant 0 : index
    %c0_220 = arith.constant 0 : index
    %1105 = vector.load %arg2[%c1_217, %c2_218, %c0_219, %c0_220] : memref<2x9x4x4xf32, #tpu.memory_space<vmem>>, vector<1x1x4x4xf32>
    %1106 = vector.shape_cast %1105 : vector<1x1x4x4xf32> to vector<4x4xf32>
    %1107 = vector.extract_strided_slice %1106 {offsets = [0, 0], sizes = [4, 1], strides = [1, 1]} : vector<4x4xf32> to vector<4x1xf32>
    %1108 = vector.extract_strided_slice %1033 {offsets = [0, 0], sizes = [1, 256], strides = [1, 1]} : vector<4x256xf32> to vector<1x256xf32>
    %1109 = vector.broadcast %1107 : vector<4x1xf32> to vector<4x256xf32>
    %1110 = vector.broadcast %1108 : vector<1x256xf32> to vector<4x256xf32>
    %1111 = arith.mulf %1109, %1110 : vector<4x256xf32>
    %1112 = arith.addf %1104, %1111 : vector<4x256xf32>
    %1113 = vector.extract_strided_slice %1106 {offsets = [0, 1], sizes = [4, 1], strides = [1, 1]} : vector<4x4xf32> to vector<4x1xf32>
    %1114 = vector.extract_strided_slice %1033 {offsets = [1, 0], sizes = [1, 256], strides = [1, 1]} : vector<4x256xf32> to vector<1x256xf32>
    %1115 = vector.broadcast %1113 : vector<4x1xf32> to vector<4x256xf32>
    %1116 = vector.broadcast %1114 : vector<1x256xf32> to vector<4x256xf32>
    %1117 = arith.mulf %1115, %1116 : vector<4x256xf32>
    %1118 = arith.addf %1112, %1117 : vector<4x256xf32>
    %1119 = vector.extract_strided_slice %1106 {offsets = [0, 2], sizes = [4, 1], strides = [1, 1]} : vector<4x4xf32> to vector<4x1xf32>
    %1120 = vector.extract_strided_slice %1033 {offsets = [2, 0], sizes = [1, 256], strides = [1, 1]} : vector<4x256xf32> to vector<1x256xf32>
    %1121 = vector.broadcast %1119 : vector<4x1xf32> to vector<4x256xf32>
    %1122 = vector.broadcast %1120 : vector<1x256xf32> to vector<4x256xf32>
    %1123 = arith.mulf %1121, %1122 : vector<4x256xf32>
    %1124 = arith.addf %1118, %1123 : vector<4x256xf32>
    %1125 = vector.extract_strided_slice %1106 {offsets = [0, 3], sizes = [4, 1], strides = [1, 1]} : vector<4x4xf32> to vector<4x1xf32>
    %1126 = vector.extract_strided_slice %1033 {offsets = [3, 0], sizes = [1, 256], strides = [1, 1]} : vector<4x256xf32> to vector<1x256xf32>
    %1127 = vector.broadcast %1125 : vector<4x1xf32> to vector<4x256xf32>
    %1128 = vector.broadcast %1126 : vector<1x256xf32> to vector<4x256xf32>
    %1129 = arith.mulf %1127, %1128 : vector<4x256xf32>
    %1130 = arith.addf %1124, %1129 : vector<4x256xf32>
    %c1_221 = arith.constant 1 : index
    %c3_222 = arith.constant 3 : index
    %c0_223 = arith.constant 0 : index
    %c0_224 = arith.constant 0 : index
    %1131 = vector.load %arg2[%c1_221, %c3_222, %c0_223, %c0_224] : memref<2x9x4x4xf32, #tpu.memory_space<vmem>>, vector<1x1x4x4xf32>
    %1132 = vector.shape_cast %1131 : vector<1x1x4x4xf32> to vector<4x4xf32>
    %1133 = vector.extract_strided_slice %1132 {offsets = [0, 0], sizes = [4, 1], strides = [1, 1]} : vector<4x4xf32> to vector<4x1xf32>
    %1134 = vector.extract_strided_slice %1038 {offsets = [0, 0], sizes = [1, 256], strides = [1, 1]} : vector<4x256xf32> to vector<1x256xf32>
    %1135 = vector.broadcast %1133 : vector<4x1xf32> to vector<4x256xf32>
    %1136 = vector.broadcast %1134 : vector<1x256xf32> to vector<4x256xf32>
    %1137 = arith.mulf %1135, %1136 : vector<4x256xf32>
    %1138 = arith.addf %1130, %1137 : vector<4x256xf32>
    %1139 = vector.extract_strided_slice %1132 {offsets = [0, 1], sizes = [4, 1], strides = [1, 1]} : vector<4x4xf32> to vector<4x1xf32>
    %1140 = vector.extract_strided_slice %1038 {offsets = [1, 0], sizes = [1, 256], strides = [1, 1]} : vector<4x256xf32> to vector<1x256xf32>
    %1141 = vector.broadcast %1139 : vector<4x1xf32> to vector<4x256xf32>
    %1142 = vector.broadcast %1140 : vector<1x256xf32> to vector<4x256xf32>
    %1143 = arith.mulf %1141, %1142 : vector<4x256xf32>
    %1144 = arith.addf %1138, %1143 : vector<4x256xf32>
    %1145 = vector.extract_strided_slice %1132 {offsets = [0, 2], sizes = [4, 1], strides = [1, 1]} : vector<4x4xf32> to vector<4x1xf32>
    %1146 = vector.extract_strided_slice %1038 {offsets = [2, 0], sizes = [1, 256], strides = [1, 1]} : vector<4x256xf32> to vector<1x256xf32>
    %1147 = vector.broadcast %1145 : vector<4x1xf32> to vector<4x256xf32>
    %1148 = vector.broadcast %1146 : vector<1x256xf32> to vector<4x256xf32>
    %1149 = arith.mulf %1147, %1148 : vector<4x256xf32>
    %1150 = arith.addf %1144, %1149 : vector<4x256xf32>
    %1151 = vector.extract_strided_slice %1132 {offsets = [0, 3], sizes = [4, 1], strides = [1, 1]} : vector<4x4xf32> to vector<4x1xf32>
    %1152 = vector.extract_strided_slice %1038 {offsets = [3, 0], sizes = [1, 256], strides = [1, 1]} : vector<4x256xf32> to vector<1x256xf32>
    %1153 = vector.broadcast %1151 : vector<4x1xf32> to vector<4x256xf32>
    %1154 = vector.broadcast %1152 : vector<1x256xf32> to vector<4x256xf32>
    %1155 = arith.mulf %1153, %1154 : vector<4x256xf32>
    %1156 = arith.addf %1150, %1155 : vector<4x256xf32>
    %c1_225 = arith.constant 1 : index
    %c4_226 = arith.constant 4 : index
    %c0_227 = arith.constant 0 : index
    %c0_228 = arith.constant 0 : index
    %1157 = vector.load %arg2[%c1_225, %c4_226, %c0_227, %c0_228] : memref<2x9x4x4xf32, #tpu.memory_space<vmem>>, vector<1x1x4x4xf32>
    %1158 = vector.shape_cast %1157 : vector<1x1x4x4xf32> to vector<4x4xf32>
    %1159 = vector.extract_strided_slice %1158 {offsets = [0, 0], sizes = [4, 1], strides = [1, 1]} : vector<4x4xf32> to vector<4x1xf32>
    %1160 = vector.extract_strided_slice %1013 {offsets = [0, 0], sizes = [1, 256], strides = [1, 1]} : vector<4x256xf32> to vector<1x256xf32>
    %1161 = vector.broadcast %1159 : vector<4x1xf32> to vector<4x256xf32>
    %1162 = vector.broadcast %1160 : vector<1x256xf32> to vector<4x256xf32>
    %1163 = arith.mulf %1161, %1162 : vector<4x256xf32>
    %1164 = arith.addf %1156, %1163 : vector<4x256xf32>
    %1165 = vector.extract_strided_slice %1158 {offsets = [0, 1], sizes = [4, 1], strides = [1, 1]} : vector<4x4xf32> to vector<4x1xf32>
    %1166 = vector.extract_strided_slice %1013 {offsets = [1, 0], sizes = [1, 256], strides = [1, 1]} : vector<4x256xf32> to vector<1x256xf32>
    %1167 = vector.broadcast %1165 : vector<4x1xf32> to vector<4x256xf32>
    %1168 = vector.broadcast %1166 : vector<1x256xf32> to vector<4x256xf32>
    %1169 = arith.mulf %1167, %1168 : vector<4x256xf32>
    %1170 = arith.addf %1164, %1169 : vector<4x256xf32>
    %1171 = vector.extract_strided_slice %1158 {offsets = [0, 2], sizes = [4, 1], strides = [1, 1]} : vector<4x4xf32> to vector<4x1xf32>
    %1172 = vector.extract_strided_slice %1013 {offsets = [2, 0], sizes = [1, 256], strides = [1, 1]} : vector<4x256xf32> to vector<1x256xf32>
    %1173 = vector.broadcast %1171 : vector<4x1xf32> to vector<4x256xf32>
    %1174 = vector.broadcast %1172 : vector<1x256xf32> to vector<4x256xf32>
    %1175 = arith.mulf %1173, %1174 : vector<4x256xf32>
    %1176 = arith.addf %1170, %1175 : vector<4x256xf32>
    %1177 = vector.extract_strided_slice %1158 {offsets = [0, 3], sizes = [4, 1], strides = [1, 1]} : vector<4x4xf32> to vector<4x1xf32>
    %1178 = vector.extract_strided_slice %1013 {offsets = [3, 0], sizes = [1, 256], strides = [1, 1]} : vector<4x256xf32> to vector<1x256xf32>
    %1179 = vector.broadcast %1177 : vector<4x1xf32> to vector<4x256xf32>
    %1180 = vector.broadcast %1178 : vector<1x256xf32> to vector<4x256xf32>
    %1181 = arith.mulf %1179, %1180 : vector<4x256xf32>
    %1182 = arith.addf %1176, %1181 : vector<4x256xf32>
    %c1_229 = arith.constant 1 : index
    %c5_230 = arith.constant 5 : index
    %c0_231 = arith.constant 0 : index
    %c0_232 = arith.constant 0 : index
    %1183 = vector.load %arg2[%c1_229, %c5_230, %c0_231, %c0_232] : memref<2x9x4x4xf32, #tpu.memory_space<vmem>>, vector<1x1x4x4xf32>
    %1184 = vector.shape_cast %1183 : vector<1x1x4x4xf32> to vector<4x4xf32>
    %1185 = vector.extract_strided_slice %1184 {offsets = [0, 0], sizes = [4, 1], strides = [1, 1]} : vector<4x4xf32> to vector<4x1xf32>
    %1186 = vector.extract_strided_slice %1043 {offsets = [0, 0], sizes = [1, 256], strides = [1, 1]} : vector<4x256xf32> to vector<1x256xf32>
    %1187 = vector.broadcast %1185 : vector<4x1xf32> to vector<4x256xf32>
    %1188 = vector.broadcast %1186 : vector<1x256xf32> to vector<4x256xf32>
    %1189 = arith.mulf %1187, %1188 : vector<4x256xf32>
    %1190 = arith.addf %1182, %1189 : vector<4x256xf32>
    %1191 = vector.extract_strided_slice %1184 {offsets = [0, 1], sizes = [4, 1], strides = [1, 1]} : vector<4x4xf32> to vector<4x1xf32>
    %1192 = vector.extract_strided_slice %1043 {offsets = [1, 0], sizes = [1, 256], strides = [1, 1]} : vector<4x256xf32> to vector<1x256xf32>
    %1193 = vector.broadcast %1191 : vector<4x1xf32> to vector<4x256xf32>
    %1194 = vector.broadcast %1192 : vector<1x256xf32> to vector<4x256xf32>
    %1195 = arith.mulf %1193, %1194 : vector<4x256xf32>
    %1196 = arith.addf %1190, %1195 : vector<4x256xf32>
    %1197 = vector.extract_strided_slice %1184 {offsets = [0, 2], sizes = [4, 1], strides = [1, 1]} : vector<4x4xf32> to vector<4x1xf32>
    %1198 = vector.extract_strided_slice %1043 {offsets = [2, 0], sizes = [1, 256], strides = [1, 1]} : vector<4x256xf32> to vector<1x256xf32>
    %1199 = vector.broadcast %1197 : vector<4x1xf32> to vector<4x256xf32>
    %1200 = vector.broadcast %1198 : vector<1x256xf32> to vector<4x256xf32>
    %1201 = arith.mulf %1199, %1200 : vector<4x256xf32>
    %1202 = arith.addf %1196, %1201 : vector<4x256xf32>
    %1203 = vector.extract_strided_slice %1184 {offsets = [0, 3], sizes = [4, 1], strides = [1, 1]} : vector<4x4xf32> to vector<4x1xf32>
    %1204 = vector.extract_strided_slice %1043 {offsets = [3, 0], sizes = [1, 256], strides = [1, 1]} : vector<4x256xf32> to vector<1x256xf32>
    %1205 = vector.broadcast %1203 : vector<4x1xf32> to vector<4x256xf32>
    %1206 = vector.broadcast %1204 : vector<1x256xf32> to vector<4x256xf32>
    %1207 = arith.mulf %1205, %1206 : vector<4x256xf32>
    %1208 = arith.addf %1202, %1207 : vector<4x256xf32>
    %c1_233 = arith.constant 1 : index
    %c6_234 = arith.constant 6 : index
    %c0_235 = arith.constant 0 : index
    %c0_236 = arith.constant 0 : index
    %1209 = vector.load %arg2[%c1_233, %c6_234, %c0_235, %c0_236] : memref<2x9x4x4xf32, #tpu.memory_space<vmem>>, vector<1x1x4x4xf32>
    %1210 = vector.shape_cast %1209 : vector<1x1x4x4xf32> to vector<4x4xf32>
    %1211 = vector.extract_strided_slice %1210 {offsets = [0, 0], sizes = [4, 1], strides = [1, 1]} : vector<4x4xf32> to vector<4x1xf32>
    %1212 = vector.extract_strided_slice %1048 {offsets = [0, 0], sizes = [1, 256], strides = [1, 1]} : vector<4x256xf32> to vector<1x256xf32>
    %1213 = vector.broadcast %1211 : vector<4x1xf32> to vector<4x256xf32>
    %1214 = vector.broadcast %1212 : vector<1x256xf32> to vector<4x256xf32>
    %1215 = arith.mulf %1213, %1214 : vector<4x256xf32>
    %1216 = arith.addf %1208, %1215 : vector<4x256xf32>
    %1217 = vector.extract_strided_slice %1210 {offsets = [0, 1], sizes = [4, 1], strides = [1, 1]} : vector<4x4xf32> to vector<4x1xf32>
    %1218 = vector.extract_strided_slice %1048 {offsets = [1, 0], sizes = [1, 256], strides = [1, 1]} : vector<4x256xf32> to vector<1x256xf32>
    %1219 = vector.broadcast %1217 : vector<4x1xf32> to vector<4x256xf32>
    %1220 = vector.broadcast %1218 : vector<1x256xf32> to vector<4x256xf32>
    %1221 = arith.mulf %1219, %1220 : vector<4x256xf32>
    %1222 = arith.addf %1216, %1221 : vector<4x256xf32>
    %1223 = vector.extract_strided_slice %1210 {offsets = [0, 2], sizes = [4, 1], strides = [1, 1]} : vector<4x4xf32> to vector<4x1xf32>
    %1224 = vector.extract_strided_slice %1048 {offsets = [2, 0], sizes = [1, 256], strides = [1, 1]} : vector<4x256xf32> to vector<1x256xf32>
    %1225 = vector.broadcast %1223 : vector<4x1xf32> to vector<4x256xf32>
    %1226 = vector.broadcast %1224 : vector<1x256xf32> to vector<4x256xf32>
    %1227 = arith.mulf %1225, %1226 : vector<4x256xf32>
    %1228 = arith.addf %1222, %1227 : vector<4x256xf32>
    %1229 = vector.extract_strided_slice %1210 {offsets = [0, 3], sizes = [4, 1], strides = [1, 1]} : vector<4x4xf32> to vector<4x1xf32>
    %1230 = vector.extract_strided_slice %1048 {offsets = [3, 0], sizes = [1, 256], strides = [1, 1]} : vector<4x256xf32> to vector<1x256xf32>
    %1231 = vector.broadcast %1229 : vector<4x1xf32> to vector<4x256xf32>
    %1232 = vector.broadcast %1230 : vector<1x256xf32> to vector<4x256xf32>
    %1233 = arith.mulf %1231, %1232 : vector<4x256xf32>
    %1234 = arith.addf %1228, %1233 : vector<4x256xf32>
    %c1_237 = arith.constant 1 : index
    %c7_238 = arith.constant 7 : index
    %c0_239 = arith.constant 0 : index
    %c0_240 = arith.constant 0 : index
    %1235 = vector.load %arg2[%c1_237, %c7_238, %c0_239, %c0_240] : memref<2x9x4x4xf32, #tpu.memory_space<vmem>>, vector<1x1x4x4xf32>
    %1236 = vector.shape_cast %1235 : vector<1x1x4x4xf32> to vector<4x4xf32>
    %1237 = vector.extract_strided_slice %1236 {offsets = [0, 0], sizes = [4, 1], strides = [1, 1]} : vector<4x4xf32> to vector<4x1xf32>
    %1238 = vector.extract_strided_slice %1023 {offsets = [0, 0], sizes = [1, 256], strides = [1, 1]} : vector<4x256xf32> to vector<1x256xf32>
    %1239 = vector.broadcast %1237 : vector<4x1xf32> to vector<4x256xf32>
    %1240 = vector.broadcast %1238 : vector<1x256xf32> to vector<4x256xf32>
    %1241 = arith.mulf %1239, %1240 : vector<4x256xf32>
    %1242 = arith.addf %1234, %1241 : vector<4x256xf32>
    %1243 = vector.extract_strided_slice %1236 {offsets = [0, 1], sizes = [4, 1], strides = [1, 1]} : vector<4x4xf32> to vector<4x1xf32>
    %1244 = vector.extract_strided_slice %1023 {offsets = [1, 0], sizes = [1, 256], strides = [1, 1]} : vector<4x256xf32> to vector<1x256xf32>
    %1245 = vector.broadcast %1243 : vector<4x1xf32> to vector<4x256xf32>
    %1246 = vector.broadcast %1244 : vector<1x256xf32> to vector<4x256xf32>
    %1247 = arith.mulf %1245, %1246 : vector<4x256xf32>
    %1248 = arith.addf %1242, %1247 : vector<4x256xf32>
    %1249 = vector.extract_strided_slice %1236 {offsets = [0, 2], sizes = [4, 1], strides = [1, 1]} : vector<4x4xf32> to vector<4x1xf32>
    %1250 = vector.extract_strided_slice %1023 {offsets = [2, 0], sizes = [1, 256], strides = [1, 1]} : vector<4x256xf32> to vector<1x256xf32>
    %1251 = vector.broadcast %1249 : vector<4x1xf32> to vector<4x256xf32>
    %1252 = vector.broadcast %1250 : vector<1x256xf32> to vector<4x256xf32>
    %1253 = arith.mulf %1251, %1252 : vector<4x256xf32>
    %1254 = arith.addf %1248, %1253 : vector<4x256xf32>
    %1255 = vector.extract_strided_slice %1236 {offsets = [0, 3], sizes = [4, 1], strides = [1, 1]} : vector<4x4xf32> to vector<4x1xf32>
    %1256 = vector.extract_strided_slice %1023 {offsets = [3, 0], sizes = [1, 256], strides = [1, 1]} : vector<4x256xf32> to vector<1x256xf32>
    %1257 = vector.broadcast %1255 : vector<4x1xf32> to vector<4x256xf32>
    %1258 = vector.broadcast %1256 : vector<1x256xf32> to vector<4x256xf32>
    %1259 = arith.mulf %1257, %1258 : vector<4x256xf32>
    %1260 = arith.addf %1254, %1259 : vector<4x256xf32>
    %c1_241 = arith.constant 1 : index
    %c8_242 = arith.constant 8 : index
    %c0_243 = arith.constant 0 : index
    %c0_244 = arith.constant 0 : index
    %1261 = vector.load %arg2[%c1_241, %c8_242, %c0_243, %c0_244] : memref<2x9x4x4xf32, #tpu.memory_space<vmem>>, vector<1x1x4x4xf32>
    %1262 = vector.shape_cast %1261 : vector<1x1x4x4xf32> to vector<4x4xf32>
    %1263 = vector.extract_strided_slice %1262 {offsets = [0, 0], sizes = [4, 1], strides = [1, 1]} : vector<4x4xf32> to vector<4x1xf32>
    %1264 = vector.extract_strided_slice %1053 {offsets = [0, 0], sizes = [1, 256], strides = [1, 1]} : vector<4x256xf32> to vector<1x256xf32>
    %1265 = vector.broadcast %1263 : vector<4x1xf32> to vector<4x256xf32>
    %1266 = vector.broadcast %1264 : vector<1x256xf32> to vector<4x256xf32>
    %1267 = arith.mulf %1265, %1266 : vector<4x256xf32>
    %1268 = arith.addf %1260, %1267 : vector<4x256xf32>
    %1269 = vector.extract_strided_slice %1262 {offsets = [0, 1], sizes = [4, 1], strides = [1, 1]} : vector<4x4xf32> to vector<4x1xf32>
    %1270 = vector.extract_strided_slice %1053 {offsets = [1, 0], sizes = [1, 256], strides = [1, 1]} : vector<4x256xf32> to vector<1x256xf32>
    %1271 = vector.broadcast %1269 : vector<4x1xf32> to vector<4x256xf32>
    %1272 = vector.broadcast %1270 : vector<1x256xf32> to vector<4x256xf32>
    %1273 = arith.mulf %1271, %1272 : vector<4x256xf32>
    %1274 = arith.addf %1268, %1273 : vector<4x256xf32>
    %1275 = vector.extract_strided_slice %1262 {offsets = [0, 2], sizes = [4, 1], strides = [1, 1]} : vector<4x4xf32> to vector<4x1xf32>
    %1276 = vector.extract_strided_slice %1053 {offsets = [2, 0], sizes = [1, 256], strides = [1, 1]} : vector<4x256xf32> to vector<1x256xf32>
    %1277 = vector.broadcast %1275 : vector<4x1xf32> to vector<4x256xf32>
    %1278 = vector.broadcast %1276 : vector<1x256xf32> to vector<4x256xf32>
    %1279 = arith.mulf %1277, %1278 : vector<4x256xf32>
    %1280 = arith.addf %1274, %1279 : vector<4x256xf32>
    %1281 = vector.extract_strided_slice %1262 {offsets = [0, 3], sizes = [4, 1], strides = [1, 1]} : vector<4x4xf32> to vector<4x1xf32>
    %1282 = vector.extract_strided_slice %1053 {offsets = [3, 0], sizes = [1, 256], strides = [1, 1]} : vector<4x256xf32> to vector<1x256xf32>
    %1283 = vector.broadcast %1281 : vector<4x1xf32> to vector<4x256xf32>
    %1284 = vector.broadcast %1282 : vector<1x256xf32> to vector<4x256xf32>
    %1285 = arith.mulf %1283, %1284 : vector<4x256xf32>
    %1286 = arith.addf %1280, %1285 : vector<4x256xf32>
    %1287 = vector.broadcast %27 : vector<4x1xf32> to vector<4x256xf32>
    %1288 = arith.addf %1286, %1287 : vector<4x256xf32>
    %cst_245 = arith.constant dense<0.000000e+00> : vector<4xf32>
    %1289 = vector.multi_reduction <add>, %1288, %cst_245 [1] : vector<4x256xf32> to vector<4xf32>
    %1290 = vector.shape_cast %1289 : vector<4xf32> to vector<4x1xf32>
    %cst_246 = arith.constant 2.560000e+02 : f32
    %1291 = vector.broadcast %cst_246 : f32 to vector<4x1xf32>
    %1292 = arith.divf %1290, %1291 : vector<4x1xf32>
    %1293 = vector.broadcast %1292 : vector<4x1xf32> to vector<4x256xf32>
    %1294 = arith.subf %1288, %1293 : vector<4x256xf32>
    %1295 = arith.mulf %1294, %1294 : vector<4x256xf32>
    %cst_247 = arith.constant dense<0.000000e+00> : vector<4xf32>
    %1296 = vector.multi_reduction <add>, %1295, %cst_247 [1] : vector<4x256xf32> to vector<4xf32>
    %1297 = vector.shape_cast %1296 : vector<4xf32> to vector<4x1xf32>
    %cst_248 = arith.constant 0.00392156886 : f32
    %1298 = vector.broadcast %cst_248 : f32 to vector<4x1xf32>
    %1299 = arith.mulf %1297, %1298 : vector<4x1xf32>
    %cst_249 = arith.constant 9.99999974E-6 : f32
    %1300 = vector.broadcast %cst_249 : f32 to vector<4x1xf32>
    %1301 = arith.addf %1299, %1300 : vector<4x1xf32>
    %1302 = math.rsqrt %1301 : vector<4x1xf32>
    %1303 = vector.broadcast %1302 : vector<4x1xf32> to vector<4x256xf32>
    %1304 = arith.mulf %1294, %1303 : vector<4x256xf32>
    %1305 = vector.shape_cast %1288 : vector<4x256xf32> to vector<1x4x256xf32>
    %cst_250 = arith.constant dense<0.000000e+00> : vector<1xf32>
    %1306 = vector.multi_reduction <add>, %1305, %cst_250 [1, 2] : vector<1x4x256xf32> to vector<1xf32>
    %1307 = vector.shape_cast %1306 : vector<1xf32> to vector<1x1x1xf32>
    %1308 = vector.extract %1307[0, 0, 0] : f32 from vector<1x1x1xf32>
    %1309 = vector.broadcast %1308 : f32 to vector<1x1xf32>
    %cst_251 = arith.constant 1.024000e+03 : f32
    %1310 = vector.broadcast %cst_251 : f32 to vector<1x1xf32>
    %1311 = arith.divf %1309, %1310 : vector<1x1xf32>
    %1312 = vector.broadcast %1311 : vector<1x1xf32> to vector<4x256xf32>
    %1313 = arith.subf %1288, %1312 : vector<4x256xf32>
    %1314 = arith.mulf %1313, %1313 : vector<4x256xf32>
    %1315 = vector.shape_cast %1314 : vector<4x256xf32> to vector<1x4x256xf32>
    %cst_252 = arith.constant dense<0.000000e+00> : vector<1xf32>
    %1316 = vector.multi_reduction <add>, %1315, %cst_252 [1, 2] : vector<1x4x256xf32> to vector<1xf32>
    %1317 = vector.shape_cast %1316 : vector<1xf32> to vector<1x1x1xf32>
    %1318 = vector.extract %1317[0, 0, 0] : f32 from vector<1x1x1xf32>
    %1319 = vector.broadcast %1318 : f32 to vector<1x1xf32>
    %cst_253 = arith.constant 9.77517105E-4 : f32
    %1320 = vector.broadcast %cst_253 : f32 to vector<1x1xf32>
    %1321 = arith.mulf %1319, %1320 : vector<1x1xf32>
    %cst_254 = arith.constant 9.99999974E-6 : f32
    %1322 = vector.broadcast %cst_254 : f32 to vector<1x1xf32>
    %1323 = arith.addf %1321, %1322 : vector<1x1xf32>
    %1324 = math.rsqrt %1323 : vector<1x1xf32>
    %1325 = vector.broadcast %1324 : vector<1x1xf32> to vector<4x256xf32>
    %1326 = arith.mulf %1313, %1325 : vector<4x256xf32>
    %1327 = vector.broadcast %30 : vector<4x1xf32> to vector<4x256xf32>
    %1328 = arith.mulf %1327, %1304 : vector<4x256xf32>
    %1329 = vector.broadcast %31 : vector<4x1xf32> to vector<4x256xf32>
    %1330 = arith.mulf %1329, %1326 : vector<4x256xf32>
    %1331 = arith.addf %1328, %1330 : vector<4x256xf32>
    %1332 = vector.broadcast %686 : vector<4x1xf32> to vector<4x256xf32>
    %1333 = arith.mulf %1331, %1332 : vector<4x256xf32>
    %1334 = vector.broadcast %687 : vector<4x1xf32> to vector<4x256xf32>
    %1335 = arith.addf %1333, %1334 : vector<4x256xf32>
    %1336 = arith.addf %689, %1335 : vector<4x256xf32>
    %c1_255 = arith.constant 1 : index
    %c0_256 = arith.constant 0 : index
    %c0_257 = arith.constant 0 : index
    %1337 = vector.load %arg4[%c1_255, %c0_256, %c0_257] : memref<2x4x256xf32, #tpu.memory_space<vmem>>, vector<1x4x256xf32>
    %1338 = vector.shape_cast %1337 : vector<1x4x256xf32> to vector<4x256xf32>
    %1339 = vector.shape_cast %1336 : vector<4x256xf32> to vector<1x4x256xf32>
    tpu.vector_store %arg4[%c1_255, %c0_256, %c0_257], %1339 {strides = array<i32>} : memref<2x4x256xf32, #tpu.memory_space<vmem>>, vector<1x4x256xf32>,
    return
  }
  func.func @transform_0(%arg0: i32) -> (i32, i32, i32) {
    %c0_i32 = arith.constant 0 : i32
    %c0_i32_0 = arith.constant 0 : i32
    %c0_i32_1 = arith.constant 0 : i32
    %c0_i32_2 = arith.constant 0 : i32
    return %c0_i32, %c0_i32_0, %c0_i32_1 : i32, i32, i32
  }
  func.func @transform_1(%arg0: i32) -> (i32, i32, i32, i32) {
    %c0_i32 = arith.constant 0 : i32
    %c0_i32_0 = arith.constant 0 : i32
    %c0_i32_1 = arith.constant 0 : i32
    %c0_i32_2 = arith.constant 0 : i32
    %c0_i32_3 = arith.constant 0 : i32
    return %c0_i32, %c0_i32_0, %c0_i32_1, %c0_i32_2 : i32, i32, i32, i32
  }
  func.func @transform_2(%arg0: i32) -> (i32, i32) {
    %c0_i32 = arith.constant 0 : i32
    %c0_i32_0 = arith.constant 0 : i32
    %c0_i32_1 = arith.constant 0 : i32
    return %c0_i32, %c0_i32_0 : i32, i32
  }
  func.func @transform_3(%arg0: i32) -> (i32, i32, i32) {
    %c0_i32 = arith.constant 0 : i32
    %c0_i32_0 = arith.constant 0 : i32
    %c0_i32_1 = arith.constant 0 : i32
    %c0_i32_2 = arith.constant 0 : i32
    return %c0_i32, %c0_i32_0, %c0_i32_1 : i32, i32, i32
  }
}

</mosaic_0001>

<bundles_post_ra>
// kernel: resnet_adailn_block.1
= control target key start
LH: loop header
LB: loop body
LE: loop exit
PB: predicated region body
PF: predicated region fallthrough
CT: control target
= control target key end

     0   :  { %v5080_v1 = vmov 1   ;;  %v5076_v2 = vmov 0   ;;  %s3351_s14 = smov 16   ;;  %s3352_s15 = smov 112   ;;  %v5078_v5 = vmov 2   ;;  %v5082_v6 = vmov 3   ;;  %s5068_s0 = inlined_call_operand.vmem [shape: f32[2,4,256], index: 0, kind: input, shape index: {}]   ;;  %s5069_s1 = inlined_call_operand.vmem [shape: f32[2,9,4,4], index: 1, kind: input, shape index: {}]   ;;  %s5070_s2 = inlined_call_operand.vmem [shape: f32[4,10], index: 2, kind: input, shape index: {}]   ;;  %s5071_s3 = inlined_call_operand.vmem [shape: f32[2,4,256], index: 3, kind: output, shape index: {}]  }
   0x1   :  { %v3386_v0 = vld [vmem:[%s5068_s0] sm:$0xff]  ;;  %3183 = vset.pattern.permute.xlu1 %v5080_v1  ;;  %3182 = vset.pattern.permute.xlu0 %v5076_v2  ;;  %v3117_v8 = vld [vmem:[%s5069_s1 + $0x8] sm:$0xf]  ;;  %s3355_s22 = smov 1   ;;  %s3356_s23 = smov 127   ;;  %v14_v9 = vlaneseq  ;;  %vm784_vm9 = vcmask 1043456  }
   0x2   :  { %61 = vrot.lane.b32.xlu1 %v3386_v0, %s3351_s14  ;;  %54 = vrot.lane.b32.xlu0 %v3386_v0, %s3352_s15  ;;  %v52_v3 = vcombine.high %v3386_v0, %v3386_v0  ;;  %v137_v4 = vld [vmem:[%s5069_s1] sm:$0xf]  ;;  %v3116_v7 = vld [vmem:[%s5069_s1 + $0x4] sm:$0xf] }
   0x3   :  { %v3425_v10 = vand.u32 127, %v14_v9  ;;  %v3118_v19 = vld [vmem:[%s5069_s1 + $0xc] sm:$0xf]  ;;  %v3119_v20 = vld [vmem:[%s5069_s1 + $0x10] sm:$0xf]  ;;  %v3548_v47 = vshrl.u32 %v14_v9, 7 }
   0x4   :  { %v3120_v21 = vld [vmem:[%s5069_s1 + $0x14] sm:$0xf]  ;;  %v3121_v22 = vld [vmem:[%s5069_s1 + $0x18] sm:$0xf]  ;;  %v3122_v23 = vld [vmem:[%s5069_s1 + $0x1c] sm:$0xf] }
   0x5   :  { %vm41_vm0 = vcmp.lt.s32.totalorder %v3425_v10, 16  ;;  %vm58_vm1 = vcmp.lt.s32.totalorder %v3425_v10, 112  ;;  %v3484_v24 = vadd.s32 128, %v3425_v10  ;;  %v3123_v26 = vld [vmem:[%s5069_s1 + $0x20] sm:$0xf]  ;;  %5104 = vst [vmem:[#allocation2_spill] sm:$0xff] %v3548_v47 }
   0x6   :  { %63 = vrot.lane.b32.xlu1 %v52_v3, %s3351_s14  ;;  %56 = vrot.lane.b32.xlu0 %v52_v3, %s3352_s15  ;;  %v3527_v36 = vld [vmem:[%s5070_s2] sm:$0xf]  ;;  %v21_v48 = vand.u32 15, %v3425_v10  ;;  %vm83_vm3 = vcmp.lt.s32.totalorder %v3425_v10, 127  ;;  %vm90_vm4 = vcmp.lt.s32.totalorder %v3425_v10, 1  ;;  %v3558_v52 = vsub.s32 0, %v3548_v47 }
   0x7   :  { %vm44_vm2 = vcmp.ge.s32.totalorder %v3484_v24, 240  ;;  %v28_v46 = vand.u32 15, %v3484_v24  ;;  %v3561_v53 = vsub.s32 1, %v3548_v47  ;;  %v3576_v60 = vsub.s32 2, %v3548_v47  ;;  %v3149_v24 = vld [vmem:[%s5069_s1 + $0x40] sm:$0xf] }
   0x8   :  { %vm3563_vm6 = vcmp.eq.s32.totalorder %v21_v48, 0  ;;  %v3579_v61 = vsub.s32 3, %v3548_v47  ;;  %vm3605_vm8 = vcmp.eq.s32.totalorder %v21_v48, 15 }
   0x9   :  { %vm3553_vm5 = vcmp.eq.s32.totalorder %v28_v46, 0  ;;  %vm3597_vm7 = vcmp.eq.s32.totalorder %v28_v46, 15 }
   0xa   :  { %154 = vperm.xlu1 %3183, %v137_v4   ;;  %140 = vperm.xlu0 %3182, %v137_v4  }
   0xe   :  { %3184 = vset.pattern.permute.xlu1 %v5078_v5  ;;  %3185 = vset.pattern.permute.xlu0 %v5082_v6 }
   0xf   :  { %170 = vperm.xlu1 %3184, %v137_v4   ;;  %186 = vperm.xlu0 %3185, %v137_v4  }
  0x13   :  { %3186 = vset.pattern.permute.xlu1 %v5076_v2  ;;  %3188 = vset.pattern.permute.xlu0 %v5078_v5 }
  0x14   :  { %205 = vperm.xlu1 %3186, %v3116_v7   ;;  %237 = vperm.xlu0 %3188, %v3116_v7  }
  0x18   :  { %3187 = vset.pattern.permute.xlu1 %v5080_v1  ;;  %3191 = vset.pattern.permute.xlu0 %v5080_v1 }
  0x19   :  { %221 = vperm.xlu1 %3187, %v3116_v7   ;;  %288 = vperm.xlu0 %3191, %v3117_v8  }
  0x1d   :  { %3189 = vset.pattern.permute.xlu1 %v5082_v6  ;;  %111 = vrot.lane.b32.xlu0 %v3386_v0, %s3355_s22 }
  0x1e   :  { %253 = vperm.xlu1 %3189, %v3116_v7  }
  0x22   :  { %3190 = vset.pattern.permute.xlu1 %v5076_v2 }
  0x23   :  { %272 = vperm.xlu1 %3190, %v3117_v8  }
  0x27   :  { %3192 = vset.pattern.permute.xlu1 %v5078_v5 }
  0x28   :  { %304 = vperm.xlu1 %3192, %v3117_v8  }
  0x2c   :  { %3193 = vset.pattern.permute.xlu1 %v5082_v6 }
  0x2d   :  { %320 = vperm.xlu1 %3193, %v3117_v8  }
  0x31   :  { %105 = vrot.lane.b32.xlu1 %v3386_v0, %s3356_s23 }
  0x32   :  { %3195 = vset.pattern.permute.xlu1 %v5078_v5 }
  0x35   :  { %107 = vrot.lane.b32.xlu1 %v52_v3, %s3356_s23 }
  0x39   :  { %113 = vrot.lane.b32.xlu1 %v52_v3, %s3355_s22 }
  0x74   :  { %v62_v11 = vpop.permute.xlu1 %61  ;;  %v55_v12 = vpop.permute.xlu0 %54 }
  0x78   :  { %v64_v13 = vpop.permute.xlu1 %63  ;;  %v57_v14 = vpop.permute.xlu0 %56 }
  0x79   :  { %v3431_v15 = vsel %vm41_vm0, %v62_v11, %v64_v13  ;;  %v66_v16 = vsel %vm41_vm0, %v64_v13, %v62_v11  ;;  %v3437_v17 = vsel %vm58_vm1, %v55_v12, %v57_v14  ;;  %v60_v25 = vsel %vm58_vm1, %v57_v14, %v55_v12 }
  0x7a   :  { %81 = vrot.lane.b32.xlu0 %v3431_v15, %s3356_s23  ;;  %v3444_v18 = vsel %vm41_vm0, %v3437_v17, %v66_v16  ;;  %v3497_v27 = vsel %vm44_vm2, %v3431_v15, %v60_v25  ;;  %v247_v46 = vrot.slane %v3431_v15, %v3576_v60 }
  0x7b   :  { %79 = vrot.lane.b32.xlu1 %v3444_v18, %s3356_s23 }
  0x7e   :  { %88 = vrot.lane.b32.xlu0 %v3431_v15, %s3355_s22 }
  0x7f   :  { %86 = vrot.lane.b32.xlu1 %v3444_v18, %s3355_s22 }
  0x82   :  { %355 = vperm.xlu0 %3191, %v3118_v19  }
  0x83   :  { %371 = vperm.xlu1 %3195, %v3118_v19  }
  0x85   :  { %v3499_v28 = vpop.permute.xlu1 %154  ;;  %v141_v35 = vpop.permute.xlu0 %140 }
  0x86   :  { %3194 = vset.pattern.permute.xlu0 %v5076_v2 }
  0x87   :  { %339 = vperm.xlu0 %3194, %v3118_v19   ;;  %3196 = vset.pattern.permute.xlu1 %v5082_v6 }
  0x88   :  { %387 = vperm.xlu1 %3196, %v3118_v19  }
  0x8a   :  { %v3507_v29 = vpop.permute.xlu1 %170  ;;  %v187_v38 = vpop.permute.xlu0 %186 }
  0x8b   :  { %406 = vperm.xlu0 %3194, %v3119_v20  }
  0x8c   :  { %3197 = vset.pattern.permute.xlu1 %v5080_v1 }
  0x8d   :  { %432 = vperm.xlu1 %3197, %v3119_v20  }
  0x8f   :  { %3199 = vset.pattern.permute.xlu0 %v5082_v6  ;;  %v3509_v30 = vpop.permute.xlu1 %205  ;;  %v3536_v40 = vpop.permute.xlu0 %237 }
  0x90   :  { %484 = vperm.xlu0 %3199, %v3119_v20  }
  0x91   :  { %3198 = vset.pattern.permute.xlu1 %v5078_v5 }
  0x92   :  { %458 = vperm.xlu1 %3198, %v3119_v20  }
  0x94   :  { %3202 = vset.pattern.permute.xlu0 %v5078_v5  ;;  %v3513_v31 = vpop.permute.xlu1 %221  ;;  %v3538_v41 = vpop.permute.xlu0 %288 }
  0x95   :  { %545 = vperm.xlu0 %3202, %v3120_v21  }
  0x96   :  { %3200 = vset.pattern.permute.xlu1 %v5076_v2 }
  0x97   :  { %513 = vperm.xlu1 %3200, %v3120_v21  }
  0x98   :  { %v3542_v43 = vpop.permute.xlu0 %111 }
  0x99   :  { %121 = vrot.lane.b32.xlu0 %v3437_v17, %s3356_s23  ;;  %v3516_v32 = vpop.permute.xlu1 %253 }
  0x9a   :  { %3205 = vset.pattern.permute.xlu0 %v5080_v1 }
  0x9b   :  { %3201 = vset.pattern.permute.xlu1 %v5080_v1 }
  0x9c   :  { %529 = vperm.xlu1 %3201, %v3120_v21  }
  0x9d   :  { %127 = vrot.lane.b32.xlu0 %v3437_v17, %s3355_s22 }
  0x9e   :  { %v3519_v33 = vpop.permute.xlu1 %272 }
  0xa0   :  { %3203 = vset.pattern.permute.xlu1 %v5082_v6 }
  0xa1   :  { %596 = vperm.xlu0 %3205, %v3121_v22   ;;  %561 = vperm.xlu1 %3203, %v3120_v21  }
  0xa3   :  { %v3522_v34 = vpop.permute.xlu1 %304 }
  0xa5   :  { %3208 = vset.pattern.permute.xlu0 %v5076_v2  ;;  %3204 = vset.pattern.permute.xlu1 %v5076_v2 }
  0xa6   :  { %647 = vperm.xlu0 %3208, %v3122_v23   ;;  %580 = vperm.xlu1 %3204, %v3121_v22  }
  0xa8   :  { %v3531_v37 = vpop.permute.xlu1 %320 }
  0xaa   :  { %3211 = vset.pattern.permute.xlu0 %v5082_v6  ;;  %3206 = vset.pattern.permute.xlu1 %v5078_v5 }
  0xab   :  { %695 = vperm.xlu0 %3211, %v3122_v23   ;;  %612 = vperm.xlu1 %3206, %v3121_v22  }
  0xac   :  { %v3534_v39 = vpop.permute.xlu1 %105 }
  0xaf   :  { %123 = vrot.lane.b32.xlu1 %v3497_v27, %s3356_s23  ;;  %3214 = vset.pattern.permute.xlu0 %v5078_v5 }
  0xb0   :  { %3207 = vset.pattern.permute.xlu1 %v5082_v6  ;;  %746 = vperm.xlu0 %3214, %v3123_v26   ;;  %v3540_v42 = vpop.permute.xlu1 %107 }
  0xb3   :  { %129 = vrot.lane.b32.xlu1 %v3497_v27, %s3355_s22 }
  0xb4   :  { %v3544_v44 = vpop.permute.xlu1 %113 }
  0xb7   :  { %628 = vperm.xlu1 %3207, %v3121_v22  }
  0xbb   :  { %3209 = vset.pattern.permute.xlu1 %v5080_v1 }
  0xbc   :  { %663 = vperm.xlu1 %3209, %v3122_v23  }
  0xc0   :  { %3210 = vset.pattern.permute.xlu1 %v5078_v5 }
  0xc1   :  { %679 = vperm.xlu1 %3210, %v3122_v23  }
  0xc5   :  { %3212 = vset.pattern.permute.xlu1 %v5076_v2 }
  0xc6   :  { %714 = vperm.xlu1 %3212, %v3123_v26  }
  0xca   :  { %3213 = vset.pattern.permute.xlu1 %v5080_v1 }
  0xcb   :  { %730 = vperm.xlu1 %3213, %v3123_v26  }
  0xcf   :  { %3215 = vset.pattern.permute.xlu1 %v5082_v6 }
  0xd0   :  { %762 = vperm.xlu1 %3215, %v3123_v26  }
  0xd4   :  { %3216 = vset.pattern.permute.xlu1 %v5076_v2 }
  0xd5   :  { %779 = vperm.xlu1 %3216, %v3527_v36  }
  0xd9   :  { %3217 = vset.pattern.permute.xlu1 %v5082_v6 }
  0xec   :  { %v82_v45 = vpop.permute.xlu0 %81 }
  0xed   :  { %v80_v49 = vpop.permute.xlu1 %79 }
  0xee   :  { %v84_v56 = vsel %vm83_vm3, %v80_v49, %v82_v45  ;;  %v85_v57 = vsel %vm83_vm3, %v82_v45, %v80_v49  ;;  %v215_v45 = vrot.slane %v3431_v15, %v3558_v52 }
  0xf0   :  { %v89_v50 = vpop.permute.xlu0 %88 }
  0xf1   :  { %v87_v55 = vpop.permute.xlu1 %86 }
  0xf2   :  { %v91_v58 = vsel %vm90_vm4, %v87_v55, %v89_v50  ;;  %v92_v59 = vsel %vm90_vm4, %v89_v50, %v87_v55 }
  0xf3   :  { %v97_v62 = vsel %vm3563_vm6, %v84_v56, %v92_v59  ;;  %v98_v63 = vsel %vm3553_vm5, %v85_v57, %v91_v58 }
  0xf4   :  { %v146_v3 = vrot.slane %v97_v62, %v3558_v52  ;;  %v150_v4 = vrot.slane %v98_v63, %v3558_v52  ;;  %v160_v7 = vrot.slane %v97_v62, %v3561_v53  ;;  %v164_v8 = vrot.slane %v98_v63, %v3561_v53 }
  0xf5   :  { %v176_v9 = vrot.slane %v97_v62, %v3576_v60  ;;  %v180_v11 = vrot.slane %v98_v63, %v3576_v60  ;;  %v192_v12 = vrot.slane %v97_v62, %v3579_v61  ;;  %v196_v13 = vrot.slane %v98_v63, %v3579_v61 }
  0xf6   :  { %v151_v14 = vmul.f32 %v146_v3, %v141_v35  ;;  %v152_v16 = vmul.f32 %v150_v4, %v141_v35  ;;  %v165_v19 = vmul.f32 %v160_v7, %v3499_v28  ;;  %v166_v20 = vmul.f32 %v164_v8, %v3499_v28 }
  0xf7   :  { %v181_v23 = vmul.f32 %v176_v9, %v3507_v29  ;;  %v182_v25 = vmul.f32 %v180_v11, %v3507_v29  ;;  %v211_v35 = vrot.slane %v3444_v18, %v3558_v52  ;;  %v197_v55 = vmul.f32 %v192_v12, %v187_v38 }
  0xf8   :  { %v167_v21 = vadd.f32 %v165_v19, %v151_v14  ;;  %v168_v22 = vadd.f32 %v166_v20, %v152_v16  ;;  %v198_v62 = vmul.f32 %v196_v13, %v187_v38  ;;  %v243_v29 = vrot.slane %v3444_v18, %v3576_v60 }
  0xf9   :  { %v231_v63 = vrot.slane %v3431_v15, %v3561_v53  ;;  %v227_v3 = vrot.slane %v3444_v18, %v3561_v53  ;;  %v216_v48 = vmul.f32 %v211_v35, %v3509_v30  ;;  %v217_v4 = vmul.f32 %v215_v45, %v3509_v30 }
  0xfa   :  { %v183_v28 = vadd.f32 %v181_v23, %v167_v21  ;;  %v184_v50 = vadd.f32 %v182_v25, %v168_v22  ;;  %v263_v38 = vrot.slane %v3431_v15, %v3579_v61  ;;  %v259_v9 = vrot.slane %v3444_v18, %v3579_v61 }
  0xfb   :  { %v103_v11 = vsel %vm3605_vm8, %v92_v59, %v84_v56  ;;  %v104_v12 = vsel %vm3597_vm7, %v91_v58, %v85_v57  ;;  %v232_v13 = vmul.f32 %v227_v3, %v3513_v31  ;;  %v233_v14 = vmul.f32 %v231_v63, %v3513_v31 }
  0xfc   :  { %v199_v7 = vadd.f32 %v197_v55, %v183_v28  ;;  %v200_v8 = vadd.f32 %v198_v62, %v184_v50  ;;  %v248_v20 = vmul.f32 %v243_v29, %v3536_v40  ;;  %v249_v15 = vmul.f32 %v247_v46, %v3536_v40 }
  0xfd   :  { %v264_v18 = vmul.f32 %v259_v9, %v3516_v32  ;;  %v265_v21 = vmul.f32 %v263_v38, %v3516_v32  ;;  %v278_v57 = vrot.slane %v103_v11, %v3558_v52  ;;  %v282_v58 = vrot.slane %v104_v12, %v3558_v52  ;;  %v356_v28 = vpop.permute.xlu0 %355 }
  0xfe   :  { %v218_v16 = vadd.f32 %v216_v48, %v199_v7  ;;  %v219_v30 = vadd.f32 %v217_v4, %v200_v8  ;;  %v3629_v19 = vpop.permute.xlu1 %371  ;;  %v3641_v31 = vsel %vm83_vm3, %v3534_v39, %v3540_v42  ;;  %v3647_v40 = vsel %vm83_vm3, %v3540_v42, %v3534_v39 }
  0xff   :  { %v294_v32 = vrot.slane %v103_v11, %v3561_v53  ;;  %v298_v22 = vrot.slane %v104_v12, %v3561_v53  ;;  %v3655_v23 = vsel %vm90_vm4, %v3542_v43, %v3544_v44  ;;  %v3661_v25 = vsel %vm90_vm4, %v3544_v44, %v3542_v43 }
 0x100   :  { %v234_v56 = vadd.f32 %v232_v13, %v218_v16  ;;  %v235_v59 = vadd.f32 %v233_v14, %v219_v30  ;;  %v310_v39 = vrot.slane %v103_v11, %v3576_v60  ;;  %v314_v42 = vrot.slane %v104_v12, %v3576_v60 }
 0x101   :  { %v5075_v55 = vsub.s32 4, %v3548_v47  ;;  %v283_v62 = vmul.f32 %v278_v57, %v3519_v33  ;;  %v284_v29 = vmul.f32 %v282_v58, %v3519_v33  ;;  %v117_v43 = vsel %vm3563_vm6, %v3641_v31, %v3661_v25 }
 0x102   :  { %v250_v45 = vadd.f32 %v248_v20, %v234_v56  ;;  %v251_v35 = vadd.f32 %v249_v15, %v235_v59  ;;  %v118_v44 = vsel %vm3553_vm5, %v3647_v40, %v3655_v23  ;;  %v299_v3 = vmul.f32 %v294_v32, %v3538_v41  ;;  %v340_v15 = vpop.permute.xlu0 %339 }
 0x103   :  { %v388_v50 = vpop.permute.xlu1 %387  ;;  %v300_v48 = vmul.f32 %v298_v22, %v3538_v41  ;;  %v326_v4 = vrot.slane %v103_v11, %v3579_v61  ;;  %v330_v33 = vrot.slane %v104_v12, %v3579_v61  ;;  %v315_v13 = vmul.f32 %v310_v39, %v3522_v34 }
 0x104   :  { %v266_v46 = vadd.f32 %v264_v18, %v250_v45  ;;  %v267_v63 = vadd.f32 %v265_v21, %v251_v35  ;;  %v316_v14 = vmul.f32 %v314_v42, %v3522_v34  ;;  %v345_v30 = vrot.slane %v117_v43, %v3558_v52 }
 0x105   :  { %v349_v20 = vrot.slane %v118_v44, %v3558_v52  ;;  %v412_v41 = vrot.slane %v3386_v0, %v3558_v52  ;;  %v416_v11 = vrot.slane %v3386_v0, %v5075_v55  ;;  %v331_v21 = vmul.f32 %v326_v4, %v3531_v37 }
 0x106   :  { %v285_v7 = vadd.f32 %v283_v62, %v266_v46  ;;  %v286_v8 = vadd.f32 %v284_v29, %v267_v63  ;;  %v332_v56 = vmul.f32 %v330_v33, %v3531_v37  ;;  %v361_v34 = vrot.slane %v117_v43, %v3561_v53 }
 0x107   :  { %v365_v59 = vrot.slane %v118_v44, %v3561_v53  ;;  %v438_v57 = vrot.slane %v3386_v0, %v3561_v53  ;;  %v5074_v58 = vsub.s32 5, %v3548_v47  ;;  %v350_v45 = vmul.f32 %v345_v30, %v340_v15 }
 0x108   :  { %v301_v38 = vadd.f32 %v299_v3, %v285_v7  ;;  %v302_v9 = vadd.f32 %v300_v48, %v286_v8  ;;  %v433_v16 = vpop.permute.xlu1 %432  ;;  %v351_v35 = vmul.f32 %v349_v20, %v340_v15  ;;  %v377_v39 = vrot.slane %v117_v43, %v3576_v60  ;;  %v407_v20 = vpop.permute.xlu0 %406 }
 0x109   :  { %v381_v42 = vrot.slane %v118_v44, %v3576_v60  ;;  %v422_v62 = vrot.slane %v412_v41, %v3558_v52  ;;  %v426_v37 = vrot.slane %v416_v11, %v3558_v52  ;;  %v366_v46 = vmul.f32 %v361_v34, %v356_v28 }
 0x10a   :  { %v317_v12 = vadd.f32 %v315_v13, %v301_v38  ;;  %v318_v18 = vadd.f32 %v316_v14, %v302_v9  ;;  %v367_v63 = vmul.f32 %v365_v59, %v356_v28  ;;  %v393_v4 = vrot.slane %v117_v43, %v3579_v61 }
 0x10b   :  { %v397_v33 = vrot.slane %v118_v44, %v3579_v61  ;;  %v442_v7 = vrot.slane %v3386_v0, %v5074_v58  ;;  %v5073_v8 = vsub.s32 6, %v3548_v47  ;;  %v382_v38 = vmul.f32 %v377_v39, %v3629_v19 }
 0x10c   :  { %v333_v32 = vadd.f32 %v331_v21, %v317_v12  ;;  %v334_v22 = vadd.f32 %v332_v56, %v318_v18  ;;  %v383_v9 = vmul.f32 %v381_v42, %v3629_v19  ;;  %v398_v30 = vmul.f32 %v393_v4, %v388_v50 }
 0x10d   :  { %v459_v29 = vpop.permute.xlu1 %458  ;;  %v399_v28 = vmul.f32 %v397_v33, %v388_v50  ;;  %v5072_v15 = vsub.s32 7, %v3548_v47  ;;  %v427_v44 = vmul.f32 %v422_v62, %v407_v20  ;;  %v428_v11 = vmul.f32 %v426_v37, %v407_v20  ;;  %v485_v37 = vpop.permute.xlu0 %484 }
 0x10e   :  { %v352_v3 = vadd.f32 %v350_v45, %v333_v32  ;;  %v353_v48 = vadd.f32 %v351_v35, %v334_v22  ;;  %v448_v18 = vrot.slane %v438_v57, %v3561_v53  ;;  %v452_v21 = vrot.slane %v442_v7, %v3561_v53 }
 0x10f   :  { %v464_v19 = vrot.slane %v3386_v0, %v3576_v60  ;;  %v468_v50 = vrot.slane %v3386_v0, %v5073_v8  ;;  %v490_v22 = vrot.slane %v3386_v0, %v3579_v61  ;;  %v494_v57 = vrot.slane %v3386_v0, %v5072_v15 }
 0x110   :  { %v368_v13 = vadd.f32 %v366_v46, %v352_v3  ;;  %v369_v14 = vadd.f32 %v367_v63, %v353_v48  ;;  %v453_v35 = vmul.f32 %v448_v18, %v433_v16  ;;  %v454_v39 = vmul.f32 %v452_v21, %v433_v16 }
 0x111   :  { %v474_v42 = vrot.slane %v464_v19, %v3576_v60  ;;  %v478_v62 = vrot.slane %v468_v50, %v3576_v60  ;;  %v500_v46 = vrot.slane %v490_v22, %v3579_v61  ;;  %v504_v63 = vrot.slane %v494_v57, %v3579_v61 }
 0x112   :  { %v384_v43 = vadd.f32 %v382_v38, %v368_v13  ;;  %v385_v41 = vadd.f32 %v383_v9, %v369_v14  ;;  %v514_v12 = vpop.permute.xlu1 %513  ;;  %v119_v16 = vsel %vm3605_vm8, %v3661_v25, %v3641_v31  ;;  %v120_v14 = vsel %vm3597_vm7, %v3655_v23, %v3647_v40 }
 0x113   :  { %v479_v4 = vmul.f32 %v474_v42, %v459_v29  ;;  %v480_v33 = vmul.f32 %v478_v62, %v459_v29  ;;  %v505_v38 = vmul.f32 %v500_v46, %v485_v37  ;;  %v506_v9 = vmul.f32 %v504_v63, %v485_v37 }
 0x114   :  { %v400_v56 = vadd.f32 %v398_v30, %v384_v43  ;;  %v401_v34 = vadd.f32 %v399_v28, %v385_v41  ;;  %v546_v30 = vpop.permute.xlu0 %545  ;;  %v519_v29 = vrot.slane %v119_v16, %v3558_v52  ;;  %v523_v41 = vrot.slane %v120_v14, %v3558_v52 }
 0x115   :  { %v535_v31 = vrot.slane %v119_v16, %v3561_v53  ;;  %v539_v25 = vrot.slane %v120_v14, %v3561_v53  ;;  %v551_v23 = vrot.slane %v119_v16, %v3576_v60  ;;  %v555_v50 = vrot.slane %v120_v14, %v3576_v60 }
 0x116   :  { %v429_v59 = vadd.f32 %v427_v44, %v400_v56  ;;  %v430_v32 = vadd.f32 %v428_v11, %v401_v34  ;;  %v524_v44 = vmul.f32 %v519_v29, %v514_v12  ;;  %v525_v11 = vmul.f32 %v523_v41, %v514_v12 }
 0x117   :  { %v530_v45 = vpop.permute.xlu1 %529  ;;  %v557_v12 = vmul.f32 %v555_v50, %v546_v30  ;;  %v567_v62 = vrot.slane %v119_v16, %v3579_v61  ;;  %v571_v37 = vrot.slane %v120_v14, %v3579_v61 }
 0x118   :  { %v455_v3 = vadd.f32 %v453_v35, %v429_v59  ;;  %v456_v48 = vadd.f32 %v454_v39, %v430_v32  ;;  %v122_v18 = vpop.permute.xlu0 %121  ;;  %v540_v19 = vmul.f32 %v535_v31, %v530_v45  ;;  %v541_v40 = vmul.f32 %v539_v25, %v530_v45 }
 0x119   :  { %v556_v35 = vmul.f32 %v551_v23, %v546_v30 }
 0x11a   :  { %v481_v0 = vadd.f32 %v479_v4, %v455_v3  ;;  %v482_v13 = vadd.f32 %v480_v33, %v456_v48 }
 0x11c   :  { %v562_v7 = vpop.permute.xlu1 %561  ;;  %v507_v20 = vadd.f32 %v505_v38, %v481_v0  ;;  %v508_v43 = vadd.f32 %v506_v9, %v482_v13  ;;  %v128_v57 = vpop.permute.xlu0 %127 }
 0x11d   :  { %v572_v4 = vmul.f32 %v567_v62, %v562_v7  ;;  %v573_v33 = vmul.f32 %v571_v37, %v562_v7  ;;  %v669_v62 = vrot.slane %v3437_v17, %v3561_v53  ;;  %v673_v37 = vrot.slane %v3497_v27, %v3561_v53 }
 0x11e   :  { %v526_v21 = vadd.f32 %v524_v44, %v507_v20  ;;  %v527_v56 = vadd.f32 %v525_v11, %v508_v43 }
 0x120   :  { %v542_v59 = vadd.f32 %v540_v19, %v526_v21  ;;  %v543_v32 = vadd.f32 %v541_v40, %v527_v56  ;;  %v597_v0 = vpop.permute.xlu0 %596 }
 0x121   :  { %v581_v28 = vpop.permute.xlu1 %580 }
 0x122   :  { %v558_v39 = vadd.f32 %v556_v35, %v542_v59  ;;  %v559_v42 = vadd.f32 %v557_v12, %v543_v32 }
 0x124   :  { %v574_v20 = vadd.f32 %v572_v4, %v558_v39  ;;  %v575_v43 = vadd.f32 %v573_v33, %v559_v42  ;;  %v648_v40 = vpop.permute.xlu0 %647 }
 0x126   :  { %v613_v34 = vpop.permute.xlu1 %612 }
 0x12a   :  { %v124_v22 = vpop.permute.xlu1 %123 }
 0x12b   :  { %v125_v45 = vsel %vm83_vm3, %v122_v18, %v124_v22  ;;  %v126_v63 = vsel %vm83_vm3, %v124_v22, %v122_v18 }
 0x12e   :  { %v130_v46 = vpop.permute.xlu1 %129 }
 0x12f   :  { %v131_v3 = vsel %vm90_vm4, %v128_v57, %v130_v46  ;;  %v132_v48 = vsel %vm90_vm4, %v130_v46, %v128_v57  ;;  %v657_v57 = vrot.slane %v3497_v27, %v3558_v52 }
 0x130   :  { %v133_v38 = vsel %vm3563_vm6, %v125_v45, %v132_v48  ;;  %v134_v9 = vsel %vm3553_vm5, %v126_v63, %v131_v3 }
 0x131   :  { %v586_v13 = vrot.slane %v133_v38, %v3558_v52  ;;  %v590_v16 = vrot.slane %v134_v9, %v3558_v52  ;;  %v602_v14 = vrot.slane %v133_v38, %v3561_v53  ;;  %v606_v30 = vrot.slane %v134_v9, %v3561_v53 }
 0x132   :  { %v629_v29 = vpop.permute.xlu1 %628  ;;  %v618_v44 = vrot.slane %v133_v38, %v3576_v60  ;;  %v622_v11 = vrot.slane %v134_v9, %v3576_v60  ;;  %v634_v18 = vrot.slane %v133_v38, %v3579_v61  ;;  %v638_v21 = vrot.slane %v134_v9, %v3579_v61 }
 0x133   :  { %v591_v41 = vmul.f32 %v586_v13, %v581_v28  ;;  %v592_v7 = vmul.f32 %v590_v16, %v581_v28  ;;  %v607_v25 = vmul.f32 %v602_v14, %v597_v0  ;;  %v608_v19 = vmul.f32 %v606_v30, %v597_v0  ;;  %v696_v13 = vpop.permute.xlu0 %695 }
 0x134   :  { %v623_v59 = vmul.f32 %v618_v44, %v613_v34  ;;  %v624_v32 = vmul.f32 %v622_v11, %v613_v34  ;;  %v653_v28 = vrot.slane %v3437_v17, %v3558_v52  ;;  %v639_v39 = vmul.f32 %v634_v18, %v629_v29 }
 0x135   :  { %v593_v56 = vadd.f32 %v591_v41, %v574_v20  ;;  %v594_v31 = vadd.f32 %v592_v7, %v575_v43  ;;  %v640_v42 = vmul.f32 %v638_v21, %v629_v29  ;;  %v659_v4 = vmul.f32 %v657_v57, %v648_v40 }
 0x136   :  { %v658_v46 = vmul.f32 %v653_v28, %v648_v40  ;;  %v685_v38 = vrot.slane %v3437_v17, %v3576_v60  ;;  %v689_v9 = vrot.slane %v3497_v27, %v3576_v60  ;;  %v701_v43 = vrot.slane %v3437_v17, %v3579_v61 }
 0x137   :  { %v609_v23 = vadd.f32 %v607_v25, %v593_v56  ;;  %v610_v50 = vadd.f32 %v608_v19, %v594_v31  ;;  %v664_v22 = vpop.permute.xlu1 %663  ;;  %v705_v29 = vrot.slane %v3497_v27, %v3579_v61  ;;  %v135_v41 = vsel %vm3605_vm8, %v132_v48, %v125_v45 }
 0x138   :  { %v674_v30 = vmul.f32 %v669_v62, %v664_v22  ;;  %v675_v20 = vmul.f32 %v673_v37, %v664_v22  ;;  %v136_v7 = vsel %vm3597_vm7, %v131_v3, %v126_v63  ;;  %v706_v56 = vmul.f32 %v701_v43, %v696_v13  ;;  %v747_v22 = vpop.permute.xlu0 %746 }
 0x139   :  { %v625_v35 = vadd.f32 %v623_v59, %v609_v23  ;;  %v626_v12 = vadd.f32 %v624_v32, %v610_v50  ;;  %v707_v31 = vmul.f32 %v705_v29, %v696_v13  ;;  %v720_v17 = vrot.slane %v135_v41, %v3558_v52 }
 0x13a   :  { %v724_v23 = vrot.slane %v136_v7, %v3558_v52  ;;  %v752_v48 = vrot.slane %v135_v41, %v3576_v60  ;;  %v756_v63 = vrot.slane %v136_v7, %v3576_v60  ;;  %v736_v3 = vrot.slane %v135_v41, %v3561_v53 }
 0x13b   :  { %v641_v34 = vadd.f32 %v639_v39, %v625_v35  ;;  %v642_v33 = vadd.f32 %v640_v42, %v626_v12  ;;  %v740_v32 = vrot.slane %v136_v7, %v3561_v53 }
 0x13c   :  { %v680_v0 = vpop.permute.xlu1 %679  ;;  %v757_v42 = vmul.f32 %v752_v48, %v747_v22  ;;  %v758_v62 = vmul.f32 %v756_v63, %v747_v22  ;;  %v3357_v48 = vmov 8  }
 0x13d   :  { %v660_v16 = vadd.f32 %v658_v46, %v641_v34  ;;  %v661_v14 = vadd.f32 %v659_v4, %v642_v33  ;;  %v690_v18 = vmul.f32 %v685_v38, %v680_v0  ;;  %v691_v21 = vmul.f32 %v689_v9, %v680_v0 }
 0x13e   :  { %v768_v4 = vrot.slane %v135_v41, %v3579_v61  ;;  %v772_v34 = vrot.slane %v136_v7, %v3579_v61 }
 0x13f   :  { %v676_v44 = vadd.f32 %v674_v30, %v660_v16  ;;  %v677_v11 = vadd.f32 %v675_v20, %v661_v14 }
 0x141   :  { %v692_v25 = vadd.f32 %v690_v18, %v676_v44  ;;  %v693_v19 = vadd.f32 %v691_v21, %v677_v11  ;;  %v715_v40 = vpop.permute.xlu1 %714 }
 0x142   :  { %v725_v59 = vmul.f32 %v720_v17, %v715_v40  ;;  %v726_v45 = vmul.f32 %v724_v23, %v715_v40 }
 0x143   :  { %v708_v27 = vadd.f32 %v706_v56, %v692_v25  ;;  %v709_v50 = vadd.f32 %v707_v31, %v693_v19 }
 0x145   :  { %v727_v57 = vadd.f32 %v725_v59, %v708_v27  ;;  %v728_v35 = vadd.f32 %v726_v45, %v709_v50 }
 0x146   :  { %v731_v28 = vpop.permute.xlu1 %730 }
 0x147   :  { %v741_v12 = vmul.f32 %v736_v3, %v731_v28  ;;  %v742_v39 = vmul.f32 %v740_v32, %v731_v28 }
 0x149   :  { %v743_v37 = vadd.f32 %v741_v12, %v727_v57  ;;  %v744_v46 = vadd.f32 %v742_v39, %v728_v35 }
 0x14b   :  { %v763_v33 = vpop.permute.xlu1 %762  ;;  %v759_v38 = vadd.f32 %v757_v42, %v743_v37  ;;  %v760_v9 = vadd.f32 %v758_v62, %v744_v46  ;;  %v3358_v42 = vmov 6  }
 0x14c   :  { %v773_v0 = vmul.f32 %v768_v4, %v763_v33  ;;  %v774_v13 = vmul.f32 %v772_v34, %v763_v33 }
 0x14e   :  { %v775_v16 = vadd.f32 %v773_v0, %v759_v38  ;;  %v776_v14 = vadd.f32 %v774_v13, %v760_v9 }
 0x150   :  { %v3789_v30 = vpop.permute.xlu1 %779 }
 0x151   :  { %5113 = vst [vmem:[#allocation3_spill] sm:$0xff] %v3789_v30  ;;  %v782_v20 = vadd.f32 %v3789_v30, %v775_v16  ;;  %v783_v43 = vadd.f32 %v3789_v30, %v776_v14 }
 0x153   :  { %v785_v29 = vsel %vm784_vm9, %v782_v20, 0.0  ;;  %v786_v41 = vsel %vm784_vm9, %v783_v43, 0.0 }
 0x154   :  { %v787_v44 = vadd.f32 %v786_v41, %v785_v29 }
 0x156   :  { %788 = vadd.xlane.f32.xlu0 %v787_v44 }
 0x1df   :  { %v789_v7 = vpop.xlane.xlu0 %788 }
 0x1e0   :  { %v791_v11 = vmul.f32 0.00390625, %v789_v7  ;;  %v806_v18 = vrot.slane %v789_v7, 4 }
 0x1e2   :  { %v792_v21 = vsub.f32 %v782_v20, %v791_v11  ;;  %v793_v56 = vsub.f32 %v783_v43, %v791_v11  ;;  %v807_v31 = vadd.f32 %v806_v18, %v789_v7 }
 0x1e4   :  { %v794_v25 = vmul.f32 %v792_v21, %v792_v21  ;;  %v795_v19 = vmul.f32 %v793_v56, %v793_v56  ;;  %v808_v40 = vrot.slane %v807_v31, 2 }
 0x1e6   :  { %v796_v17 = vsel %vm784_vm9, %v794_v25, 0.0  ;;  %v797_v23 = vsel %vm784_vm9, %v795_v19, 0.0  ;;  %v809_v27 = vadd.f32 %v808_v40, %v807_v31 }
 0x1e7   :  { %v798_v50 = vadd.f32 %v797_v23, %v796_v17 }
 0x1e8   :  { %v810_v59 = vrot.slane %v809_v27, 1 }
 0x1e9   :  { %799 = vadd.xlane.f32.xlu0 %v798_v50 }
 0x1ea   :  { %v811_v45 = vadd.f32 %v810_v59, %v809_v27 }
 0x1ec   :  { %3152 = vpush %v811_v45 }
 0x1ff   :  { %839 = vperm.xlu0 %3214, %v3527_v36  }
 0x203   :  { %3219 = vset.pattern.permute.xlu0 %v3357_v48 }
 0x204   :  { %859 = vperm.xlu0 %3219, %v3527_v36  }
 0x208   :  { %3224 = vset.pattern.permute.xlu0 %v5078_v5 }
 0x21d   :  { %s3153_s11 = spop %3152 }
 0x21e   :  { %v813_v63 = vstv %s3153_s11 }
 0x21f   :  { %v815_v3 = vmul.f32 0.0009765625, %v813_v63  ;;  %v3125_v63 = vld [vmem:[%s5069_s1 + $0x28] sm:$0xf] }
 0x221   :  { %v816_v32 = vsub.f32 %v782_v20, %v815_v3  ;;  %v817_v22 = vsub.f32 %v783_v43, %v815_v3 }
 0x223   :  { %v818_v28 = vmul.f32 %v816_v32, %v816_v32  ;;  %v819_v57 = vmul.f32 %v817_v22, %v817_v22 }
 0x225   :  { %v820_v35 = vsel %vm784_vm9, %v818_v28, 0.0  ;;  %v821_v12 = vsel %vm784_vm9, %v819_v57, 0.0  ;;  %v3127_v28 = vld [vmem:[%s5069_s1 + $0x30] sm:$0xf]  ;;  %v3128_v57 = vld [vmem:[%s5069_s1 + $0x34] sm:$0xf] }
 0x226   :  { %v822_v39 = vadd.f32 %v821_v12, %v820_v35 }
 0x228   :  { %823 = vadd.xlane.f32.xlu1 %v822_v39 }
 0x239   :  { %845 = vperm.xlu1 %3217, %v3527_v36  }
 0x23d   :  { %3218 = vset.pattern.permute.xlu1 %v3358_v42 }
 0x23e   :  { %853 = vperm.xlu1 %3218, %v3527_v36  }
 0x242   :  { %3220 = vset.pattern.permute.xlu1 %v5080_v1 }
 0x272   :  { %v800_v9 = vpop.xlane.xlu0 %799 }
 0x273   :  { %v801_v0 = vmul.f32 0.003921569, %v800_v9  ;;  %v3130_v9 = vld [vmem:[%s5069_s1 + $0x3c] sm:$0xf] }
 0x275   :  { %v802_v13 = vadd.f32 1e-05, %v801_v0  ;;  %v3131_v0 = vld [vmem:[%s5069_s1 + $0x40] sm:$0xf] }
 0x277   :  { %3328 = vrsqrt.f32 %v802_v13 }
 0x27a   :  { %v3807_v18 = vpop.permute.xlu0 %839 }
 0x27b   :  { %5115 = vst [vmem:[#allocation5_spill] sm:$0xff] %v3807_v18 }
 0x27f   :  { %v3815_v50 = vpop.permute.xlu0 %859 }
 0x280   :  { %5117 = vst [vmem:[#allocation7_spill] sm:$0xff] %v3815_v50 }
 0x284   :  { %v3329_v36 = vpop.eup %3328 }
 0x285   :  { %v804_v29 = vmul.f32 %v3329_v36, %v792_v21  ;;  %v805_v41 = vmul.f32 %v3329_v36, %v793_v56 }
 0x287   :  { %v842_v31 = vmul.f32 %v3807_v18, %v804_v29  ;;  %v843_v25 = vmul.f32 %v3807_v18, %v805_v41 }
 0x2b1   :  { %v824_v62 = vpop.xlane.xlu1 %823 }
 0x2b2   :  { %v825_v37 = vrot.slane %v824_v62, 4 }
 0x2b4   :  { %v826_v46 = vadd.f32 %v825_v37, %v824_v62 }
 0x2b5   :  { %v3805_v43 = vpop.permute.xlu1 %845 }
 0x2b6   :  { %v827_v4 = vrot.slane %v826_v46, 2  ;;  %5114 = vst [vmem:[#allocation4_spill] sm:$0xff] %v3805_v43 }
 0x2b8   :  { %v828_v34 = vadd.f32 %v827_v4, %v826_v46 }
 0x2b9   :  { %v3813_v17 = vpop.permute.xlu1 %853 }
 0x2ba   :  { %v829_v33 = vrot.slane %v828_v34, 1  ;;  %5116 = vst [vmem:[#allocation6_spill] sm:$0xff] %v3813_v17 }
 0x2bc   :  { %v830_v38 = vadd.f32 %v829_v33, %v828_v34 }
 0x2be   :  { %3154 = vpush %v830_v38  ;;  %v3129_v38 = vld [vmem:[%s5069_s1 + $0x38] sm:$0xf] }
 0x2ef   :  { %s3155_s12 = spop %3154 }
 0x2f0   :  { %v832_v16 = vstv %s3155_s12 }
 0x2f1   :  { %v833_v14 = vmul.f32 0.0009775171, %v832_v16  ;;  %v3132_v16 = vld [vmem:[%s5069_s1 + $0x44] sm:$0xf] }
 0x2f3   :  { %v834_v20 = vadd.f32 1e-05, %v833_v14 }
 0x2f5   :  { %3330 = vrsqrt.f32 %v834_v20  ;;  %v3934_v20 = vld [vmem:[%s5068_s0 + $0x8] sm:$0xff] }
 0x302   :  { %v3331_v44 = vpop.eup %3330 }
 0x303   :  { %v836_v7 = vmul.f32 %v3331_v44, %v816_v32  ;;  %v837_v11 = vmul.f32 %v3331_v44, %v817_v22  ;;  %v3124_v32 = vld [vmem:[%s5069_s1 + $0x24] sm:$0xf]  ;;  %v3126_v22 = vld [vmem:[%s5069_s1 + $0x2c] sm:$0xf] }
 0x305   :  { %v848_v19 = vmul.f32 %v3805_v43, %v836_v7  ;;  %v849_v40 = vmul.f32 %v3805_v43, %v837_v11  ;;  %v3958_v7 = vcombine.high %v3934_v20, %v3934_v20  ;;  %v3965_v11 = vld [vmem:[%s5069_s1 + $0xc] sm:$0xf] }
 0x307   :  { %v850_v23 = vadd.f32 %v848_v19, %v842_v31  ;;  %v851_v27 = vadd.f32 %v849_v40, %v843_v25  ;;  %5118 = vst [vmem:[#allocation8_spill] sm:$0xff] %v3958_v7  ;;  %v3974_v25 = vld [vmem:[%s5069_s1 + $0x10] sm:$0xf]  ;;  %v3344_v40 = vld [vmem:[%s5070_s2] sm:$0xf] }
 0x308   :  { %5119 = vst [vmem:[#allocation9_spill] sm:$0xff] %v3974_v25 }
 0x309   :  { %v856_v21 = vmul.f32 %v3813_v17, %v850_v23  ;;  %v857_v56 = vmul.f32 %v3813_v17, %v851_v27  ;;  %v3987_v23 = vld [vmem:[%s5069_s1 + $0x4] sm:$0xf] }
 0x30b   :  { %v862_v59 = vadd.f32 %v3815_v50, %v856_v21  ;;  %v863_v45 = vadd.f32 %v3815_v50, %v857_v56  ;;  %v3998_v21 = vld [vmem:[%s5069_s1 + $0x14] sm:$0xf] }
 0x30d   :  { %v3821_v48 = vmax.f32 %v862_v59, 0.0  ;;  %v3830_v3 = vmax.f32 %v863_v45, 0.0  ;;  %v4009_v59 = vld [vmem:[%s5069_s1] sm:$0xf] }
 0x30f   :  { %872 = vrot.lane.b32.xlu0 %v3821_v48, %s3351_s14  ;;  %866 = vrot.lane.b32.xlu1 %v3821_v48, %s3352_s15 }
 0x313   :  { %1031 = vperm.xlu0 %3224, %v3125_v63   ;;  %868 = vrot.lane.b32.xlu1 %v3830_v3, %s3352_s15 }
 0x317   :  { %3227 = vset.pattern.permute.xlu0 %v5080_v1  ;;  %948 = vperm.xlu1 %3220, %v3124_v32  }
 0x318   :  { %1082 = vperm.xlu0 %3227, %v3126_v22  }
 0x31b   :  { %3221 = vset.pattern.permute.xlu1 %v5078_v5 }
 0x31c   :  { %3228 = vset.pattern.permute.xlu0 %v5076_v2  ;;  %964 = vperm.xlu1 %3221, %v3124_v32  }
 0x31d   :  { %934 = vperm.xlu0 %3228, %v3124_v32  }
 0x320   :  { %874 = vrot.lane.b32.xlu1 %v3830_v3, %s3351_s14 }
 0x321   :  { %1133 = vperm.xlu0 %3228, %v3127_v28   ;;  %3222 = vset.pattern.permute.xlu1 %v5076_v2 }
 0x324   :  { %999 = vperm.xlu1 %3222, %v3125_v63  }
 0x325   :  { %1200 = vperm.xlu0 %3228, %v3128_v57  }
 0x328   :  { %3223 = vset.pattern.permute.xlu1 %v5080_v1 }
 0x329   :  { %904 = vrot.lane.b32.xlu0 %v3821_v48, %s3355_s22  ;;  %1015 = vperm.xlu1 %3223, %v3125_v63  }
 0x32a   :  { %3233 = vset.pattern.permute.xlu0 %v5082_v6 }
 0x32d   :  { %3225 = vset.pattern.permute.xlu1 %v5082_v6 }
 0x32e   :  { %1047 = vperm.xlu1 %3225, %v3125_v63  }
 0x332   :  { %3226 = vset.pattern.permute.xlu1 %v5076_v2 }
 0x333   :  { %1066 = vperm.xlu1 %3226, %v3126_v22  }
 0x337   :  { %3229 = vset.pattern.permute.xlu1 %v5078_v5 }
 0x338   :  { %1098 = vperm.xlu1 %3229, %v3126_v22  }
 0x33c   :  { %3230 = vset.pattern.permute.xlu1 %v5082_v6 }
 0x33d   :  { %1114 = vperm.xlu1 %3230, %v3126_v22  }
 0x341   :  { %3231 = vset.pattern.permute.xlu1 %v5078_v5 }
 0x342   :  { %1165 = vperm.xlu1 %3231, %v3127_v28  }
 0x346   :  { %3232 = vset.pattern.permute.xlu1 %v5082_v6 }
 0x347   :  { %1181 = vperm.xlu1 %3232, %v3127_v28  }
 0x34b   :  { %898 = vrot.lane.b32.xlu1 %v3821_v48, %s3356_s23 }
 0x34c   :  { %3234 = vset.pattern.permute.xlu1 %v5080_v1 }
 0x34f   :  { %900 = vrot.lane.b32.xlu1 %v3830_v3, %s3356_s23 }
 0x353   :  { %906 = vrot.lane.b32.xlu1 %v3830_v3, %s3355_s22 }
 0x357   :  { %1216 = vperm.xlu1 %3234, %v3128_v57  }
 0x35b   :  { %3235 = vset.pattern.permute.xlu1 %v5078_v5 }
 0x35c   :  { %1232 = vperm.xlu1 %3235, %v3128_v57  }
 0x360   :  { %3236 = vset.pattern.permute.xlu1 %v5076_v2 }
 0x381   :  { %v867_v35 = vpop.permute.xlu1 %866  ;;  %v873_v62 = vpop.permute.xlu0 %872 }
 0x385   :  { %v869_v12 = vpop.permute.xlu1 %868 }
 0x386   :  { %v3877_v46 = vsel %vm58_vm1, %v867_v35, %v869_v12  ;;  %v871_v36 = vsel %vm58_vm1, %v869_v12, %v867_v35 }
 0x38e   :  { %v4004_v56 = vpop.permute.xlu0 %1031 }
 0x392   :  { %v3871_v39 = vpop.permute.xlu1 %948 }
 0x393   :  { %v4015_v63 = vpop.permute.xlu0 %1082 }
 0x397   :  { %v3873_v42 = vpop.permute.xlu1 %964 }
 0x398   :  { %v935_v22 = vpop.permute.xlu0 %934 }
 0x39b   :  { %v875_v37 = vpop.permute.xlu1 %874 }
 0x39c   :  { %v3881_v4 = vsel %vm41_vm0, %v873_v62, %v875_v37  ;;  %v877_v34 = vsel %vm41_vm0, %v875_v37, %v873_v62 }
 0x39d   :  { %v3888_v33 = vsel %vm41_vm0, %v3877_v46, %v877_v34  ;;  %884 = vrot.lane.b32.xlu0 %v3881_v4, %s3356_s23  ;;  %v3941_v29 = vsel %vm44_vm2, %v3881_v4, %v871_v36  ;;  %v1009_v47 = vrot.slane %v3881_v4, %v3558_v52 }
 0x39e   :  { %882 = vrot.lane.b32.xlu1 %v3888_v33, %s3356_s23  ;;  %v1005_v30 = vrot.slane %v3888_v33, %v3558_v52 }
 0x39f   :  { %v3920_v13 = vpop.permute.xlu1 %999 }
 0x3a1   :  { %890 = vrot.lane.b32.xlu0 %v3881_v4, %s3355_s22 }
 0x3a2   :  { %888 = vrot.lane.b32.xlu1 %v3888_v33, %s3355_s22 }
 0x3a4   :  { %v3927_v14 = vpop.permute.xlu1 %1015 }
 0x3a5   :  { %980 = vperm.xlu0 %3233, %v3124_v32  }
 0x3a6   :  { %1267 = vperm.xlu1 %3236, %v3129_v38  }
 0x3a9   :  { %1248 = vperm.xlu0 %3233, %v3128_v57   ;;  %v3943_v41 = vpop.permute.xlu1 %1047  ;;  %v4024_v57 = vpop.permute.xlu0 %1133 }
 0x3aa   :  { %3237 = vset.pattern.permute.xlu1 %v5080_v1 }
 0x3ab   :  { %1283 = vperm.xlu1 %3237, %v3129_v38  }
 0x3ad   :  { %3238 = vset.pattern.permute.xlu0 %v5078_v5  ;;  %v4026_v12 = vpop.permute.xlu0 %1200 }
 0x3ae   :  { %1299 = vperm.xlu0 %3238, %v3129_v38   ;;  %v3950_v44 = vpop.permute.xlu1 %1066 }
 0x3af   :  { %3240 = vset.pattern.permute.xlu1 %v5082_v6 }
 0x3b0   :  { %1315 = vperm.xlu1 %3240, %v3129_v38  }
 0x3b1   :  { %v905_v37 = vpop.permute.xlu0 %904 }
 0x3b2   :  { %3239 = vset.pattern.permute.xlu0 %v5080_v1 }
 0x3b3   :  { %1149 = vperm.xlu0 %3239, %v3127_v28   ;;  %v3967_v31 = vpop.permute.xlu1 %1098 }
 0x3b4   :  { %3241 = vset.pattern.permute.xlu1 %v5076_v2 }
 0x3b5   :  { %1334 = vperm.xlu1 %3241, %v3130_v9  }
 0x3b7   :  { %914 = vrot.lane.b32.xlu0 %v3877_v46, %s3356_s23 }
 0x3b8   :  { %v3976_v19 = vpop.permute.xlu1 %1114 }
 0x3b9   :  { %3242 = vset.pattern.permute.xlu1 %v5078_v5 }
 0x3ba   :  { %1366 = vperm.xlu1 %3242, %v3130_v9  }
 0x3bb   :  { %920 = vrot.lane.b32.xlu0 %v3877_v46, %s3355_s22 }
 0x3bd   :  { %v3990_v27 = vpop.permute.xlu1 %1165 }
 0x3be   :  { %3243 = vset.pattern.permute.xlu1 %v5082_v6 }
 0x3bf   :  { %1382 = vperm.xlu1 %3243, %v3130_v9   ;;  %1350 = vperm.xlu0 %3239, %v3130_v9  }
 0x3c2   :  { %v4011_v45 = vpop.permute.xlu1 %1181 }
 0x3c3   :  { %3245 = vset.pattern.permute.xlu1 %v5080_v1  ;;  %3244 = vset.pattern.permute.xlu0 %v5076_v2 }
 0x3c4   :  { %1417 = vperm.xlu1 %3245, %v3131_v0   ;;  %1401 = vperm.xlu0 %3244, %v3131_v0  }
 0x3c6   :  { %v4017_v32 = vpop.permute.xlu1 %898 }
 0x3c8   :  { %3246 = vset.pattern.permute.xlu1 %v5078_v5  ;;  %3247 = vset.pattern.permute.xlu0 %v5082_v6 }
 0x3c9   :  { %1433 = vperm.xlu1 %3246, %v3131_v0   ;;  %1449 = vperm.xlu0 %3247, %v3131_v0  }
 0x3ca   :  { %v4022_v28 = vpop.permute.xlu1 %900 }
 0x3cd   :  { %3248 = vset.pattern.permute.xlu1 %v5076_v2  ;;  %3250 = vset.pattern.permute.xlu0 %v5078_v5 }
 0x3ce   :  { %1468 = vperm.xlu1 %3248, %v3132_v16   ;;  %1500 = vperm.xlu0 %3250, %v3132_v16   ;;  %v907_v35 = vpop.permute.xlu1 %906 }
 0x3d2   :  { %916 = vrot.lane.b32.xlu1 %v3941_v29, %s3356_s23  ;;  %1617 = vrot.lane.b32.xlu0 %v3934_v20, %s3352_s15  ;;  %v4028_v62 = vpop.permute.xlu1 %1216 }
 0x3d3   :  { %3249 = vset.pattern.permute.xlu1 %v5080_v1 }
 0x3d6   :  { %922 = vrot.lane.b32.xlu1 %v3941_v29, %s3355_s22  ;;  %1623 = vrot.lane.b32.xlu0 %v3934_v20, %s3351_s14 }
 0x3d7   :  { %v4030_v34 = vpop.permute.xlu1 %1232 }
 0x3da   :  { %1484 = vperm.xlu1 %3249, %v3132_v16   ;;  %1657 = vrot.lane.b32.xlu0 %v3958_v7, %s3355_s22 }
 0x3de   :  { %3251 = vset.pattern.permute.xlu1 %v5082_v6  ;;  %1912 = vperm.xlu0 %3250, %v3965_v11  }
 0x3df   :  { %1516 = vperm.xlu1 %3251, %v3132_v16  }
 0x3e2   :  { %3268 = vset.pattern.permute.xlu0 %v5080_v1 }
 0x3e3   :  { %3252 = vset.pattern.permute.xlu1 %v5080_v1  ;;  %1972 = vperm.xlu0 %3268, %v3974_v25  }
 0x3e4   :  { %1532 = vperm.xlu1 %3252, %v3344_v40  }
 0x3e7   :  { %3269 = vset.pattern.permute.xlu0 %v5076_v2 }
 0x3e8   :  { %1748 = vperm.xlu0 %3269, %v3987_v23   ;;  %1619 = vrot.lane.b32.xlu1 %v3958_v7, %s3352_s15 }
 0x3e9   :  { %3253 = vset.pattern.permute.xlu1 %v5076_v2 }
 0x3ec   :  { %1625 = vrot.lane.b32.xlu1 %v3958_v7, %s3351_s14  ;;  %2052 = vperm.xlu0 %3269, %v3998_v21  }
 0x3f0   :  { %1684 = vperm.xlu1 %3253, %v4009_v59   ;;  %3274 = vset.pattern.permute.xlu0 %v5082_v6 }
 0x3f4   :  { %3254 = vset.pattern.permute.xlu1 %v5080_v1 }
 0x3f5   :  { %1698 = vperm.xlu1 %3254, %v4009_v59  }
 0x3f9   :  { %3255 = vset.pattern.permute.xlu1 %v5078_v5 }
 0x40f   :  { %v885_v38 = vpop.permute.xlu0 %884 }
 0x410   :  { %v883_v9 = vpop.permute.xlu1 %882 }
 0x411   :  { %v886_v36 = vsel %vm83_vm3, %v883_v9, %v885_v38  ;;  %v887_v40 = vsel %vm83_vm3, %v885_v38, %v883_v9 }
 0x413   :  { %v891_v0 = vpop.permute.xlu0 %890 }
 0x414   :  { %v889_v16 = vpop.permute.xlu1 %888 }
 0x415   :  { %v892_v15 = vsel %vm90_vm4, %v889_v16, %v891_v0  ;;  %v893_v8 = vsel %vm90_vm4, %v891_v0, %v889_v16 }
 0x416   :  { %v894_v58 = vsel %vm3563_vm6, %v886_v36, %v893_v8  ;;  %v895_v55 = vsel %vm3553_vm5, %v887_v40, %v892_v15 }
 0x417   :  { %v940_v2 = vrot.slane %v894_v58, %v3558_v52  ;;  %v944_v5 = vrot.slane %v895_v55, %v3558_v52  ;;  %v954_v1 = vrot.slane %v894_v58, %v3561_v53  ;;  %v958_v38 = vrot.slane %v895_v55, %v3561_v53 }
 0x418   :  { %v970_v16 = vrot.slane %v894_v58, %v3576_v60  ;;  %v974_v17 = vrot.slane %v895_v55, %v3576_v60 }
 0x419   :  { %v945_v9 = vmul.f32 %v940_v2, %v935_v22  ;;  %v946_v6 = vmul.f32 %v944_v5, %v935_v22  ;;  %v959_v50 = vmul.f32 %v954_v1, %v3871_v39  ;;  %v960_v0 = vmul.f32 %v958_v38, %v3871_v39 }
 0x41a   :  { %v975_v25 = vmul.f32 %v970_v16, %v3873_v42  ;;  %v976_v2 = vmul.f32 %v974_v17, %v3873_v42  ;;  %v986_v1 = vrot.slane %v894_v58, %v3579_v61  ;;  %v990_v5 = vrot.slane %v895_v55, %v3579_v61 }
 0x41b   :  { %v961_v43 = vadd.f32 %v959_v50, %v945_v9  ;;  %v962_v18 = vadd.f32 %v960_v0, %v946_v6  ;;  %v1021_v9 = vrot.slane %v3888_v33, %v3561_v53  ;;  %v1025_v0 = vrot.slane %v3881_v4, %v3561_v53 }
 0x41c   :  { %v1037_v17 = vrot.slane %v3888_v33, %v3576_v60  ;;  %v1041_v58 = vrot.slane %v3881_v4, %v3576_v60  ;;  %v1010_v55 = vmul.f32 %v1005_v30, %v3920_v13  ;;  %v1057_v16 = vrot.slane %v3881_v4, %v3579_v61 }
 0x41d   :  { %v977_v22 = vadd.f32 %v975_v25, %v961_v43  ;;  %v978_v38 = vadd.f32 %v976_v2, %v962_v18  ;;  %v1011_v43 = vmul.f32 %v1009_v47, %v3920_v13  ;;  %v1053_v25 = vrot.slane %v3888_v33, %v3579_v61 }
 0x41e   :  { %v896_v2 = vsel %vm3605_vm8, %v893_v8, %v886_v36  ;;  %v1026_v30 = vmul.f32 %v1021_v9, %v3927_v14  ;;  %v1027_v47 = vmul.f32 %v1025_v0, %v3927_v14  ;;  %v4086_v33 = vsel %vm90_vm4, %v905_v37, %v907_v35 }
 0x41f   :  { %v4090_v4 = vsel %vm90_vm4, %v907_v35, %v905_v37  ;;  %v1042_v8 = vmul.f32 %v1037_v17, %v4004_v56  ;;  %v4104_v35 = vsel %vm83_vm3, %v4017_v32, %v4022_v28  ;;  %v1088_v37 = vrot.slane %v896_v2, %v3561_v53 }
 0x420   :  { %v981_v39 = vpop.permute.xlu0 %980 }
 0x421   :  { %v991_v7 = vmul.f32 %v986_v1, %v981_v39  ;;  %v992_v50 = vmul.f32 %v990_v5, %v981_v39  ;;  %v4060_v6 = vpop.permute.xlu1 %1267  ;;  %v897_v1 = vsel %vm3597_vm7, %v892_v15, %v887_v40  ;;  %v1043_v15 = vmul.f32 %v1041_v58, %v4004_v56 }
 0x422   :  { %v1072_v40 = vrot.slane %v896_v2, %v3558_v52  ;;  %v1076_v14 = vrot.slane %v897_v1, %v3558_v52  ;;  %v4110_v56 = vsel %vm83_vm3, %v4022_v28, %v4017_v32  ;;  %v1092_v9 = vrot.slane %v897_v1, %v3561_v53 }
 0x423   :  { %v993_v18 = vadd.f32 %v991_v7, %v977_v22  ;;  %v994_v42 = vadd.f32 %v992_v50, %v978_v38  ;;  %v1058_v38 = vmul.f32 %v1053_v25, %v3943_v41  ;;  %v1059_v50 = vmul.f32 %v1057_v16, %v3943_v41 }
 0x424   :  { %v4080_v5 = vpop.permute.xlu0 %1248  ;;  %v910_v41 = vsel %vm3563_vm6, %v4104_v35, %v4090_v4  ;;  %v1104_v32 = vrot.slane %v896_v2, %v3576_v60  ;;  %v1108_v28 = vrot.slane %v897_v1, %v3576_v60 }
 0x425   :  { %v1012_v13 = vadd.f32 %v1010_v55, %v993_v18  ;;  %v1013_v7 = vadd.f32 %v1011_v43, %v994_v42  ;;  %v911_v55 = vsel %vm3553_vm5, %v4110_v56, %v4086_v33  ;;  %v1077_v43 = vmul.f32 %v1072_v40, %v3950_v44 }
 0x426   :  { %v4094_v36 = vpop.permute.xlu1 %1283  ;;  %v1078_v18 = vmul.f32 %v1076_v14, %v3950_v44  ;;  %v1143_v40 = vrot.slane %v911_v55, %v3558_v52 }
 0x427   :  { %v1028_v39 = vadd.f32 %v1026_v30, %v1012_v13  ;;  %v1029_v22 = vadd.f32 %v1027_v47, %v1013_v7  ;;  %v1120_v30 = vrot.slane %v896_v2, %v3579_v61  ;;  %v1124_v47 = vrot.slane %v897_v1, %v3579_v61 }
 0x428   :  { %v1093_v13 = vmul.f32 %v1088_v37, %v4015_v63  ;;  %v1094_v7 = vmul.f32 %v1092_v9, %v4015_v63  ;;  %v1155_v9 = vrot.slane %v910_v41, %v3561_v53 }
 0x429   :  { %v1044_v0 = vadd.f32 %v1042_v8, %v1028_v39  ;;  %v1045_v17 = vadd.f32 %v1043_v15, %v1029_v22  ;;  %v4114_v58 = vpop.permute.xlu0 %1299  ;;  %v1139_v22 = vrot.slane %v910_v41, %v3558_v52  ;;  %v1125_v37 = vmul.f32 %v1120_v30, %v3976_v19 }
 0x42a   :  { %v1126_v63 = vmul.f32 %v1124_v47, %v3976_v19  ;;  %v1187_v30 = vrot.slane %v910_v41, %v3579_v61  ;;  %v1191_v19 = vrot.slane %v911_v55, %v3579_v61 }
 0x42b   :  { %v1060_v42 = vadd.f32 %v1058_v38, %v1044_v0  ;;  %v1061_v25 = vadd.f32 %v1059_v50, %v1045_v17  ;;  %v4128_v16 = vpop.permute.xlu1 %1315  ;;  %v1109_v38 = vmul.f32 %v1104_v32, %v3967_v31  ;;  %v1110_v50 = vmul.f32 %v1108_v28, %v3967_v31 }
 0x42c   :  { %v1159_v17 = vrot.slane %v911_v55, %v3561_v53  ;;  %v1144_v28 = vmul.f32 %v1139_v22, %v4024_v57 }
 0x42d   :  { %v1079_v8 = vadd.f32 %v1077_v43, %v1060_v42  ;;  %v1080_v15 = vadd.f32 %v1078_v18, %v1061_v25  ;;  %v1171_v43 = vrot.slane %v910_v41, %v3576_v60  ;;  %v1175_v18 = vrot.slane %v911_v55, %v3576_v60 }
 0x42e   :  { %v1150_v39 = vpop.permute.xlu0 %1149  ;;  %v1145_v25 = vmul.f32 %v1143_v40, %v4024_v57  ;;  %v1210_v57 = vrot.slane %v3830_v3, %v3558_v52  ;;  %v1206_v41 = vrot.slane %v3821_v48, %v3558_v52 }
 0x42f   :  { %v1095_v44 = vadd.f32 %v1093_v13, %v1079_v8  ;;  %v1096_v14 = vadd.f32 %v1094_v7, %v1080_v15  ;;  %v1160_v7 = vmul.f32 %v1155_v9, %v1150_v39  ;;  %v1161_v8 = vmul.f32 %v1159_v17, %v1150_v39 }
 0x430   :  { %v4138_v2 = vpop.permute.xlu1 %1334  ;;  %v1177_v22 = vmul.f32 %v1175_v18, %v3990_v27  ;;  %v1192_v39 = vmul.f32 %v1187_v30, %v4011_v45  ;;  %v1211_v9 = vmul.f32 %v1206_v41, %v4026_v12  ;;  %v1212_v17 = vmul.f32 %v1210_v57, %v4026_v12 }
 0x431   :  { %v1111_v1 = vadd.f32 %v1109_v38, %v1095_v44  ;;  %v1112_v0 = vadd.f32 %v1110_v50, %v1096_v14  ;;  %v1176_v50 = vmul.f32 %v1171_v43, %v3990_v27 }
 0x432   :  { %v4146_v42 = vpop.permute.xlu0 %914 }
 0x433   :  { %v1127_v32 = vadd.f32 %v1125_v37, %v1111_v1  ;;  %v1128_v31 = vadd.f32 %v1126_v63, %v1112_v0  ;;  %v1193_v1 = vmul.f32 %v1191_v19, %v4011_v45  ;;  %v1226_v0 = vrot.slane %v3830_v3, %v3561_v53 }
 0x434   :  { %v1222_v37 = vrot.slane %v3821_v48, %v3561_v53  ;;  %v1238_v45 = vrot.slane %v3821_v48, %v3576_v60  ;;  %v1254_v19 = vrot.slane %v3821_v48, %v3579_v61  ;;  %v912_v48 = vsel %vm3605_vm8, %v4090_v4, %v4104_v35 }
 0x435   :  { %v1146_v47 = vadd.f32 %v1144_v28, %v1127_v32  ;;  %v1147_v13 = vadd.f32 %v1145_v25, %v1128_v31  ;;  %v4152_v15 = vpop.permute.xlu1 %1366  ;;  %v1242_v32 = vrot.slane %v3830_v3, %v3576_v60  ;;  %v1228_v28 = vmul.f32 %v1226_v0, %v4028_v62 }
 0x436   :  { %v4154_v44 = vpop.permute.xlu0 %920  ;;  %v1227_v31 = vmul.f32 %v1222_v37, %v4028_v62  ;;  %v1259_v62 = vmul.f32 %v1254_v19, %v4080_v5  ;;  %v1289_v35 = vrot.slane %v912_v48, %v3561_v53  ;;  %v1321_v19 = vrot.slane %v912_v48, %v3579_v61 }
 0x437   :  { %v1162_v14 = vadd.f32 %v1160_v7, %v1146_v47  ;;  %v1163_v38 = vadd.f32 %v1161_v8, %v1147_v13  ;;  %v1243_v47 = vmul.f32 %v1238_v45, %v4030_v34  ;;  %v1244_v12 = vmul.f32 %v1242_v32, %v4030_v34 }
 0x438   :  { %v913_v34 = vsel %vm3597_vm7, %v4086_v33, %v4110_v56 }
 0x439   :  { %v1178_v55 = vadd.f32 %v1176_v50, %v1162_v14  ;;  %v1179_v40 = vadd.f32 %v1177_v22, %v1163_v38  ;;  %v1258_v38 = vrot.slane %v3830_v3, %v3579_v61  ;;  %v1273_v3 = vrot.slane %v912_v48, %v3558_v52 }
 0x43a   :  { %v4168_v63 = vpop.permute.xlu1 %1382  ;;  %v4170_v27 = vpop.permute.xlu0 %1350  ;;  %v1293_v33 = vrot.slane %v913_v34, %v3561_v53  ;;  %v1309_v32 = vrot.slane %v913_v34, %v3576_v60 }
 0x43b   :  { %v1194_v43 = vadd.f32 %v1192_v39, %v1178_v55  ;;  %v1195_v18 = vadd.f32 %v1193_v1, %v1179_v40  ;;  %v1260_v57 = vmul.f32 %v1258_v38, %v4080_v5  ;;  %v1277_v40 = vrot.slane %v913_v34, %v3558_v52 }
 0x43c   :  { %v1278_v0 = vmul.f32 %v1273_v3, %v4060_v6 }
 0x43d   :  { %v1213_v25 = vadd.f32 %v1211_v9, %v1194_v43  ;;  %v1214_v30 = vadd.f32 %v1212_v17, %v1195_v18  ;;  %v1279_v4 = vmul.f32 %v1277_v40, %v4060_v6  ;;  %v1294_v17 = vmul.f32 %v1289_v35, %v4094_v36 }
 0x43e   :  { %v1295_v43 = vmul.f32 %v1293_v33, %v4094_v36  ;;  %v1305_v18 = vrot.slane %v912_v48, %v3576_v60 }
 0x43f   :  { %v1229_v13 = vadd.f32 %v1227_v31, %v1213_v25  ;;  %v1230_v7 = vadd.f32 %v1228_v28, %v1214_v30  ;;  %v4184_v8 = vpop.permute.xlu0 %1401  ;;  %v4186_v14 = vpop.permute.xlu1 %1417  ;;  %v1311_v30 = vmul.f32 %v1309_v32, %v4114_v58 }
 0x440   :  { %v1310_v25 = vmul.f32 %v1305_v18, %v4114_v58 }
 0x441   :  { %v1245_v50 = vadd.f32 %v1243_v47, %v1229_v13  ;;  %v1246_v22 = vadd.f32 %v1244_v12, %v1230_v7  ;;  %v1325_v47 = vrot.slane %v913_v34, %v3579_v61 }
 0x443   :  { %v1261_v41 = vadd.f32 %v1259_v62, %v1245_v50  ;;  %v1262_v39 = vadd.f32 %v1260_v57, %v1246_v22  ;;  %v1326_v22 = vmul.f32 %v1321_v19, %v4128_v16  ;;  %v1327_v48 = vmul.f32 %v1325_v47, %v4128_v16 }
 0x444   :  { %v4200_v55 = vpop.permute.xlu1 %1433  ;;  %v4204_v1 = vpop.permute.xlu0 %1449  ;;  %v1407_v19 = vrot.slane %v3877_v46, %v3558_v52  ;;  %v1411_v47 = vrot.slane %v3941_v29, %v3558_v52 }
 0x445   :  { %v1280_v56 = vadd.f32 %v1278_v0, %v1261_v41  ;;  %v1281_v5 = vadd.f32 %v1279_v4, %v1262_v39 }
 0x447   :  { %v1297_v6 = vadd.f32 %v1295_v43, %v1281_v5  ;;  %v1296_v31 = vadd.f32 %v1294_v17, %v1280_v56 }
 0x449   :  { %v4210_v37 = vpop.permute.xlu1 %1468  ;;  %v4212_v9 = vpop.permute.xlu0 %1500  ;;  %v1313_v12 = vadd.f32 %v1311_v30, %v1297_v6  ;;  %v1312_v36 = vadd.f32 %v1310_v25, %v1296_v31 }
 0x44b   :  { %v1329_v40 = vadd.f32 %v1327_v48, %v1313_v12  ;;  %v1328_v39 = vadd.f32 %v1326_v22, %v1312_v36  ;;  %v1423_v22 = vrot.slane %v3877_v46, %v3561_v53  ;;  %v1412_v48 = vmul.f32 %v1407_v19, %v4184_v8 }
 0x44d   :  { %v917_v45 = vpop.permute.xlu1 %916  ;;  %v4218_v28 = vpop.permute.xlu0 %1617 }
 0x44e   :  { %v918_v7 = vsel %vm83_vm3, %v4146_v42, %v917_v45  ;;  %v919_v38 = vsel %vm83_vm3, %v917_v45, %v4146_v42 }
 0x451   :  { %v923_v13 = vpop.permute.xlu1 %922  ;;  %v4236_v50 = vpop.permute.xlu0 %1623 }
 0x452   :  { %v924_v62 = vsel %vm90_vm4, %v4154_v44, %v923_v13  ;;  %v925_v58 = vsel %vm90_vm4, %v923_v13, %v4154_v44 }
 0x453   :  { %v926_v34 = vsel %vm3563_vm6, %v918_v7, %v925_v58  ;;  %v927_v42 = vsel %vm3553_vm5, %v919_v38, %v924_v62 }
 0x454   :  { %v1340_v57 = vrot.slane %v926_v34, %v3558_v52  ;;  %v1344_v41 = vrot.slane %v927_v42, %v3558_v52  ;;  %v1356_v3 = vrot.slane %v926_v34, %v3561_v53  ;;  %v1360_v44 = vrot.slane %v927_v42, %v3561_v53 }
 0x455   :  { %v1485_v0 = vpop.permute.xlu1 %1484  ;;  %v1372_v35 = vrot.slane %v926_v34, %v3576_v60  ;;  %v1376_v33 = vrot.slane %v927_v42, %v3576_v60  ;;  %v1388_v56 = vrot.slane %v926_v34, %v3579_v61  ;;  %v1392_v5 = vrot.slane %v927_v42, %v3579_v61  ;;  %v4256_v45 = vpop.permute.xlu0 %1657 }
 0x456   :  { %v1345_v4 = vmul.f32 %v1340_v57, %v4138_v2  ;;  %v1346_v16 = vmul.f32 %v1344_v41, %v4138_v2  ;;  %v1361_v18 = vmul.f32 %v1356_v3, %v4170_v27  ;;  %v1362_v32 = vmul.f32 %v1360_v44, %v4170_v27 }
 0x457   :  { %v1377_v2 = vmul.f32 %v1372_v35, %v4152_v15  ;;  %v1378_v25 = vmul.f32 %v1376_v33, %v4152_v15  ;;  %v1393_v27 = vmul.f32 %v1388_v56, %v4168_v63  ;;  %v1394_v36 = vmul.f32 %v1392_v5, %v4168_v63 }
 0x458   :  { %v1347_v17 = vadd.f32 %v1345_v4, %v1328_v39  ;;  %v1348_v43 = vadd.f32 %v1346_v16, %v1329_v40  ;;  %v1427_v15 = vrot.slane %v3941_v29, %v3561_v53  ;;  %v1413_v34 = vmul.f32 %v1411_v47, %v4184_v8 }
 0x459   :  { %v4274_v41 = vpop.permute.xlu0 %1912  ;;  %v1439_v3 = vrot.slane %v3877_v46, %v3576_v60  ;;  %v1443_v63 = vrot.slane %v3941_v29, %v3576_v60  ;;  %v928_v44 = vsel %vm3605_vm8, %v925_v58, %v918_v7  ;;  %v929_v40 = vsel %vm3597_vm7, %v924_v62, %v919_v38 }
 0x45a   :  { %v1363_v6 = vadd.f32 %v1361_v18, %v1347_v17  ;;  %v1364_v31 = vadd.f32 %v1362_v32, %v1348_v43  ;;  %v4260_v30 = vpop.permute.xlu1 %1516  ;;  %v1428_v8 = vmul.f32 %v1423_v22, %v4186_v14  ;;  %v1429_v4 = vmul.f32 %v1427_v15, %v4186_v14 }
 0x45b   :  { %v1455_v33 = vrot.slane %v3877_v46, %v3579_v61  ;;  %v1459_v56 = vrot.slane %v3941_v29, %v3579_v61  ;;  %v1444_v5 = vmul.f32 %v1439_v3, %v4200_v55  ;;  %v1445_v7 = vmul.f32 %v1443_v63, %v4200_v55 }
 0x45c   :  { %v1379_v12 = vadd.f32 %v1377_v2, %v1363_v6  ;;  %v1380_v13 = vadd.f32 %v1378_v25, %v1364_v31  ;;  %v1474_v38 = vrot.slane %v928_v44, %v3558_v52  ;;  %v1478_v62 = vrot.slane %v929_v40, %v3558_v52 }
 0x45d   :  { %v1506_v14 = vrot.slane %v928_v44, %v3576_v60  ;;  %v1490_v18 = vrot.slane %v928_v44, %v3561_v53  ;;  %v1494_v46 = vrot.slane %v929_v40, %v3561_v53  ;;  %v1460_v29 = vmul.f32 %v1455_v33, %v4204_v1 }
 0x45e   :  { %v1395_v42 = vadd.f32 %v1393_v27, %v1379_v12  ;;  %v1396_v57 = vadd.f32 %v1394_v36, %v1380_v13  ;;  %v4296_v43 = vpop.permute.xlu0 %1972  ;;  %v1461_v6 = vmul.f32 %v1459_v56, %v4204_v1  ;;  %v1510_v2 = vrot.slane %v929_v40, %v3576_v60 }
 0x45f   :  { %v4284_v39 = vpop.permute.xlu1 %1532  ;;  %v1479_v19 = vmul.f32 %v1474_v38, %v4210_v37  ;;  %v1480_v47 = vmul.f32 %v1478_v62, %v4210_v37  ;;  %v1495_v13 = vmul.f32 %v1490_v18, %v1485_v0  ;;  %v1496_v27 = vmul.f32 %v1494_v46, %v1485_v0 }
 0x460   :  { %v1415_v16 = vadd.f32 %v1413_v34, %v1396_v57  ;;  %v1414_v35 = vadd.f32 %v1412_v48, %v1395_v42  ;;  %v1511_v36 = vmul.f32 %v1506_v14, %v4212_v9  ;;  %v1512_v42 = vmul.f32 %v1510_v2, %v4212_v9  ;;  %v5125_v2 = vld [vmem:[#allocation9_spill] sm:$0xff] }
 0x461   :  { %v1522_v57 = vrot.slane %v928_v44, %v3579_v61  ;;  %v5120_v14 = vmov 3   ;;  %v5121_v18 = vmov 1   ;;  %v5122_v46 = vmov 2  }
 0x462   :  { %v1431_v58 = vadd.f32 %v1429_v4, %v1415_v16  ;;  %v1430_v17 = vadd.f32 %v1428_v8, %v1414_v35  ;;  %v1526_v16 = vrot.slane %v929_v40, %v3579_v61 }
 0x463   :  { %v1620_v32 = vpop.permute.xlu1 %1619  ;;  %v1749_v0 = vpop.permute.xlu0 %1748  ;;  %v1527_v9 = vmul.f32 %v1522_v57, %v4260_v30 }
 0x464   :  { %v1447_v55 = vadd.f32 %v1445_v7, %v1431_v58  ;;  %v1446_v31 = vadd.f32 %v1444_v5, %v1430_v17  ;;  %v4310_v22 = vsel %vm58_vm1, %v4218_v28, %v1620_v32  ;;  %v1528_v56 = vmul.f32 %v1526_v16, %v4260_v30 }
 0x466   :  { %v1463_v25 = vadd.f32 %v1461_v6, %v1447_v55  ;;  %v1462_v12 = vadd.f32 %v1460_v29, %v1446_v31  ;;  %v1622_v29 = vsel %vm58_vm1, %v1620_v32, %v4218_v28  ;;  %v3135_v6 = vld [vmem:[%s5069_s1 + $0x8] sm:$0xf]  ;;  %v5123_v55 = vmov 0   ;;  %v4390_v28 = vld [vmem:[%s5069_s1 + $0x1c] sm:$0xf]  ;;  %v5124_v31 = vld [vmem:[#allocation8_spill] sm:$0xff] }
 0x467   :  { %v1626_v1 = vpop.permute.xlu1 %1625  ;;  %v4398_v32 = vld [vmem:[%s5069_s1 + $0x20] sm:$0xf] }
 0x468   :  { %v1482_v15 = vadd.f32 %v1480_v47, %v1463_v25  ;;  %v1481_v48 = vadd.f32 %v1479_v19, %v1462_v12  ;;  %v4315_v34 = vsel %vm41_vm0, %v4236_v50, %v1626_v1  ;;  %v1628_v37 = vsel %vm41_vm0, %v1626_v1, %v4236_v50 }
 0x469   :  { %v4325_v3 = vsel %vm41_vm0, %v4310_v22, %v1628_v37  ;;  %v1758_v63 = vrot.slane %v4315_v34, %v3558_v52 }
 0x46a   :  { %v1497_v8 = vadd.f32 %v1495_v13, %v1481_v48  ;;  %v1498_v4 = vadd.f32 %v1496_v27, %v1482_v15  ;;  %v1754_v50 = vrot.slane %v4325_v3, %v3558_v52  ;;  %1633 = vrot.lane.b32.xlu1 %v4325_v3, %s3356_s23 }
 0x46b   :  { %v4335_v44 = vmul.f32 %v1758_v63, %v1749_v0 }
 0x46c   :  { %v1514_v35 = vadd.f32 %v1512_v42, %v1498_v4  ;;  %v1513_v33 = vadd.f32 %v1511_v36, %v1497_v8  ;;  %v4338_v5 = vmul.f32 %v1754_v50, %v1749_v0 }
 0x46e   :  { %v1529_v7 = vadd.f32 %v1527_v9, %v1513_v33  ;;  %v1530_v38 = vadd.f32 %v1528_v56, %v1514_v35  ;;  %1635 = vrot.lane.b32.xlu1 %v4315_v34, %s3356_s23  ;;  %v4468_v56 = vpop.permute.xlu0 %2052 }
 0x470   :  { %v4343_v40 = vadd.f32 %v4284_v39, %v1529_v7  ;;  %v4346_v62 = vadd.f32 %v4284_v39, %v1530_v38 }
 0x472   :  { %1639 = vrot.lane.b32.xlu1 %v4325_v3, %s3355_s22  ;;  %v1537_v58 = vsel %vm784_vm9, %v4343_v40, 0.0  ;;  %v1538_v30 = vsel %vm784_vm9, %v4346_v62, 0.0 }
 0x473   :  { %v1539_v17 = vadd.f32 %v1538_v30, %v1537_v58 }
 0x475   :  { %1540 = vadd.xlane.f32.xlu0 %v1539_v17 }
 0x476   :  { %1641 = vrot.lane.b32.xlu1 %v4315_v34, %s3355_s22 }
 0x47a   :  { %1714 = vperm.xlu1 %3255, %v4009_v59  }
 0x47e   :  { %3256 = vset.pattern.permute.xlu1 %v5120_v14 }
 0x47f   :  { %1730 = vperm.xlu1 %3256, %v4009_v59   ;;  %v4372_v59 = vsel %vm44_vm2, %v4315_v34, %v1622_v29 }
 0x483   :  { %3257 = vset.pattern.permute.xlu1 %v5121_v18 }
 0x484   :  { %1764 = vperm.xlu1 %3257, %v3987_v23  }
 0x488   :  { %3258 = vset.pattern.permute.xlu1 %v5122_v46 }
 0x489   :  { %1780 = vperm.xlu1 %3258, %v3987_v23  }
 0x48b   :  { %2100 = vperm.xlu0 %3274, %v3998_v21  }
 0x48d   :  { %3259 = vset.pattern.permute.xlu1 %v5120_v14 }
 0x48e   :  { %1796 = vperm.xlu1 %3259, %v3987_v23   ;;  %v3139_v23 = vld [vmem:[%s5069_s1 + $0x18] sm:$0xf] }
 0x48f   :  { %1667 = vrot.lane.b32.xlu0 %v4372_v59, %s3356_s23 }
 0x490   :  { %3277 = vset.pattern.permute.xlu0 %v5122_v46 }
 0x492   :  { %3260 = vset.pattern.permute.xlu1 %v5123_v55 }
 0x493   :  { %1814 = vperm.xlu1 %3260, %v3135_v6   ;;  %1673 = vrot.lane.b32.xlu0 %v4372_v59, %s3355_s22 }
 0x497   :  { %3261 = vset.pattern.permute.xlu1 %v5121_v18  ;;  %2150 = vperm.xlu0 %3277, %v3139_v23  }
 0x498   :  { %1830 = vperm.xlu1 %3261, %v3135_v6  }
 0x49b   :  { %3280 = vset.pattern.permute.xlu0 %v5121_v18 }
 0x49c   :  { %3262 = vset.pattern.permute.xlu1 %v5122_v46  ;;  %2200 = vperm.xlu0 %3280, %v4390_v28  }
 0x49d   :  { %1846 = vperm.xlu1 %3262, %v3135_v6  }
 0x4a0   :  { %3283 = vset.pattern.permute.xlu0 %v5123_v55 }
 0x4a1   :  { %3263 = vset.pattern.permute.xlu1 %v5120_v14  ;;  %2250 = vperm.xlu0 %3283, %v4398_v32  }
 0x4a2   :  { %1862 = vperm.xlu1 %3263, %v3135_v6  }
 0x4a5   :  { %3286 = vset.pattern.permute.xlu0 %v5120_v14 }
 0x4a6   :  { %3264 = vset.pattern.permute.xlu1 %v5123_v55  ;;  %2298 = vperm.xlu0 %3286, %v4398_v32  }
 0x4a7   :  { %1880 = vperm.xlu1 %3264, %v3965_v11  }
 0x4ab   :  { %1649 = vrot.lane.b32.xlu1 %v3934_v20, %s3356_s23 }
 0x4ac   :  { %3265 = vset.pattern.permute.xlu1 %v5121_v18 }
 0x4af   :  { %1651 = vrot.lane.b32.xlu1 %v5124_v31, %s3356_s23 }
 0x4b3   :  { %1655 = vrot.lane.b32.xlu1 %v3934_v20, %s3355_s22  ;;  %v1685_v20 = vpop.permute.xlu1 %1684 }
 0x4b7   :  { %1896 = vperm.xlu1 %3265, %v3965_v11  }
 0x4bb   :  { %3266 = vset.pattern.permute.xlu1 %v5120_v14 }
 0x4bc   :  { %1928 = vperm.xlu1 %3266, %v3965_v11   ;;  %v1699_v11 = vpop.permute.xlu1 %1698 }
 0x4c0   :  { %3267 = vset.pattern.permute.xlu1 %v5123_v55 }
 0x4c1   :  { %1946 = vperm.xlu1 %3267, %v5125_v2  }
 0x4c5   :  { %3270 = vset.pattern.permute.xlu1 %v5122_v46 }
 0x4c6   :  { %1998 = vperm.xlu1 %3270, %v5125_v2  }
 0x4ca   :  { %3271 = vset.pattern.permute.xlu1 %v5120_v14 }
 0x4cb   :  { %2024 = vperm.xlu1 %3271, %v5125_v2  }
 0x4cf   :  { %3272 = vset.pattern.permute.xlu1 %v5121_v18 }
 0x4d0   :  { %2068 = vperm.xlu1 %3272, %v3998_v21  }
 0x4d4   :  { %3273 = vset.pattern.permute.xlu1 %v5122_v46 }
 0x4d5   :  { %2084 = vperm.xlu1 %3273, %v3998_v21  }
 0x4d9   :  { %3275 = vset.pattern.permute.xlu1 %v5123_v55 }
 0x4da   :  { %2118 = vperm.xlu1 %3275, %v3139_v23  }
 0x4dc   :  { %v1634_v25 = vpop.permute.xlu1 %1633 }
 0x4de   :  { %1665 = vrot.lane.b32.xlu1 %v4310_v22, %s3356_s23 }
 0x4df   :  { %3276 = vset.pattern.permute.xlu1 %v5121_v18 }
 0x4e0   :  { %v1636_v19 = vpop.permute.xlu1 %1635 }
 0x4e1   :  { %v4444_v27 = vsel %vm83_vm3, %v1634_v25, %v1636_v19  ;;  %v4448_v36 = vsel %vm83_vm3, %v1636_v19, %v1634_v25  ;;  %v1770_v25 = vrot.slane %v4325_v3, %v3561_v53  ;;  %v1774_v19 = vrot.slane %v4315_v34, %v3561_v53 }
 0x4e2   :  { %1671 = vrot.lane.b32.xlu1 %v4310_v22, %s3355_s22 }
 0x4e4   :  { %v1640_v47 = vpop.permute.xlu1 %1639 }
 0x4e6   :  { %2134 = vperm.xlu1 %3276, %v3139_v23  }
 0x4e8   :  { %v1642_v12 = vpop.permute.xlu1 %1641 }
 0x4e9   :  { %v4436_v21 = vsel %vm90_vm4, %v1640_v47, %v1642_v12  ;;  %v4440_v13 = vsel %vm90_vm4, %v1642_v12, %v1640_v47 }
 0x4ea   :  { %3278 = vset.pattern.permute.xlu1 %v5120_v14  ;;  %v1645_v1 = vsel %vm3563_vm6, %v4444_v27, %v4440_v13  ;;  %v1646_v15 = vsel %vm3553_vm5, %v4448_v36, %v4436_v21 }
 0x4eb   :  { %2166 = vperm.xlu1 %3278, %v3139_v23   ;;  %v1690_v48 = vrot.slane %v1645_v1, %v3558_v52  ;;  %v1694_v37 = vrot.slane %v1646_v15, %v3558_v52  ;;  %v1704_v0 = vrot.slane %v1645_v1, %v3561_v53  ;;  %v1708_v42 = vrot.slane %v1646_v15, %v3561_v53 }
 0x4ec   :  { %v1720_v57 = vrot.slane %v1645_v1, %v3576_v60  ;;  %v1724_v63 = vrot.slane %v1646_v15, %v3576_v60  ;;  %v1736_v58 = vrot.slane %v1645_v1, %v3579_v61  ;;  %v1740_v30 = vrot.slane %v1646_v15, %v3579_v61 }
 0x4ed   :  { %v1695_v8 = vmul.f32 %v1690_v48, %v1685_v20  ;;  %v1696_v4 = vmul.f32 %v1694_v37, %v1685_v20  ;;  %v1709_v16 = vmul.f32 %v1704_v0, %v1699_v11  ;;  %v1710_v50 = vmul.f32 %v1708_v42, %v1699_v11 }
 0x4ef   :  { %3279 = vset.pattern.permute.xlu1 %v5123_v55  ;;  %v1711_v7 = vadd.f32 %v1709_v16, %v1695_v8  ;;  %v1712_v38 = vadd.f32 %v1710_v50, %v1696_v4 }
 0x4f0   :  { %2184 = vperm.xlu1 %3279, %v4390_v28  }
 0x4f4   :  { %3281 = vset.pattern.permute.xlu1 %v5122_v46 }
 0x4f5   :  { %2216 = vperm.xlu1 %3281, %v4390_v28   ;;  %v1715_v9 = vpop.permute.xlu1 %1714 }
 0x4f6   :  { %v1725_v35 = vmul.f32 %v1720_v57, %v1715_v9  ;;  %v1726_v33 = vmul.f32 %v1724_v63, %v1715_v9  ;;  %v1786_v57 = vrot.slane %v4325_v3, %v3576_v60  ;;  %v1790_v63 = vrot.slane %v4315_v34, %v3576_v60 }
 0x4f8   :  { %v1727_v29 = vadd.f32 %v1725_v35, %v1711_v7  ;;  %v1728_v6 = vadd.f32 %v1726_v33, %v1712_v38  ;;  %v1802_v33 = vrot.slane %v4325_v3, %v3579_v61  ;;  %v1806_v7 = vrot.slane %v4315_v34, %v3579_v61 }
 0x4f9   :  { %3282 = vset.pattern.permute.xlu1 %v5120_v14  ;;  %v1647_v3 = vsel %vm3605_vm8, %v4440_v13, %v4444_v27  ;;  %v1648_v34 = vsel %vm3597_vm7, %v4436_v21, %v4448_v36 }
 0x4fa   :  { %2232 = vperm.xlu1 %3282, %v4390_v28   ;;  %v1731_v17 = vpop.permute.xlu1 %1730  ;;  %v1852_v13 = vrot.slane %v1647_v3, %v3576_v60  ;;  %v1856_v27 = vrot.slane %v1648_v34, %v3576_v60  ;;  %v1868_v21 = vrot.slane %v1647_v3, %v3579_v61  ;;  %v1872_v36 = vrot.slane %v1648_v34, %v3579_v61 }
 0x4fb   :  { %v1741_v23 = vmul.f32 %v1736_v58, %v1731_v17  ;;  %v1742_v31 = vmul.f32 %v1740_v30, %v1731_v17 }
 0x4fd   :  { %v1743_v2 = vadd.f32 %v1741_v23, %v1727_v29  ;;  %v1744_v20 = vadd.f32 %v1742_v31, %v1728_v6 }
 0x4fe   :  { %3284 = vset.pattern.permute.xlu1 %v5121_v18  ;;  %v4475_v11 = vpop.xlane.xlu0 %1540 }
 0x4ff   :  { %v1557_v47 = vrot.slane %v4475_v11, 4  ;;  %2266 = vperm.xlu1 %3284, %v4398_v32   ;;  %v1761_v28 = vadd.f32 %v4338_v5, %v1743_v2  ;;  %v1762_v12 = vadd.f32 %v4335_v44, %v1744_v20  ;;  %v1765_v1 = vpop.permute.xlu1 %1764 }
 0x500   :  { %v1775_v15 = vmul.f32 %v1770_v25, %v1765_v1  ;;  %v1776_v48 = vmul.f32 %v1774_v19, %v1765_v1  ;;  %v1820_v25 = vrot.slane %v1647_v3, %v3558_v52  ;;  %v1824_v19 = vrot.slane %v1648_v34, %v3558_v52 }
 0x501   :  { %v1558_v37 = vadd.f32 %v1557_v47, %v4475_v11  ;;  %v1836_v1 = vrot.slane %v1647_v3, %v3561_v53 }
 0x502   :  { %v1777_v0 = vadd.f32 %v1775_v15, %v1761_v28  ;;  %v1778_v42 = vadd.f32 %v1776_v48, %v1762_v12  ;;  %v1840_v15 = vrot.slane %v1648_v34, %v3561_v53 }
 0x503   :  { %3285 = vset.pattern.permute.xlu1 %v5122_v46  ;;  %v1559_v8 = vrot.slane %v1558_v37, 2 }
 0x504   :  { %2282 = vperm.xlu1 %3285, %v4398_v32   ;;  %v1781_v5 = vpop.permute.xlu1 %1780 }
 0x505   :  { %v1791_v44 = vmul.f32 %v1786_v57, %v1781_v5  ;;  %v1792_v4 = vmul.f32 %v1790_v63, %v1781_v5  ;;  %v1560_v16 = vadd.f32 %v1559_v8, %v1558_v37 }
 0x507   :  { %v1793_v50 = vadd.f32 %v1791_v44, %v1777_v0  ;;  %v1794_v9 = vadd.f32 %v1792_v4, %v1778_v42  ;;  %v1561_v35 = vrot.slane %v1560_v16, 1 }
 0x509   :  { %v1797_v38 = vpop.permute.xlu1 %1796  ;;  %v1562_v58 = vadd.f32 %v1561_v35, %v1560_v16 }
 0x50a   :  { %v1807_v30 = vmul.f32 %v1802_v33, %v1797_v38  ;;  %v1808_v17 = vmul.f32 %v1806_v7, %v1797_v38 }
 0x50b   :  { %3156 = vpush %v1562_v58 }
 0x50c   :  { %v1809_v29 = vadd.f32 %v1807_v30, %v1793_v50  ;;  %v1810_v32 = vadd.f32 %v1808_v17, %v1794_v9 }
 0x50e   :  { %v1815_v6 = vpop.permute.xlu1 %1814 }
 0x50f   :  { %v1825_v28 = vmul.f32 %v1820_v25, %v1815_v6  ;;  %v1826_v12 = vmul.f32 %v1824_v19, %v1815_v6 }
 0x511   :  { %v1827_v42 = vadd.f32 %v1825_v28, %v1809_v29  ;;  %v1828_v57 = vadd.f32 %v1826_v12, %v1810_v32 }
 0x513   :  { %v1831_v23 = vpop.permute.xlu1 %1830 }
 0x514   :  { %v1841_v48 = vmul.f32 %v1836_v1, %v1831_v23  ;;  %v1842_v37 = vmul.f32 %v1840_v15, %v1831_v23  ;;  %v5126_v1 = vld [vmem:[#allocation2_spill] sm:$0xff] }
 0x515   :  { %v5127_v15 = vsub.s32 4, %v5126_v1 }
 0x516   :  { %v1843_v5 = vadd.f32 %v1841_v48, %v1827_v42  ;;  %v1844_v44 = vadd.f32 %v1842_v37, %v1828_v57 }
 0x518   :  { %v1847_v31 = vpop.permute.xlu1 %1846 }
 0x519   :  { %v1857_v63 = vmul.f32 %v1852_v13, %v1847_v31  ;;  %v1858_v8 = vmul.f32 %v1856_v27, %v1847_v31 }
 0x51b   :  { %v1859_v38 = vadd.f32 %v1857_v63, %v1843_v5  ;;  %v1860_v58 = vadd.f32 %v1858_v8, %v1844_v44 }
 0x51d   :  { %v1863_v2 = vpop.permute.xlu1 %1862 }
 0x51e   :  { %v1873_v4 = vmul.f32 %v1868_v21, %v1863_v2  ;;  %v1874_v16 = vmul.f32 %v1872_v36, %v1863_v2 }
 0x520   :  { %v1875_v6 = vadd.f32 %v1873_v4, %v1859_v38  ;;  %v1876_v23 = vadd.f32 %v1874_v16, %v1860_v58 }
 0x522   :  { %v1881_v20 = vpop.permute.xlu1 %1880 }
 0x526   :  { %v1650_v47 = vpop.permute.xlu1 %1649 }
 0x52a   :  { %v1652_v0 = vpop.permute.xlu1 %1651 }
 0x52b   :  { %v4514_v9 = vsel %vm83_vm3, %v1650_v47, %v1652_v0  ;;  %v4518_v35 = vsel %vm83_vm3, %v1652_v0, %v1650_v47  ;;  %v3345_v47 = vld [vmem:[%s5068_s0 + $0x8] sm:$0xff] }
 0x52c   :  { %v1978_v28 = vrot.slane %v3345_v47, %v3561_v53  ;;  %v1952_v12 = vrot.slane %v3345_v47, %v3558_v52  ;;  %v1956_v48 = vrot.slane %v3345_v47, %v5127_v15 }
 0x52e   :  { %v1656_v50 = vpop.permute.xlu1 %1655  ;;  %v1988_v4 = vrot.slane %v1978_v28, %v3561_v53 }
 0x52f   :  { %v4523_v33 = vsel %vm90_vm4, %v1656_v50, %v4256_v45  ;;  %v4528_v7 = vsel %vm90_vm4, %v4256_v45, %v1656_v50  ;;  %v1962_v50 = vrot.slane %v1952_v12, %v3558_v52 }
 0x530   :  { %v1661_v30 = vsel %vm3563_vm6, %v4514_v9, %v4528_v7  ;;  %v1662_v17 = vsel %vm3553_vm5, %v4518_v35, %v4523_v33 }
 0x531   :  { %v1886_v29 = vrot.slane %v1661_v30, %v3558_v52  ;;  %v1890_v32 = vrot.slane %v1662_v17, %v3558_v52  ;;  %v1918_v45 = vrot.slane %v1661_v30, %v3576_v60  ;;  %v1922_v31 = vrot.slane %v1662_v17, %v3576_v60 }
 0x532   :  { %v1897_v2 = vpop.permute.xlu1 %1896  ;;  %v1902_v25 = vrot.slane %v1661_v30, %v3561_v53  ;;  %v1906_v19 = vrot.slane %v1662_v17, %v3561_v53  ;;  %v1934_v42 = vrot.slane %v1661_v30, %v3579_v61  ;;  %v1938_v5 = vrot.slane %v1662_v17, %v3579_v61 }
 0x533   :  { %v1891_v3 = vmul.f32 %v1886_v29, %v1881_v20  ;;  %v1892_v34 = vmul.f32 %v1890_v32, %v1881_v20  ;;  %v5128_v20 = vsub.s32 5, %v5126_v1  ;;  %v1923_v36 = vmul.f32 %v1918_v45, %v4274_v41 }
 0x534   :  { %v1907_v27 = vmul.f32 %v1902_v25, %v1897_v2  ;;  %v1908_v0 = vmul.f32 %v1906_v19, %v1897_v2  ;;  %v1924_v8 = vmul.f32 %v1922_v31, %v4274_v41  ;;  %v1966_v32 = vrot.slane %v1956_v48, %v3558_v52 }
 0x535   :  { %v1893_v37 = vadd.f32 %v1891_v3, %v1875_v6  ;;  %v1894_v13 = vadd.f32 %v1892_v34, %v1876_v23  ;;  %v1982_v21 = vrot.slane %v3345_v47, %v5128_v20  ;;  %v2004_v30 = vrot.slane %v3345_v47, %v3576_v60 }
 0x536   :  { %v5129_v23 = vsub.s32 6, %v5126_v1  ;;  %v1993_v17 = vmul.f32 %v1988_v4, %v4296_v43 }
 0x537   :  { %v1909_v57 = vadd.f32 %v1907_v27, %v1893_v37  ;;  %v1910_v63 = vadd.f32 %v1908_v0, %v1894_v13  ;;  %v1929_v44 = vpop.permute.xlu1 %1928  ;;  %v1992_v6 = vrot.slane %v1982_v21, %v3561_v53  ;;  %v2014_v12 = vrot.slane %v2004_v30, %v3576_v60 }
 0x538   :  { %v1939_v16 = vmul.f32 %v1934_v42, %v1929_v44  ;;  %v1940_v29 = vmul.f32 %v1938_v5, %v1929_v44  ;;  %v2008_v41 = vrot.slane %v3345_v47, %v5129_v23  ;;  %v2030_v13 = vrot.slane %v3345_v47, %v3579_v61 }
 0x539   :  { %v1925_v38 = vadd.f32 %v1923_v36, %v1909_v57  ;;  %v1926_v58 = vadd.f32 %v1924_v8, %v1910_v63  ;;  %v1994_v19 = vmul.f32 %v1992_v6, %v4296_v43  ;;  %v5130_v27 = vsub.s32 7, %v5126_v1 }
 0x53a   :  { %v2018_v15 = vrot.slane %v2008_v41, %v3576_v60  ;;  %v1663_v57 = vsel %vm3605_vm8, %v4528_v7, %v4514_v9  ;;  %v1664_v1 = vsel %vm3597_vm7, %v4523_v33, %v4518_v35  ;;  %v2040_v44 = vrot.slane %v2030_v13, %v3579_v61 }
 0x53b   :  { %v1941_v45 = vadd.f32 %v1939_v16, %v1925_v38  ;;  %v1942_v2 = vadd.f32 %v1940_v29, %v1926_v58  ;;  %v2034_v0 = vrot.slane %v3345_v47, %v5130_v27  ;;  %v2058_v7 = vrot.slane %v1663_v57, %v3558_v52 }
 0x53c   :  { %v1947_v31 = vpop.permute.xlu1 %1946  ;;  %s3157_s9 = spop %3156  ;;  %v2062_v35 = vrot.slane %v1664_v1, %v3558_v52 }
 0x53d   :  { %v1967_v3 = vmul.f32 %v1962_v50, %v1947_v31  ;;  %v1968_v34 = vmul.f32 %v1966_v32, %v1947_v31  ;;  %v1564_v25 = vstv %s3157_s9  ;;  %v2044_v4 = vrot.slane %v2034_v0, %v3579_v61 }
 0x53e   :  { %v1565_v28 = vmul.f32 0.0009765625, %v1564_v25  ;;  %v2063_v23 = vmul.f32 %v2058_v7, %v4468_v56  ;;  %v2064_v41 = vmul.f32 %v2062_v35, %v4468_v56  ;;  %v2078_v25 = vrot.slane %v1664_v1, %v3561_v53 }
 0x53f   :  { %v1969_v48 = vadd.f32 %v1967_v3, %v1941_v45  ;;  %v1970_v37 = vadd.f32 %v1968_v34, %v1942_v2  ;;  %v2101_v3 = vpop.permute.xlu0 %2100  ;;  %v2074_v34 = vrot.slane %v1663_v57, %v3561_v53 }
 0x540   :  { %v4572_v20 = vsub.f32 %v4343_v40, %v1565_v28  ;;  %v4575_v21 = vsub.f32 %v4346_v62, %v1565_v28 }
 0x541   :  { %v1995_v36 = vadd.f32 %v1993_v17, %v1969_v48  ;;  %v1996_v43 = vadd.f32 %v1994_v19, %v1970_v37  ;;  %v1999_v42 = vpop.permute.xlu1 %1998  ;;  %v2090_v48 = vrot.slane %v1663_v57, %v3576_v60  ;;  %v2094_v37 = vrot.slane %v1664_v1, %v3576_v60 }
 0x542   :  { %5131 = vst [vmem:[#allocation8_spill] sm:$0xff] %v4575_v21  ;;  %v1568_v47 = vmul.f32 %v4572_v20, %v4572_v20  ;;  %v1569_v63 = vmul.f32 %v4575_v21, %v4575_v21  ;;  %v2019_v8 = vmul.f32 %v2014_v12, %v1999_v42  ;;  %v2020_v5 = vmul.f32 %v2018_v15, %v1999_v42 }
 0x543   :  { %v1668_v28 = vpop.permute.xlu0 %1667  ;;  %v2110_v42 = vrot.slane %v1664_v1, %v3579_v61 }
 0x544   :  { %v1570_v16 = vsel %vm784_vm9, %v1568_v47, 0.0  ;;  %v1571_v9 = vsel %vm784_vm9, %v1569_v63, 0.0  ;;  %v2021_v38 = vadd.f32 %v2019_v8, %v1995_v36  ;;  %v2022_v58 = vadd.f32 %v2020_v5, %v1996_v43 }
 0x545   :  { %v1572_v33 = vadd.f32 %v1571_v9, %v1570_v16  ;;  %v2106_v43 = vrot.slane %v1663_v57, %v3579_v61  ;;  %v2112_v35 = vmul.f32 %v2110_v42, %v2101_v3  ;;  %v2210_v42 = vrot.slane %v4372_v59, %v3561_v53 }
 0x546   :  { %v2025_v50 = vpop.permute.xlu1 %2024 }
 0x547   :  { %v2045_v29 = vmul.f32 %v2040_v44, %v2025_v50  ;;  %v2046_v32 = vmul.f32 %v2044_v4, %v2025_v50  ;;  %1573 = vadd.xlane.f32.xlu1 %v1572_v33  ;;  %v1674_v47 = vpop.permute.xlu0 %1673  ;;  %v2111_v7 = vmul.f32 %v2106_v43, %v2101_v3  ;;  %v2194_v43 = vrot.slane %v4372_v59, %v3558_v52 }
 0x549   :  { %v2047_v6 = vadd.f32 %v2045_v29, %v2021_v38  ;;  %v2048_v30 = vadd.f32 %v2046_v32, %v2022_v58 }
 0x54b   :  { %v2065_v17 = vadd.f32 %v2063_v23, %v2047_v6  ;;  %v2066_v45 = vadd.f32 %v2064_v41, %v2048_v30  ;;  %v2069_v31 = vpop.permute.xlu1 %2068 }
 0x54c   :  { %v2079_v12 = vmul.f32 %v2074_v34, %v2069_v31  ;;  %v2080_v15 = vmul.f32 %v2078_v25, %v2069_v31 }
 0x54e   :  { %v2081_v0 = vadd.f32 %v2079_v12, %v2065_v17  ;;  %v2082_v36 = vadd.f32 %v2080_v15, %v2066_v45  ;;  %v2151_v45 = vpop.permute.xlu0 %2150 }
 0x550   :  { %v2085_v2 = vpop.permute.xlu1 %2084 }
 0x551   :  { %v2095_v13 = vmul.f32 %v2090_v48, %v2085_v2  ;;  %v2096_v27 = vmul.f32 %v2094_v37, %v2085_v2 }
 0x553   :  { %v2097_v63 = vadd.f32 %v2095_v13, %v2081_v0  ;;  %v2098_v8 = vadd.f32 %v2096_v27, %v2082_v36 }
 0x555   :  { %v2119_v19 = vpop.permute.xlu1 %2118  ;;  %v2113_v30 = vadd.f32 %v2111_v7, %v2097_v63  ;;  %v2114_v23 = vadd.f32 %v2112_v35, %v2098_v8 }
 0x559   :  { %v1666_v56 = vpop.permute.xlu1 %1665 }
 0x55a   :  { %v1669_v44 = vsel %vm83_vm3, %v1666_v56, %v1668_v28  ;;  %v1670_v4 = vsel %vm83_vm3, %v1668_v28, %v1666_v56 }
 0x55d   :  { %v1672_v5 = vpop.permute.xlu1 %1671 }
 0x55e   :  { %v1675_v16 = vsel %vm90_vm4, %v1672_v5, %v1674_v47  ;;  %v1676_v9 = vsel %vm90_vm4, %v1674_v47, %v1672_v5  ;;  %v2201_v47 = vpop.permute.xlu0 %2200 }
 0x55f   :  { %v1677_v57 = vsel %vm3563_vm6, %v1669_v44, %v1676_v9  ;;  %v1678_v1 = vsel %vm3553_vm5, %v1670_v4, %v1675_v16  ;;  %v2212_v35 = vmul.f32 %v2210_v42, %v2201_v47 }
 0x560   :  { %v2124_v33 = vrot.slane %v1677_v57, %v3558_v52  ;;  %v2128_v50 = vrot.slane %v1678_v1, %v3558_v52  ;;  %v2156_v38 = vrot.slane %v1677_v57, %v3576_v60  ;;  %v2160_v58 = vrot.slane %v1678_v1, %v3576_v60 }
 0x561   :  { %v2135_v29 = vpop.permute.xlu1 %2134  ;;  %v2140_v32 = vrot.slane %v1677_v57, %v3561_v53  ;;  %v2144_v6 = vrot.slane %v1678_v1, %v3561_v53  ;;  %v2172_v37 = vrot.slane %v1677_v57, %v3579_v61  ;;  %v2176_v13 = vrot.slane %v1678_v1, %v3579_v61 }
 0x562   :  { %v2129_v41 = vmul.f32 %v2124_v33, %v2119_v19  ;;  %v2130_v17 = vmul.f32 %v2128_v50, %v2119_v19  ;;  %v2161_v25 = vmul.f32 %v2156_v38, %v2151_v45  ;;  %v2162_v28 = vmul.f32 %v2160_v58, %v2151_v45 }
 0x563   :  { %v2145_v3 = vmul.f32 %v2140_v32, %v2135_v29  ;;  %v2146_v34 = vmul.f32 %v2144_v6, %v2135_v29  ;;  %v2190_v19 = vrot.slane %v4310_v22, %v3558_v52  ;;  %v2206_v1 = vrot.slane %v4310_v22, %v3561_v53 }
 0x564   :  { %v2131_v31 = vadd.f32 %v2129_v41, %v2113_v30  ;;  %v2132_v2 = vadd.f32 %v2130_v17, %v2114_v23  ;;  %v2226_v38 = vrot.slane %v4372_v59, %v3576_v60  ;;  %v2222_v29 = vrot.slane %v4310_v22, %v3576_v60 }
 0x565   :  { %v2211_v58 = vmul.f32 %v2206_v1, %v2201_v47  ;;  %v1679_v23 = vsel %vm3605_vm8, %v1676_v9, %v1669_v44  ;;  %v1680_v45 = vsel %vm3597_vm7, %v1675_v16, %v1670_v4 }
 0x566   :  { %v2147_v12 = vadd.f32 %v2145_v3, %v2131_v31  ;;  %v2148_v15 = vadd.f32 %v2146_v34, %v2132_v2  ;;  %v2167_v48 = vpop.permute.xlu1 %2166  ;;  %v2238_v2 = vrot.slane %v4310_v22, %v3579_v61  ;;  %v2242_v3 = vrot.slane %v4372_v59, %v3579_v61 }
 0x567   :  { %v2177_v0 = vmul.f32 %v2172_v37, %v2167_v48  ;;  %v2178_v36 = vmul.f32 %v2176_v13, %v2167_v48  ;;  %v2256_v34 = vrot.slane %v1679_v23, %v3558_v52  ;;  %v2251_v37 = vpop.permute.xlu0 %2250  ;;  %v2276_v22 = vrot.slane %v1680_v45, %v3561_v53 }
 0x568   :  { %v2163_v27 = vadd.f32 %v2161_v25, %v2147_v12  ;;  %v2164_v56 = vadd.f32 %v2162_v28, %v2148_v15  ;;  %v2260_v28 = vrot.slane %v1680_v45, %v3558_v52  ;;  %v2288_v42 = vrot.slane %v1679_v23, %v3576_v60 }
 0x569   :  { %v2261_v13 = vmul.f32 %v2256_v34, %v2251_v37  ;;  %v2292_v47 = vrot.slane %v1680_v45, %v3576_v60 }
 0x56a   :  { %v2179_v8 = vadd.f32 %v2177_v0, %v2163_v27  ;;  %v2180_v5 = vadd.f32 %v2178_v36, %v2164_v56  ;;  %v2262_v4 = vmul.f32 %v2260_v28, %v2251_v37  ;;  %v2272_v27 = vrot.slane %v1679_v23, %v3561_v53 }
 0x56b   :  { %v2185_v63 = vpop.permute.xlu1 %2184 }
 0x56c   :  { %v2195_v57 = vmul.f32 %v2190_v19, %v2185_v63  ;;  %v2196_v7 = vmul.f32 %v2194_v43, %v2185_v63  ;;  %v2304_v19 = vrot.slane %v1679_v23, %v3579_v61  ;;  %v2308_v43 = vrot.slane %v1680_v45, %v3579_v61  ;;  %v2299_v63 = vpop.permute.xlu0 %2298 }
 0x56e   :  { %v2197_v33 = vadd.f32 %v2195_v57, %v2179_v8  ;;  %v2198_v50 = vadd.f32 %v2196_v7, %v2180_v5 }
 0x570   :  { %v2217_v32 = vpop.permute.xlu1 %2216  ;;  %v2214_v6 = vadd.f32 %v2212_v35, %v2198_v50  ;;  %v2213_v41 = vadd.f32 %v2211_v58, %v2197_v33  ;;  %v2309_v35 = vmul.f32 %v2304_v19, %v2299_v63  ;;  %v2310_v33 = vmul.f32 %v2308_v43, %v2299_v63 }
 0x571   :  { %v2228_v30 = vmul.f32 %v2226_v38, %v2217_v32  ;;  %v2227_v17 = vmul.f32 %v2222_v29, %v2217_v32  ;;  %v5132_v32 = vld [vmem:[#allocation3_spill] sm:$0xff]  ;;  %v3359_v19 = vmov 7   ;;  %v3360_v43 = vmov 9  }
 0x572   :  { %3287 = vset.pattern.permute.xlu1 %v3359_v19  ;;  %3288 = vset.pattern.permute.xlu0 %v3360_v43 }
 0x573   :  { %v2230_v31 = vadd.f32 %v2228_v30, %v2214_v6  ;;  %v2229_v12 = vadd.f32 %v2227_v17, %v2213_v41 }
 0x575   :  { %v2233_v25 = vpop.permute.xlu1 %2232 }
 0x576   :  { %v2243_v15 = vmul.f32 %v2238_v2, %v2233_v25  ;;  %v2244_v44 = vmul.f32 %v2242_v3, %v2233_v25 }
 0x578   :  { %v2245_v9 = vadd.f32 %v2243_v15, %v2229_v12  ;;  %v2246_v48 = vadd.f32 %v2244_v44, %v2230_v31 }
 0x57a   :  { %v2267_v16 = vpop.permute.xlu1 %2266  ;;  %v2263_v56 = vadd.f32 %v2261_v13, %v2245_v9  ;;  %v2264_v59 = vadd.f32 %v2262_v4, %v2246_v48 }
 0x57b   :  { %v2277_v0 = vmul.f32 %v2272_v27, %v2267_v16  ;;  %v2278_v36 = vmul.f32 %v2276_v22, %v2267_v16 }
 0x57d   :  { %v2279_v5 = vadd.f32 %v2277_v0, %v2263_v56  ;;  %v2280_v57 = vadd.f32 %v2278_v36, %v2264_v59 }
 0x57f   :  { %v2283_v8 = vpop.permute.xlu1 %2282 }
 0x580   :  { %v2293_v7 = vmul.f32 %v2288_v42, %v2283_v8  ;;  %v2294_v1 = vmul.f32 %v2292_v47, %v2283_v8  ;;  %v4660_v42 = vld [vmem:[%s5070_s2] sm:$0xf] }
 0x582   :  { %v2295_v50 = vadd.f32 %v2293_v7, %v2279_v5  ;;  %v2296_v38 = vadd.f32 %v2294_v1, %v2280_v57 }
 0x584   :  { %v2311_v58 = vadd.f32 %v2309_v35, %v2295_v50  ;;  %v2312_v29 = vadd.f32 %v2310_v33, %v2296_v38  ;;  %v4673_v50 = vld [vmem:[%s5069_s1 + $0x2c] sm:$0xf]  ;;  %v3142_v38 = vld [vmem:[%s5069_s1 + $0x24] sm:$0xf] }
 0x586   :  { %v2313_v6 = vadd.f32 %v2311_v58, %v5132_v32  ;;  %v2314_v30 = vadd.f32 %v2312_v29, %v5132_v32 }
 0x588   :  { %v2315_v23 = vsel %vm784_vm9, %v2313_v6, 0.0  ;;  %v2316_v41 = vsel %vm784_vm9, %v2314_v30, 0.0 }
 0x589   :  { %v2317_v17 = vadd.f32 %v2316_v41, %v2315_v23 }
 0x58b   :  { %2318 = vadd.xlane.f32.xlu0 %v2317_v17 }
 0x5d0   :  { %v1574_v45 = vpop.xlane.xlu1 %1573 }
 0x5d1   :  { %v1575_v31 = vrot.slane %v1574_v45, 4 }
 0x5d3   :  { %v1576_v2 = vadd.f32 %v1575_v31, %v1574_v45 }
 0x5d5   :  { %v1577_v3 = vrot.slane %v1576_v2, 2 }
 0x5d7   :  { %v1578_v34 = vadd.f32 %v1577_v3, %v1576_v2 }
 0x5d9   :  { %v1579_v25 = vrot.slane %v1578_v34, 1 }
 0x5db   :  { %v1580_v28 = vadd.f32 %v1579_v25, %v1578_v34 }
 0x5dd   :  { %3158 = vpush %v1580_v28 }
 0x60e   :  { %s4664_s12 = spop %3158 }
 0x614   :  { %v2319_v12 = vpop.xlane.xlu0 %2318 }
 0x615   :  { %v2320_v15 = vmul.f32 0.00390625, %v2319_v12  ;;  %v2335_v44 = vrot.slane %v2319_v12, 4 }
 0x617   :  { %v2321_v9 = vsub.f32 %v2313_v6, %v2320_v15  ;;  %v2322_v48 = vsub.f32 %v2314_v30, %v2320_v15  ;;  %v2336_v37 = vadd.f32 %v2335_v44, %v2319_v12 }
 0x619   :  { %v2323_v13 = vmul.f32 %v2321_v9, %v2321_v9  ;;  %v2324_v4 = vmul.f32 %v2322_v48, %v2322_v48  ;;  %v2337_v16 = vrot.slane %v2336_v37, 2 }
 0x61b   :  { %v2325_v27 = vsel %vm784_vm9, %v2323_v13, 0.0  ;;  %v2326_v22 = vsel %vm784_vm9, %v2324_v4, 0.0  ;;  %v2338_v56 = vadd.f32 %v2337_v16, %v2336_v37  ;;  %v5133_v13 = vld [vmem:[#allocation5_spill] sm:$0xff] }
 0x61c   :  { %v2327_v59 = vadd.f32 %v2326_v22, %v2325_v27  ;;  %v5134_v27 = vld [vmem:[#allocation4_spill] sm:$0xff] }
 0x61d   :  { %v2339_v0 = vrot.slane %v2338_v56, 1 }
 0x61e   :  { %2328 = vadd.xlane.f32.xlu0 %v2327_v59 }
 0x61f   :  { %v2340_v36 = vadd.f32 %v2339_v0, %v2338_v56 }
 0x621   :  { %3160 = vpush %v2340_v36 }
 0x634   :  { %2379 = vperm.xlu0 %3288, %v4660_v42  }
 0x638   :  { %3295 = vset.pattern.permute.xlu0 %v5123_v55 }
 0x639   :  { %2583 = vperm.xlu0 %3295, %v4673_v50  }
 0x63d   :  { %3298 = vset.pattern.permute.xlu0 %v5120_v14 }
 0x63e   :  { %2631 = vperm.xlu0 %3298, %v4673_v50  }
 0x642   :  { %3299 = vset.pattern.permute.xlu0 %v5122_v46 }
 0x643   :  { %2483 = vperm.xlu0 %3299, %v3142_v38  }
 0x652   :  { %s3161_s13 = spop %3160 }
 0x653   :  { %v2342_v47 = vstv %s3161_s13 }
 0x654   :  { %v2343_v63 = vmul.f32 0.0009765625, %v2342_v47 }
 0x656   :  { %v2344_v8 = vsub.f32 %v2313_v6, %v2343_v63  ;;  %v2345_v5 = vsub.f32 %v2314_v30, %v2343_v63 }
 0x658   :  { %v2346_v57 = vmul.f32 %v2344_v8, %v2344_v8  ;;  %v2347_v7 = vmul.f32 %v2345_v5, %v2345_v5 }
 0x65a   :  { %v2348_v1 = vsel %vm784_vm9, %v2346_v57, 0.0  ;;  %v2349_v35 = vsel %vm784_vm9, %v2347_v7, 0.0  ;;  %v3145_v57 = vld [vmem:[%s5069_s1 + $0x30] sm:$0xf] }
 0x65b   :  { %v2350_v33 = vadd.f32 %v2349_v35, %v2348_v1 }
 0x65d   :  { %2351 = vadd.xlane.f32.xlu1 %v2350_v33 }
 0x66e   :  { %2373 = vperm.xlu1 %3287, %v4660_v42  }
 0x672   :  { %3289 = vset.pattern.permute.xlu1 %v5123_v55 }
 0x6a7   :  { %v2329_v17 = vpop.xlane.xlu0 %2328 }
 0x6a8   :  { %v2330_v45 = vmul.f32 0.003921569, %v2329_v17  ;;  %v3150_v17 = vld [vmem:[%s5069_s1 + $0x44] sm:$0xf] }
 0x6aa   :  { %v2331_v31 = vadd.f32 1e-05, %v2330_v45 }
 0x6ac   :  { %3332 = vrsqrt.f32 %v2331_v31 }
 0x6af   :  { %v4688_v19 = vpop.permute.xlu0 %2379 }
 0x6b0   :  { %5136 = vst [vmem:[#allocation2_spill] sm:$0xff] %v4688_v19 }
 0x6b9   :  { %v3333_v25 = vpop.eup %3332 }
 0x6ba   :  { %v2333_v28 = vmul.f32 %v3333_v25, %v2321_v9  ;;  %v2334_v12 = vmul.f32 %v3333_v25, %v2322_v48 }
 0x6bc   :  { %v2366_v4 = vmul.f32 %v2333_v28, %v5133_v13  ;;  %v2367_v16 = vmul.f32 %v2334_v12, %v5133_v13  ;;  %v4813_v12 = vpop.permute.xlu0 %2583 }
 0x6e6   :  { %v2352_v58 = vpop.xlane.xlu1 %2351 }
 0x6e7   :  { %v2353_v29 = vrot.slane %v2352_v58, 4 }
 0x6e9   :  { %v2354_v32 = vadd.f32 %v2353_v29, %v2352_v58 }
 0x6ea   :  { %v4686_v59 = vpop.permute.xlu1 %2373 }
 0x6eb   :  { %v2355_v6 = vrot.slane %v2354_v32, 2  ;;  %5135 = vst [vmem:[#allocation9_spill] sm:$0xff] %v4686_v59 }
 0x6ed   :  { %v2356_v30 = vadd.f32 %v2355_v6, %v2354_v32  ;;  %v3146_v32 = vld [vmem:[%s5069_s1 + $0x34] sm:$0xf]  ;;  %v3147_v6 = vld [vmem:[%s5069_s1 + $0x38] sm:$0xf] }
 0x6ef   :  { %v2357_v23 = vrot.slane %v2356_v30, 1 }
 0x6f1   :  { %v2358_v41 = vadd.f32 %v2357_v23, %v2356_v30 }
 0x6f3   :  { %3162 = vpush %v2358_v41  ;;  %v3148_v41 = vld [vmem:[%s5069_s1 + $0x3c] sm:$0xf] }
 0x724   :  { %s3163_s19 = spop %3162 }
 0x725   :  { %v2360_v2 = vstv %s3163_s19 }
 0x726   :  { %v2361_v3 = vmul.f32 0.0009775171, %v2360_v2 }
 0x728   :  { %v2362_v34 = vadd.f32 1e-05, %v2361_v3 }
 0x72a   :  { %3334 = vrsqrt.f32 %v2362_v34 }
 0x737   :  { %v3335_v15 = vpop.eup %3334 }
 0x738   :  { %v2364_v44 = vmul.f32 %v3335_v15, %v2344_v8  ;;  %v2365_v37 = vmul.f32 %v3335_v15, %v2345_v5  ;;  %v3143_v5 = vld [vmem:[%s5069_s1 + $0x28] sm:$0xf] }
 0x73a   :  { %v2368_v22 = vmul.f32 %v2364_v44, %v5134_v27  ;;  %v2369_v56 = vmul.f32 %v2365_v37, %v5134_v27  ;;  %v4817_v44 = vpop.permute.xlu0 %2631 }
 0x73c   :  { %v2370_v0 = vadd.f32 %v2368_v22, %v2366_v4  ;;  %v2371_v36 = vadd.f32 %v2369_v56, %v2367_v16 }
 0x73e   :  { %v2376_v9 = vmul.f32 %v4686_v59, %v2370_v0  ;;  %v2377_v48 = vmul.f32 %v4686_v59, %v2371_v36  ;;  %v2484_v13 = vpop.permute.xlu0 %2483 }
 0x740   :  { %v2382_v43 = vadd.f32 %v4688_v19, %v2376_v9  ;;  %v2383_v47 = vadd.f32 %v4688_v19, %v2377_v48 }
 0x742   :  { %v4694_v63 = vmax.f32 %v2382_v43, 0.0  ;;  %v4696_v8 = vmax.f32 %v2383_v47, 0.0 }
 0x744   :  { %2420 = vrot.lane.b32.xlu0 %v4696_v8, %s3356_s23  ;;  %2386 = vrot.lane.b32.xlu1 %v4694_v63, %s3352_s15 }
 0x748   :  { %2426 = vrot.lane.b32.xlu0 %v4696_v8, %s3355_s22  ;;  %2388 = vrot.lane.b32.xlu1 %v4696_v8, %s3352_s15 }
 0x74c   :  { %2392 = vrot.lane.b32.xlu1 %v4694_v63, %s3351_s14 }
 0x750   :  { %2394 = vrot.lane.b32.xlu1 %v4696_v8, %s3351_s14 }
 0x754   :  { %2453 = vperm.xlu1 %3289, %v3142_v38  }
 0x758   :  { %3290 = vset.pattern.permute.xlu1 %v5121_v18 }
 0x759   :  { %2467 = vperm.xlu1 %3290, %v3142_v38  }
 0x75d   :  { %3291 = vset.pattern.permute.xlu1 %v5120_v14 }
 0x75e   :  { %2499 = vperm.xlu1 %3291, %v3142_v38  }
 0x762   :  { %3292 = vset.pattern.permute.xlu1 %v5123_v55 }
 0x763   :  { %2517 = vperm.xlu1 %3292, %v3143_v5  }
 0x767   :  { %3293 = vset.pattern.permute.xlu1 %v5122_v46 }
 0x768   :  { %2549 = vperm.xlu1 %3293, %v3143_v5  }
 0x76c   :  { %3294 = vset.pattern.permute.xlu1 %v5120_v14 }
 0x76d   :  { %2565 = vperm.xlu1 %3294, %v3143_v5  }
 0x771   :  { %3296 = vset.pattern.permute.xlu1 %v5121_v18 }
 0x772   :  { %2599 = vperm.xlu1 %3296, %v4673_v50  }
 0x776   :  { %3297 = vset.pattern.permute.xlu1 %v5122_v46 }
 0x777   :  { %2615 = vperm.xlu1 %3297, %v4673_v50  }
 0x77b   :  { %3300 = vset.pattern.permute.xlu1 %v5123_v55 }
 0x77c   :  { %2649 = vperm.xlu1 %3300, %v3145_v57  }
 0x780   :  { %2418 = vrot.lane.b32.xlu1 %v4694_v63, %s3356_s23 }
 0x781   :  { %3301 = vset.pattern.permute.xlu1 %v5121_v18 }
 0x784   :  { %2424 = vrot.lane.b32.xlu1 %v4694_v63, %s3355_s22 }
 0x7b6   :  { %v2387_v7 = vpop.permute.xlu1 %2386  ;;  %v4821_v16 = vpop.permute.xlu0 %2420 }
 0x7ba   :  { %v2389_v1 = vpop.permute.xlu1 %2388  ;;  %v2427_v27 = vpop.permute.xlu0 %2426 }
 0x7bb   :  { %v4733_v50 = vsel %vm58_vm1, %v2387_v7, %v2389_v1  ;;  %v2391_v30 = vsel %vm58_vm1, %v2389_v1, %v2387_v7 }
 0x7be   :  { %v2393_v35 = vpop.permute.xlu1 %2392 }
 0x7c2   :  { %v2395_v33 = vpop.permute.xlu1 %2394 }
 0x7c3   :  { %v4737_v38 = vsel %vm41_vm0, %v2393_v35, %v2395_v33  ;;  %v2397_v58 = vsel %vm41_vm0, %v2395_v33, %v2393_v35 }
 0x7c4   :  { %v4744_v29 = vsel %vm41_vm0, %v4733_v50, %v2397_v58  ;;  %2404 = vrot.lane.b32.xlu1 %v4737_v38, %s3356_s23  ;;  %v4771_v23 = vsel %vm44_vm2, %v4737_v38, %v2391_v30  ;;  %v2527_v59 = vrot.slane %v4737_v38, %v3558_v52  ;;  %v2559_v21 = vrot.slane %v4737_v38, %v3576_v60 }
 0x7c5   :  { %2408 = vrot.lane.b32.xlu0 %v4744_v29, %s3355_s22  ;;  %v2523_v19 = vrot.slane %v4744_v29, %v3558_v52 }
 0x7c8   :  { %2410 = vrot.lane.b32.xlu1 %v4737_v38, %s3355_s22 }
 0x7c9   :  { %2681 = vperm.xlu0 %3299, %v3145_v57  }
 0x7cc   :  { %2402 = vrot.lane.b32.xlu1 %v4744_v29, %s3356_s23 }
 0x7cd   :  { %3302 = vset.pattern.permute.xlu0 %v5121_v18 }
 0x7ce   :  { %2533 = vperm.xlu0 %3302, %v3143_v5  }
 0x7cf   :  { %v2454_v45 = vpop.permute.xlu1 %2453 }
 0x7d0   :  { %2665 = vperm.xlu1 %3301, %v3145_v57  }
 0x7d2   :  { %2731 = vperm.xlu0 %3302, %v3146_v32  }
 0x7d4   :  { %3303 = vset.pattern.permute.xlu1 %v5120_v14  ;;  %v2468_v31 = vpop.permute.xlu1 %2467 }
 0x7d5   :  { %2697 = vperm.xlu1 %3303, %v3145_v57  }
 0x7d6   :  { %3307 = vset.pattern.permute.xlu0 %v5123_v55 }
 0x7d7   :  { %2781 = vperm.xlu0 %3307, %v3147_v6  }
 0x7d9   :  { %3304 = vset.pattern.permute.xlu1 %v5123_v55  ;;  %v2500_v2 = vpop.permute.xlu1 %2499 }
 0x7da   :  { %2715 = vperm.xlu1 %3304, %v3146_v32  }
 0x7db   :  { %3310 = vset.pattern.permute.xlu0 %v5120_v14 }
 0x7dc   :  { %2829 = vperm.xlu0 %3310, %v3147_v6  }
 0x7de   :  { %3305 = vset.pattern.permute.xlu1 %v5122_v46  ;;  %v2518_v3 = vpop.permute.xlu1 %2517 }
 0x7df   :  { %2747 = vperm.xlu1 %3305, %v3146_v32  }
 0x7e0   :  { %2436 = vrot.lane.b32.xlu0 %v4771_v23, %s3356_s23 }
 0x7e1   :  { %3313 = vset.pattern.permute.xlu0 %v5122_v46 }
 0x7e3   :  { %3306 = vset.pattern.permute.xlu1 %v5120_v14  ;;  %v4802_v34 = vpop.permute.xlu1 %2549 }
 0x7e4   :  { %2763 = vperm.xlu1 %3306, %v3146_v32   ;;  %2442 = vrot.lane.b32.xlu0 %v4771_v23, %s3355_s22 }
 0x7e8   :  { %3308 = vset.pattern.permute.xlu1 %v5121_v18  ;;  %2879 = vperm.xlu0 %3313, %v3148_v41   ;;  %v4805_v25 = vpop.permute.xlu1 %2565 }
 0x7e9   :  { %2797 = vperm.xlu1 %3308, %v3147_v6  }
 0x7ec   :  { %3316 = vset.pattern.permute.xlu0 %v5121_v18 }
 0x7ed   :  { %3309 = vset.pattern.permute.xlu1 %v5122_v46  ;;  %2929 = vperm.xlu0 %3316, %v3149_v24   ;;  %v4808_v28 = vpop.permute.xlu1 %2599 }
 0x7ee   :  { %2813 = vperm.xlu1 %3309, %v3147_v6  }
 0x7f1   :  { %3319 = vset.pattern.permute.xlu0 %v5123_v55 }
 0x7f2   :  { %3311 = vset.pattern.permute.xlu1 %v5123_v55  ;;  %2979 = vperm.xlu0 %3319, %v3150_v17  }
 0x7f3   :  { %2847 = vperm.xlu1 %3311, %v3148_v41  }
 0x7f6   :  { %3322 = vset.pattern.permute.xlu0 %v5120_v14 }
 0x7f7   :  { %2434 = vrot.lane.b32.xlu1 %v4733_v50, %s3356_s23  ;;  %3027 = vperm.xlu0 %3322, %v3150_v17  }
 0x7f8   :  { %3312 = vset.pattern.permute.xlu1 %v5121_v18 }
 0x7fb   :  { %2440 = vrot.lane.b32.xlu1 %v4733_v50, %s3355_s22 }
 0x7ff   :  { %2863 = vperm.xlu1 %3312, %v3148_v41  }
 0x803   :  { %3314 = vset.pattern.permute.xlu1 %v5120_v14 }
 0x804   :  { %2895 = vperm.xlu1 %3314, %v3148_v41  }
 0x808   :  { %3315 = vset.pattern.permute.xlu1 %v5123_v55  ;;  %v4811_v55 = vpop.permute.xlu1 %2615 }
 0x809   :  { %2913 = vperm.xlu1 %3315, %v3149_v24  }
 0x80c   :  { %v4815_v15 = vpop.permute.xlu1 %2649 }
 0x80d   :  { %3317 = vset.pattern.permute.xlu1 %v5122_v46 }
 0x80e   :  { %2945 = vperm.xlu1 %3317, %v3149_v24  }
 0x810   :  { %v4819_v37 = vpop.permute.xlu1 %2418 }
 0x812   :  { %3318 = vset.pattern.permute.xlu1 %v5120_v14 }
 0x813   :  { %2961 = vperm.xlu1 %3318, %v3149_v24  }
 0x814   :  { %v2425_v4 = vpop.permute.xlu1 %2424 }
 0x817   :  { %3320 = vset.pattern.permute.xlu1 %v5121_v18 }
 0x818   :  { %2995 = vperm.xlu1 %3320, %v3150_v17  }
 0x81c   :  { %3321 = vset.pattern.permute.xlu1 %v5122_v46 }
 0x81d   :  { %3011 = vperm.xlu1 %3321, %v3150_v17  }
 0x836   :  { %v2405_v18 = vpop.permute.xlu1 %2404 }
 0x837   :  { %v2409_v56 = vpop.permute.xlu0 %2408 }
 0x83a   :  { %v2411_v22 = vpop.permute.xlu1 %2410 }
 0x83b   :  { %v2412_v0 = vsel %vm90_vm4, %v2409_v56, %v2411_v22  ;;  %v2413_v36 = vsel %vm90_vm4, %v2411_v22, %v2409_v56 }
 0x83e   :  { %v2403_v46 = vpop.permute.xlu1 %2402 }
 0x83f   :  { %v2406_v9 = vsel %vm83_vm3, %v2403_v46, %v2405_v18  ;;  %v2407_v48 = vsel %vm83_vm3, %v2405_v18, %v2403_v46 }
 0x840   :  { %v2414_v43 = vsel %vm3563_vm6, %v2406_v9, %v2413_v36  ;;  %v2415_v47 = vsel %vm3553_vm5, %v2407_v48, %v2412_v0 }
 0x841   :  { %v2459_v5 = vrot.slane %v2414_v43, %v3558_v52  ;;  %v2463_v57 = vrot.slane %v2415_v47, %v3558_v52  ;;  %v2473_v7 = vrot.slane %v2414_v43, %v3561_v53  ;;  %v2477_v1 = vrot.slane %v2415_v47, %v3561_v53 }
 0x842   :  { %v2489_v35 = vrot.slane %v2414_v43, %v3576_v60  ;;  %v2493_v33 = vrot.slane %v2415_v47, %v3576_v60  ;;  %v2505_v24 = vrot.slane %v2414_v43, %v3579_v61  ;;  %v2509_v17 = vrot.slane %v2415_v47, %v3579_v61 }
 0x843   :  { %v2464_v58 = vmul.f32 %v2459_v5, %v2454_v45  ;;  %v2465_v32 = vmul.f32 %v2463_v57, %v2454_v45  ;;  %v2478_v6 = vmul.f32 %v2473_v7, %v2468_v31  ;;  %v2479_v30 = vmul.f32 %v2477_v1, %v2468_v31 }
 0x844   :  { %v4841_v41 = vpop.permute.xlu0 %2681  ;;  %v2494_v18 = vmul.f32 %v2489_v35, %v2484_v13  ;;  %v2495_v22 = vmul.f32 %v2493_v33, %v2484_v13  ;;  %v2539_v45 = vrot.slane %v4744_v29, %v3561_v53  ;;  %v2543_v31 = vrot.slane %v4737_v38, %v3561_v53 }
 0x845   :  { %v2480_v56 = vadd.f32 %v2478_v6, %v2464_v58  ;;  %v2481_v46 = vadd.f32 %v2479_v30, %v2465_v32  ;;  %v2510_v47 = vmul.f32 %v2505_v24, %v2500_v2  ;;  %v2511_v7 = vmul.f32 %v2509_v17, %v2500_v2 }
 0x846   :  { %v2528_v13 = vmul.f32 %v2523_v19, %v2518_v3  ;;  %v2529_v1 = vmul.f32 %v2527_v59, %v2518_v3  ;;  %v2555_v30 = vrot.slane %v4744_v29, %v3576_v60  ;;  %v2417_v2 = vsel %vm3597_vm7, %v2412_v0, %v2407_v48 }
 0x847   :  { %v2496_v43 = vadd.f32 %v2494_v18, %v2480_v56  ;;  %v2497_v57 = vadd.f32 %v2495_v22, %v2481_v46  ;;  %v2416_v18 = vsel %vm3605_vm8, %v2413_v36, %v2406_v9  ;;  %v2571_v59 = vrot.slane %v4744_v29, %v3579_v61 }
 0x848   :  { %v2575_v19 = vrot.slane %v4737_v38, %v3579_v61  ;;  %v2560_v17 = vmul.f32 %v2555_v30, %v4802_v34  ;;  %v2561_v22 = vmul.f32 %v2559_v21, %v4802_v34  ;;  %v4871_v56 = vsel %vm90_vm4, %v2425_v4, %v2427_v27 }
 0x849   :  { %v2534_v5 = vpop.permute.xlu0 %2533  ;;  %v2512_v33 = vadd.f32 %v2510_v47, %v2496_v43  ;;  %v2513_v58 = vadd.f32 %v2511_v7, %v2497_v57  ;;  %v4875_v36 = vsel %vm90_vm4, %v2427_v27, %v2425_v4  ;;  %v2589_v0 = vrot.slane %v2416_v18, %v3558_v52 }
 0x84a   :  { %v2544_v32 = vmul.f32 %v2539_v45, %v2534_v5  ;;  %v2545_v6 = vmul.f32 %v2543_v31, %v2534_v5  ;;  %v2593_v29 = vrot.slane %v2417_v2, %v3558_v52  ;;  %v2576_v46 = vmul.f32 %v2571_v59, %v4805_v25 }
 0x84b   :  { %v4853_v35 = vpop.permute.xlu1 %2665  ;;  %v2530_v3 = vadd.f32 %v2528_v13, %v2512_v33  ;;  %v2531_v24 = vadd.f32 %v2529_v1, %v2513_v58  ;;  %v2577_v5 = vmul.f32 %v2575_v19, %v4805_v25  ;;  %v4885_v21 = vsel %vm83_vm3, %v4819_v37, %v4821_v16 }
 0x84c   :  { %v4891_v34 = vsel %vm83_vm3, %v4821_v16, %v4819_v37  ;;  %v2605_v4 = vrot.slane %v2416_v18, %v3561_v53  ;;  %v2609_v27 = vrot.slane %v2417_v2, %v3561_v53  ;;  %v2430_v25 = vsel %vm3563_vm6, %v4885_v21, %v4875_v36 }
 0x84d   :  { %v2546_v9 = vadd.f32 %v2544_v32, %v2530_v3  ;;  %v2547_v38 = vadd.f32 %v2545_v6, %v2531_v24  ;;  %v2431_v43 = vsel %vm3553_vm5, %v4891_v34, %v4871_v56  ;;  %v2621_v57 = vrot.slane %v2416_v18, %v3576_v60 }
 0x84e   :  { %v2625_v37 = vrot.slane %v2417_v2, %v3576_v60  ;;  %v2594_v16 = vmul.f32 %v2589_v0, %v4813_v12  ;;  %v2595_v47 = vmul.f32 %v2593_v29, %v4813_v12  ;;  %v2637_v1 = vrot.slane %v2416_v18, %v3579_v61 }
 0x84f   :  { %v2562_v45 = vadd.f32 %v2560_v17, %v2546_v9  ;;  %v2563_v31 = vadd.f32 %v2561_v22, %v2547_v38  ;;  %v2641_v33 = vrot.slane %v2417_v2, %v3579_v61  ;;  %v2610_v32 = vmul.f32 %v2605_v4, %v4808_v28 }
 0x850   :  { %v2698_v48 = vpop.permute.xlu1 %2697  ;;  %v2611_v6 = vmul.f32 %v2609_v27, %v4808_v28  ;;  %v2655_v19 = vrot.slane %v2430_v25, %v3558_v52  ;;  %v2659_v3 = vrot.slane %v2431_v43, %v3558_v52  ;;  %v2626_v24 = vmul.f32 %v2621_v57, %v4811_v55 }
 0x851   :  { %v2578_v7 = vadd.f32 %v2576_v46, %v2562_v45  ;;  %v2579_v13 = vadd.f32 %v2577_v5, %v2563_v31  ;;  %v2627_v12 = vmul.f32 %v2625_v37, %v4811_v55  ;;  %v2642_v2 = vmul.f32 %v2637_v1, %v4817_v44 }
 0x852   :  { %v2643_v29 = vmul.f32 %v2641_v33, %v4817_v44  ;;  %v2671_v28 = vrot.slane %v2430_v25, %v3561_v53  ;;  %v2675_v38 = vrot.slane %v2431_v43, %v3561_v53  ;;  %v2660_v4 = vmul.f32 %v2655_v19, %v4815_v15 }
 0x853   :  { %v2596_v30 = vadd.f32 %v2594_v16, %v2578_v7  ;;  %v2597_v59 = vadd.f32 %v2595_v47, %v2579_v13  ;;  %v2661_v27 = vmul.f32 %v2659_v3, %v4815_v15  ;;  %v2687_v55 = vrot.slane %v2430_v25, %v3576_v60  ;;  %v2732_v16 = vpop.permute.xlu0 %2731 }
 0x854   :  { %v2691_v45 = vrot.slane %v2431_v43, %v3576_v60  ;;  %v2676_v37 = vmul.f32 %v2671_v28, %v4853_v35  ;;  %v2677_v44 = vmul.f32 %v2675_v38, %v4853_v35  ;;  %v2703_v47 = vrot.slane %v2430_v25, %v3579_v61 }
 0x855   :  { %v2716_v58 = vpop.permute.xlu1 %2715  ;;  %v2612_v17 = vadd.f32 %v2610_v32, %v2596_v30  ;;  %v2613_v22 = vadd.f32 %v2611_v6, %v2597_v59  ;;  %v2707_v7 = vrot.slane %v2431_v43, %v3579_v61  ;;  %v2692_v1 = vmul.f32 %v2687_v55, %v4841_v41 }
 0x856   :  { %v2693_v15 = vmul.f32 %v2691_v45, %v4841_v41  ;;  %v2725_v6 = vrot.slane %v4696_v8, %v3558_v52  ;;  %v2721_v30 = vrot.slane %v4694_v63, %v3558_v52  ;;  %v2708_v19 = vmul.f32 %v2703_v47, %v2698_v48 }
 0x857   :  { %v2628_v18 = vadd.f32 %v2626_v24, %v2612_v17  ;;  %v2629_v0 = vadd.f32 %v2627_v12, %v2613_v22  ;;  %v2709_v3 = vmul.f32 %v2707_v7, %v2698_v48  ;;  %v2741_v25 = vrot.slane %v4696_v8, %v3561_v53  ;;  %v2782_v12 = vpop.permute.xlu0 %2781 }
 0x858   :  { %v2737_v43 = vrot.slane %v4694_v63, %v3561_v53  ;;  %v2726_v17 = vmul.f32 %v2721_v30, %v2716_v58  ;;  %v2727_v22 = vmul.f32 %v2725_v6, %v2716_v58  ;;  %v2433_v48 = vsel %vm3597_vm7, %v4871_v56, %v4891_v34 }
 0x859   :  { %v2644_v46 = vadd.f32 %v2642_v2, %v2628_v18  ;;  %v2645_v5 = vadd.f32 %v2643_v29, %v2629_v0  ;;  %v2432_v0 = vsel %vm3605_vm8, %v4875_v36, %v4885_v21  ;;  %v2757_v2 = vrot.slane %v4696_v8, %v3576_v60 }
 0x85a   :  { %v2748_v9 = vpop.permute.xlu1 %2747  ;;  %v2753_v29 = vrot.slane %v4694_v63, %v3576_v60  ;;  %v2742_v28 = vmul.f32 %v2737_v43, %v2732_v16  ;;  %v2743_v38 = vmul.f32 %v2741_v25, %v2732_v16  ;;  %v2769_v36 = vrot.slane %v4694_v63, %v3579_v61 }
 0x85b   :  { %v2662_v31 = vadd.f32 %v2660_v4, %v2644_v46  ;;  %v2663_v57 = vadd.f32 %v2661_v27, %v2645_v5  ;;  %v2773_v5 = vrot.slane %v4696_v8, %v3579_v61  ;;  %v2759_v56 = vmul.f32 %v2757_v2, %v2748_v9 }
 0x85c   :  { %v2758_v27 = vmul.f32 %v2753_v29, %v2748_v9  ;;  %v2787_v34 = vrot.slane %v2432_v0, %v3558_v52  ;;  %v2791_v55 = vrot.slane %v2433_v48, %v3558_v52  ;;  %v2803_v63 = vrot.slane %v2432_v0, %v3561_v53 }
 0x85d   :  { %v2678_v33 = vadd.f32 %v2676_v37, %v2662_v31  ;;  %v2679_v32 = vadd.f32 %v2677_v44, %v2663_v57  ;;  %v2830_v31 = vpop.permute.xlu0 %2829 }
 0x85e   :  { %v2792_v47 = vmul.f32 %v2787_v34, %v2782_v12  ;;  %v2793_v7 = vmul.f32 %v2791_v55, %v2782_v12  ;;  %v2839_v12 = vrot.slane %v2433_v48, %v3579_v61 }
 0x85f   :  { %v2764_v13 = vpop.permute.xlu1 %2763  ;;  %v2694_v59 = vadd.f32 %v2692_v1, %v2678_v33  ;;  %v2695_v35 = vadd.f32 %v2693_v15, %v2679_v32  ;;  %v2807_v33 = vrot.slane %v2433_v48, %v3561_v53 }
 0x860   :  { %v2774_v44 = vmul.f32 %v2769_v36, %v2764_v13  ;;  %v2775_v16 = vmul.f32 %v2773_v5, %v2764_v13  ;;  %v2823_v13 = vrot.slane %v2433_v48, %v3576_v60 }
 0x861   :  { %v2710_v24 = vadd.f32 %v2708_v19, %v2694_v59  ;;  %v2711_v41 = vadd.f32 %v2709_v3, %v2695_v35  ;;  %v2437_v6 = vpop.permute.xlu0 %2436  ;;  %v2819_v3 = vrot.slane %v2432_v0, %v3576_v60 }
 0x863   :  { %v2728_v58 = vadd.f32 %v2726_v17, %v2710_v24  ;;  %v2729_v46 = vadd.f32 %v2727_v22, %v2711_v41  ;;  %v2835_v41 = vrot.slane %v2432_v0, %v3579_v61  ;;  %v2841_v0 = vmul.f32 %v2839_v12, %v2830_v31 }
 0x864   :  { %v2798_v18 = vpop.permute.xlu1 %2797 }
 0x865   :  { %v2745_v21 = vadd.f32 %v2743_v38, %v2729_v46  ;;  %v2744_v4 = vadd.f32 %v2742_v28, %v2728_v58  ;;  %v2808_v30 = vmul.f32 %v2803_v63, %v2798_v18  ;;  %v2809_v59 = vmul.f32 %v2807_v33, %v2798_v18  ;;  %v2443_v17 = vpop.permute.xlu0 %2442 }
 0x866   :  { %v2840_v46 = vmul.f32 %v2835_v41, %v2830_v31 }
 0x867   :  { %v2760_v57 = vadd.f32 %v2758_v27, %v2744_v4  ;;  %v2761_v37 = vadd.f32 %v2759_v56, %v2745_v21 }
 0x869   :  { %v2814_v45 = vpop.permute.xlu1 %2813  ;;  %v2776_v8 = vadd.f32 %v2774_v44, %v2760_v57  ;;  %v2777_v1 = vadd.f32 %v2775_v16, %v2761_v37  ;;  %v2880_v57 = vpop.permute.xlu0 %2879 }
 0x86a   :  { %v2824_v43 = vmul.f32 %v2819_v3, %v2814_v45  ;;  %v2825_v24 = vmul.f32 %v2823_v13, %v2814_v45  ;;  %v2939_v13 = vrot.slane %v4771_v23, %v3561_v53 }
 0x86b   :  { %v2795_v15 = vadd.f32 %v2793_v7, %v2777_v1  ;;  %v2794_v9 = vadd.f32 %v2792_v47, %v2776_v8 }
 0x86d   :  { %v2810_v35 = vadd.f32 %v2808_v30, %v2794_v9  ;;  %v2811_v19 = vadd.f32 %v2809_v59, %v2795_v15  ;;  %v2919_v59 = vrot.slane %v4733_v50, %v3558_v52  ;;  %v2930_v3 = vpop.permute.xlu0 %2929 }
 0x86e   :  { %v2848_v32 = vpop.permute.xlu1 %2847 }
 0x86f   :  { %v2826_v22 = vadd.f32 %v2824_v43, %v2810_v35  ;;  %v2827_v2 = vadd.f32 %v2825_v24, %v2811_v19  ;;  %v2923_v35 = vrot.slane %v4771_v23, %v3558_v52  ;;  %v2935_v19 = vrot.slane %v4733_v50, %v3561_v53 }
 0x871   :  { %v2842_v4 = vadd.f32 %v2840_v46, %v2826_v22  ;;  %v2843_v27 = vadd.f32 %v2841_v0, %v2827_v2  ;;  %v2941_v22 = vmul.f32 %v2939_v13, %v2930_v3  ;;  %v2951_v46 = vrot.slane %v4733_v50, %v3576_v60 }
 0x872   :  { %v2435_v25 = vpop.permute.xlu1 %2434  ;;  %v2955_v0 = vrot.slane %v4771_v23, %v3576_v60 }
 0x873   :  { %v2438_v18 = vsel %vm83_vm3, %v2435_v25, %v2437_v6  ;;  %v2439_v28 = vsel %vm83_vm3, %v2437_v6, %v2435_v25 }
 0x876   :  { %v2441_v29 = vpop.permute.xlu1 %2440 }
 0x877   :  { %v2444_v38 = vsel %vm90_vm4, %v2441_v29, %v2443_v17  ;;  %v2445_v58 = vsel %vm90_vm4, %v2443_v17, %v2441_v29  ;;  %v2940_v17 = vmul.f32 %v2935_v19, %v2930_v3 }
 0x878   :  { %v2446_v48 = vsel %vm3563_vm6, %v2438_v18, %v2445_v58  ;;  %v2447_v5 = vsel %vm3553_vm5, %v2439_v28, %v2444_v38 }
 0x879   :  { %v2853_v36 = vrot.slane %v2446_v48, %v3558_v52  ;;  %v2857_v21 = vrot.slane %v2447_v5, %v3558_v52  ;;  %v2885_v56 = vrot.slane %v2446_v48, %v3576_v60  ;;  %v2889_v34 = vrot.slane %v2447_v5, %v3576_v60 }
 0x87a   :  { %v2864_v10 = vpop.permute.xlu1 %2863  ;;  %v2869_v31 = vrot.slane %v2446_v48, %v3561_v53  ;;  %v2873_v54 = vrot.slane %v2447_v5, %v3561_v53  ;;  %v2901_v15 = vrot.slane %v2446_v48, %v3579_v61  ;;  %v2905_v63 = vrot.slane %v2447_v5, %v3579_v61 }
 0x87b   :  { %v2858_v55 = vmul.f32 %v2853_v36, %v2848_v32  ;;  %v2859_v45 = vmul.f32 %v2857_v21, %v2848_v32  ;;  %v2890_v47 = vmul.f32 %v2885_v56, %v2880_v57  ;;  %v2891_v7 = vmul.f32 %v2889_v34, %v2880_v57 }
 0x87c   :  { %v2874_v44 = vmul.f32 %v2869_v31, %v2864_v10  ;;  %v2875_v16 = vmul.f32 %v2873_v54, %v2864_v10  ;;  %v2449_v56 = vsel %vm3597_vm7, %v2444_v38, %v2439_v28 }
 0x87d   :  { %v2861_v51 = vadd.f32 %v2859_v45, %v2843_v27  ;;  %v2860_v37 = vadd.f32 %v2858_v55, %v2842_v4  ;;  %v2448_v27 = vsel %vm3605_vm8, %v2445_v58, %v2438_v18  ;;  %v2967_v55 = vrot.slane %v4733_v50, %v3579_v61  ;;  %v2980_v58 = vpop.permute.xlu0 %2979 }
 0x87e   :  { %v2971_v45 = vrot.slane %v4771_v23, %v3579_v61  ;;  %v2985_v54 = vrot.slane %v2448_v27, %v3558_v52  ;;  %v2989_v57 = vrot.slane %v2449_v56, %v3558_v52  ;;  %v3001_v38 = vrot.slane %v2448_v27, %v3561_v53 }
 0x87f   :  { %v2876_v8 = vadd.f32 %v2874_v44, %v2860_v37  ;;  %v2877_v1 = vadd.f32 %v2875_v16, %v2861_v51  ;;  %v2896_v33 = vpop.permute.xlu1 %2895  ;;  %v3005_v44 = vrot.slane %v2449_v56, %v3561_v53  ;;  %v3037_v52 = vrot.slane %v2449_v56, %v3579_v61 }
 0x880   :  { %v2906_v6 = vmul.f32 %v2901_v15, %v2896_v33  ;;  %v2907_v30 = vmul.f32 %v2905_v63, %v2896_v33  ;;  %v2990_v26 = vmul.f32 %v2985_v54, %v2980_v58  ;;  %v2991_v28 = vmul.f32 %v2989_v57, %v2980_v58 }
 0x881   :  { %v2893_v9 = vadd.f32 %v2891_v7, %v2877_v1  ;;  %v2892_v32 = vadd.f32 %v2890_v47, %v2876_v8  ;;  %v3033_v8 = vrot.slane %v2448_v27, %v3579_v61  ;;  %v3017_v1 = vrot.slane %v2448_v27, %v3576_v60  ;;  %v3028_v63 = vpop.permute.xlu0 %3027 }
 0x882   :  { %v3021_v15 = vrot.slane %v2449_v56, %v3576_v60 }
 0x883   :  { %v2908_v43 = vadd.f32 %v2906_v6, %v2892_v32  ;;  %v2909_v24 = vadd.f32 %v2907_v30, %v2893_v9  ;;  %v3038_v53 = vmul.f32 %v3033_v8, %v3028_v63 }
 0x884   :  { %v2914_v25 = vpop.permute.xlu1 %2913 }
 0x885   :  { %v2924_v41 = vmul.f32 %v2919_v59, %v2914_v25  ;;  %v2925_v12 = vmul.f32 %v2923_v35, %v2914_v25  ;;  %v3039_v59 = vmul.f32 %v3037_v52, %v3028_v63 }
 0x887   :  { %v2926_v2 = vadd.f32 %v2924_v41, %v2908_v43  ;;  %v2927_v29 = vadd.f32 %v2925_v12, %v2909_v24  ;;  %v3361_v41 = vmov 5   ;;  %v3362_v12 = vmov 4  }
 0x888   :  { %3324 = vset.pattern.permute.xlu1 %v3361_v41  ;;  %3323 = vset.pattern.permute.xlu0 %v3362_v12  ;;  %v5138_v41 = vld [vmem:[#allocation6_spill] sm:$0xff] }
 0x889   :  { %v2943_v48 = vadd.f32 %v2941_v22, %v2927_v29  ;;  %v2946_v5 = vpop.permute.xlu1 %2945  ;;  %v2942_v36 = vadd.f32 %v2940_v17, %v2926_v2 }
 0x88a   :  { %v2956_v21 = vmul.f32 %v2951_v46, %v2946_v5  ;;  %v2957_v4 = vmul.f32 %v2955_v0, %v2946_v5 }
 0x88c   :  { %v2958_v34 = vadd.f32 %v2956_v21, %v2942_v36  ;;  %v2959_v10 = vadd.f32 %v2957_v4, %v2943_v48 }
 0x88e   :  { %v2962_v31 = vpop.permute.xlu1 %2961 }
 0x88f   :  { %v2972_v51 = vmul.f32 %v2967_v55, %v2962_v31  ;;  %v2973_v37 = vmul.f32 %v2971_v45, %v2962_v31 }
 0x891   :  { %v2974_v49 = vadd.f32 %v2972_v51, %v2958_v34  ;;  %v2975_v18 = vadd.f32 %v2973_v37, %v2959_v10  ;;  %v1542_v10 = vmul.f32 0.00390625, %v4475_v11 }
 0x893   :  { %v2996_v50 = vpop.permute.xlu1 %2995  ;;  %v2993_v16 = vadd.f32 %v2991_v28, %v2975_v18  ;;  %v2992_v47 = vadd.f32 %v2990_v26, %v2974_v49  ;;  %v1543_v45 = vsub.f32 %v4343_v40, %v1542_v10  ;;  %v1544_v31 = vsub.f32 %v4346_v62, %v1542_v10 }
 0x894   :  { %v3006_v23 = vmul.f32 %v3001_v38, %v2996_v50  ;;  %v3007_v7 = vmul.f32 %v3005_v44, %v2996_v50  ;;  %v1582_v44 = vstv %s4664_s12 }
 0x895   :  { %v1545_v18 = vmul.f32 %v1543_v45, %v1543_v45  ;;  %v1546_v11 = vmul.f32 %v1544_v31, %v1544_v31  ;;  %v1583_v50 = vmul.f32 0.0009775171, %v1582_v44 }
 0x896   :  { %v3008_v9 = vadd.f32 %v3006_v23, %v2992_v47  ;;  %v3009_v32 = vadd.f32 %v3007_v7, %v2993_v16 }
 0x897   :  { %v1547_v62 = vsel %vm784_vm9, %v1545_v18, 0.0  ;;  %v1548_v28 = vsel %vm784_vm9, %v1546_v11, 0.0  ;;  %v1584_v23 = vadd.f32 1e-05, %v1583_v50 }
 0x898   :  { %v3012_v33 = vpop.permute.xlu1 %3011  ;;  %v1549_v38 = vadd.f32 %v1548_v28, %v1547_v62  ;;  %v5141_v28 = vld [vmem:[#allocation2_spill] sm:$0xff] }
 0x899   :  { %v3022_v6 = vmul.f32 %v3017_v1, %v3012_v33  ;;  %v3023_v30 = vmul.f32 %v3021_v15, %v3012_v33  ;;  %3336 = vrsqrt.f32 %v1584_v23 }
 0x89b   :  { %v3024_v35 = vadd.f32 %v3022_v6, %v3008_v9  ;;  %v3025_v19 = vadd.f32 %v3023_v30, %v3009_v32 }
 0x89d   :  { %v3040_v3 = vadd.f32 %v3038_v53, %v3024_v35  ;;  %v3041_v13 = vadd.f32 %v3039_v59, %v3025_v19  ;;  %v5137_v53 = vld [vmem:[#allocation8_spill] sm:$0xff] }
 0x89f   :  { %v3042_v25 = vadd.f32 %v3040_v3, %v4284_v39  ;;  %v3043_v61 = vadd.f32 %v3041_v13, %v4284_v39 }
 0x8a1   :  { %v3044_v43 = vsel %vm784_vm9, %v3042_v25, 0.0  ;;  %v3045_v60 = vsel %vm784_vm9, %v3043_v61, 0.0 }
 0x8a2   :  { %v3046_v24 = vadd.f32 %v3045_v60, %v3044_v43 }
 0x8a4   :  { %3047 = vadd.xlane.f32.xlu1 %v3046_v24 }
 0x92d   :  { %v3048_v17 = vpop.xlane.xlu1 %3047 }
 0x92e   :  { %v3049_v22 = vmul.f32 0.00390625, %v3048_v17  ;;  %v3064_v2 = vrot.slane %v3048_v17, 4 }
 0x930   :  { %v5013_v29 = vsub.f32 %v3042_v25, %v3049_v22  ;;  %v5015_v46 = vsub.f32 %v3043_v61, %v3049_v22  ;;  %v3065_v0 = vadd.f32 %v3064_v2, %v3048_v17  ;;  %v5139_v22 = vld [vmem:[#allocation7_spill] sm:$0xff] }
 0x932   :  { %v3052_v39 = vmul.f32 %v5013_v29, %v5013_v29  ;;  %v3053_v48 = vmul.f32 %v5015_v46, %v5015_v46  ;;  %v3066_v5 = vrot.slane %v3065_v0, 2 }
 0x934   :  { %v3054_v36 = vsel %vm784_vm9, %v3052_v39, 0.0  ;;  %v3055_v21 = vsel %vm784_vm9, %v3053_v48, 0.0  ;;  %v3067_v4 = vadd.f32 %v3066_v5, %v3065_v0  ;;  %v3347_v39 = vld [vmem:[%s5068_s0] sm:$0xff] }
 0x935   :  { %v3056_v27 = vadd.f32 %v3055_v21, %v3054_v36 }
 0x936   :  { %v3068_v56 = vrot.slane %v3067_v4, 1 }
 0x937   :  { %3057 = vadd.xlane.f32.xlu1 %v3056_v27 }
 0x938   :  { %v3069_v34 = vadd.f32 %v3068_v56, %v3067_v4 }
 0x93a   :  { %3164 = vpush %v3069_v34 }
 0x948   :  { %1595 = vperm.xlu1 %3324, %v4660_v42  }
 0x96b   :  { %s3165_s1 = spop %3164 }
 0x96c   :  { %v3071_v55 = vstv %s3165_s1 }
 0x96d   :  { %v3072_v54 = vmul.f32 0.0009765625, %v3071_v55 }
 0x96f   :  { %v5027_v57 = vsub.f32 %v3042_v25, %v3072_v54  ;;  %v5029_v51 = vsub.f32 %v3043_v61, %v3072_v54 }
 0x971   :  { %v3075_v37 = vmul.f32 %v5027_v57, %v5027_v57  ;;  %v3076_v49 = vmul.f32 %v5029_v51, %v5029_v51 }
 0x973   :  { %v3077_v58 = vsel %vm784_vm9, %v3075_v37, 0.0  ;;  %v3078_v40 = vsel %vm784_vm9, %v3076_v49, 0.0 }
 0x974   :  { %v3079_v26 = vadd.f32 %v3078_v40, %v3077_v58  ;;  %v5140_v40 = vld [vmem:[#allocation9_spill] sm:$0xff] }
 0x976   :  { %3080 = vadd.xlane.f32.xlu0 %v3079_v26 }
 0x97a   :  { %1550 = vadd.xlane.f32.xlu0 %v1549_v38 }
 0x990   :  { %1589 = vperm.xlu0 %3323, %v4660_v42   ;;  %v3337_v42 = vpop.eup %3336 }
 0x991   :  { %v1586_v30 = vmul.f32 %v3337_v42, %v4572_v20  ;;  %v1587_v59 = vmul.f32 %v3337_v42, %v5137_v53 }
 0x994   :  { %3325 = vset.pattern.permute.xlu0 %v5120_v14 }
 0x9c0   :  { %v3058_v32 = vpop.xlane.xlu1 %3057 }
 0x9c1   :  { %v3059_v5 = vmul.f32 0.003921569, %v3058_v32 }
 0x9c3   :  { %v3060_v36 = vadd.f32 1e-05, %v3059_v5 }
 0x9c4   :  { %v1596_v14 = vpop.permute.xlu1 %1595 }
 0x9c5   :  { %v1598_v13 = vmul.f32 %v1596_v14, %v1586_v30  ;;  %v1599_v25 = vmul.f32 %v1596_v14, %v1587_v59 }
 0x9ff   :  { %v3081_v16 = vpop.xlane.xlu0 %3080 }
 0xa00   :  { %v3082_v47 = vrot.slane %v3081_v16, 4 }
 0xa02   :  { %v3083_v7 = vadd.f32 %v3082_v47, %v3081_v16 }
 0xa03   :  { %v1551_v8 = vpop.xlane.xlu0 %1550 }
 0xa04   :  { %v3084_v52 = vrot.slane %v3083_v7, 2  ;;  %v1552_v1 = vmul.f32 0.003921569, %v1551_v8 }
 0xa06   :  { %v1553_v15 = vadd.f32 1e-05, %v1552_v1  ;;  %v3085_v63 = vadd.f32 %v3084_v52, %v3083_v7 }
 0xa08   :  { %3338 = vrsqrt.f32 %v1553_v15  ;;  %v3086_v33 = vrot.slane %v3085_v63, 1 }
 0xa09   :  { %3340 = vrsqrt.f32 %v3060_v36 }
 0xa0a   :  { %v3087_v9 = vadd.f32 %v3086_v33, %v3085_v63 }
 0xa0b   :  { %v1590_v3 = vpop.permute.xlu0 %1589 }
 0xa0c   :  { %3166 = vpush %v3087_v9 }
 0xa15   :  { %v3339_v6 = vpop.eup %3338 }
 0xa16   :  { %v1555_v35 = vmul.f32 %v3339_v6, %v1543_v45  ;;  %v1556_v19 = vmul.f32 %v3339_v6, %v1544_v31  ;;  %v3341_v56 = vpop.eup %3340 }
 0xa17   :  { %v3062_v10 = vmul.f32 %v3341_v56, %v5013_v29  ;;  %v3063_v55 = vmul.f32 %v3341_v56, %v5015_v46  ;;  %v3348_v46 = vld [vmem:[%s5068_s0 + $0x8] sm:$0xff] }
 0xa18   :  { %v1592_v61 = vmul.f32 %v1590_v3, %v1555_v35  ;;  %v1593_v43 = vmul.f32 %v1590_v3, %v1556_v19 }
 0xa19   :  { %v3095_v54 = vmul.f32 %v3062_v10, %v1590_v3  ;;  %v3096_v37 = vmul.f32 %v3063_v55, %v1590_v3 }
 0xa1a   :  { %v1600_v60 = vadd.f32 %v1598_v13, %v1592_v61  ;;  %v1601_v24 = vadd.f32 %v1599_v25, %v1593_v43 }
 0xa1c   :  { %v1602_v12 = vmul.f32 %v1600_v60, %v5138_v41  ;;  %v1603_v17 = vmul.f32 %v1601_v24, %v5138_v41 }
 0xa1e   :  { %v1604_v2 = vadd.f32 %v1602_v12, %v5139_v22  ;;  %v1605_v0 = vadd.f32 %v1603_v17, %v5139_v22 }
 0xa20   :  { %v1608_v20 = vcombine.low %v1604_v2, %v1605_v0 }
 0xa22   :  { %v1610_v48 = vadd.f32 %v3347_v39, %v1608_v20 }
 0xa24   :  { %1611 = vst [vmem:[%s5071_s3] sm:$0xff] %v1610_v48 }
 0xa3d   :  { %s3167_s9 = spop %3166 }
 0xa3e   :  { %v3089_v21 = vstv %s3167_s9 }
 0xa3f   :  { %v3090_v4 = vmul.f32 0.0009775171, %v3089_v21 }
 0xa41   :  { %v3091_v27 = vadd.f32 1e-05, %v3090_v4 }
 0xa43   :  { %3342 = vrsqrt.f32 %v3091_v27 }
 0xa50   :  { %v3343_v34 = vpop.eup %3342 }
 0xa51   :  { %v3093_v45 = vmul.f32 %v3343_v34, %v5027_v57  ;;  %v3094_v31 = vmul.f32 %v3343_v34, %v5029_v51 }
 0xa53   :  { %v3097_v49 = vmul.f32 %v3093_v45, %v1596_v14  ;;  %v3098_v18 = vmul.f32 %v3094_v31, %v1596_v14 }
 0xa55   :  { %v3099_v11 = vadd.f32 %v3097_v49, %v3095_v54  ;;  %v3100_v58 = vadd.f32 %v3098_v18, %v3096_v37 }
 0xa57   :  { %v3101_v26 = vmul.f32 %v3099_v11, %v5140_v40  ;;  %v3102_v62 = vmul.f32 %v3100_v58, %v5140_v40 }
 0xa59   :  { %v3103_v38 = vadd.f32 %v3101_v26, %v5141_v28  ;;  %v3104_v29 = vadd.f32 %v3102_v62, %v5141_v28 }
 0xa5b   :  { %v3107_v44 = vcombine.low %v3103_v38, %v3104_v29 }
 0xa5d   :  { %v3109_v57 = vadd.f32 %v3348_v46, %v3107_v44 }
 0xa5f   :  { %3151 = vst [vmem:[%s5071_s3 + $0x8] sm:$0xff] %v3109_v57 }

</bundles_post_ra>
